<compile_context>
chip_gen: v7x
topology: tpu7x:2x2x1
jax: 0.10.0
libtpu: 0.0.40
codegen_flags: <defaults>
</compile_context>

<pallas_src>
import math
import numpy as np
import jax
import jax.numpy as jnp
from jax import lax
from jax.experimental import pallas as pl
from jax.experimental.pallas import tpu as pltpu

# ----- static problem sizes (consistent with the module) -----
B = 2             # batch
IN_CH = 4         # in_channel
NUM_CLASSES = 10  # num_classes
H = W = 16        # input spatial

C1 = 32           # conv1 out channels
C2 = 64           # conv2 out channels
K1 = 5            # conv1 kernel
K2 = 3            # conv2 kernel
H1 = H + 2 * 1 - K1 + 1     # conv1 out: 14 (kernel 5, pad 1, stride 1)
HP = H1 // 2                # after maxpool(2): 7
H2 = HP + 2 * 1 - K2 + 1    # conv2 out: 7 (kernel 3, pad 1, stride 1)
POOL = 4                    # adaptive avg pool output

K1_FLAT = K1 * K1 * IN_CH   # 100
K1_PAD = 128                # lane-dense K for conv1 im2col
K2_FLAT = K2 * K2 * C1      # 288
FC_IN = POOL * POOL * C2    # 1024


def _adaptive_bins(in_size, out_size):
    """PyTorch AdaptiveAvgPool bins: [floor(i*in/out), ceil((i+1)*in/out))."""
    return [((i * in_size) // out_size, math.ceil((i + 1) * in_size / out_size))
            for i in range(out_size)]


_BINS = _adaptive_bins(H2, POOL)


# ----------------------------- Pallas kernel -----------------------------
def tonynet_kernel(p1_ref, w1_ref, b1_ref, w2_ref, b2_ref, wfc_ref, bfc_ref, o_ref):
    # p1_ref:  (B*H1*H1, 128)  conv1 im2col patches (K zero-padded 100->128)
    # w1_ref:  (128, C1)       conv1 weight, (kh,kw,cin)-flattened rows, zero-padded
    # b1_ref:  (1, C1)
    # w2_ref:  (K2_FLAT, C2)   conv2 weight, (kh,kw,cin)-flattened rows
    # b2_ref:  (1, C2)
    # wfc_ref: (FC_IN, NUM_CLASSES)  fc weight in (pool_h, pool_w, channel) row order
    # bfc_ref: (1, NUM_CLASSES)
    # o_ref:   (B, NUM_CLASSES)

    # ---- conv1: one im2col matmul (batch folded into M) + bias + ReLU ----
    h1 = jnp.dot(p1_ref[...], w1_ref[...], preferred_element_type=jnp.float32)
    h1 = jnp.maximum(h1 + b1_ref[...], 0.0)                  # (B*H1*H1, C1)

    # ---- maxpool 2x2 stride 2 (14 -> 7), batched ----
    h1 = h1.reshape(B, H1, H1, C1)
    hp = h1.reshape(B, HP, 2, H1, C1).max(axis=2)            # pool rows
    hp = hp.reshape(B, HP, HP, 2, C1).max(axis=3)            # pool cols -> (B,7,7,C1)

    # ---- conv2: value-level zero pad, im2col via lane-concat of the 9 taps,
    #      then a single (B*49, 288) @ (288, 64) matmul ----
    zc = jnp.zeros((B, HP, 1, C1), jnp.float32)
    hp_w = jnp.concatenate([zc, hp, zc], axis=2)             # (B, 7, 9, C1)
    zr = jnp.zeros((B, 1, HP + 2, C1), jnp.float32)
    hp_pad = jnp.concatenate([zr, hp_w, zr], axis=1)         # (B, 9, 9, C1)
    patches2 = jnp.concatenate(
        [hp_pad[:, kh:kh + H2, kw:kw + H2, :]
         for kh in range(K2) for kw in range(K2)],
        axis=-1)                                             # (B, 7, 7, 288)
    h2 = jnp.dot(patches2.reshape(B * H2 * H2, K2_FLAT), w2_ref[...],
                 preferred_element_type=jnp.float32)
    h2 = jnp.maximum(h2 + b2_ref[...], 0.0)                  # (B*49, C2)
    h2 = h2.reshape(B, H2, H2, C2)

    # ---- adaptive avg pool (7 -> 4, PyTorch bins): 16 block means concatenated
    #      along lanes into (B, 1024), then ONE FC matmul ----
    feats = []
    for (rs, re) in _BINS:
        for (cs, ce) in _BINS:
            blk = h2[:, rs:re, cs:ce, :]                     # (B, rh, rw, C2)
            s = blk.sum(axis=1).sum(axis=1)                  # (B, C2)
            feats.append(s * (1.0 / ((re - rs) * (ce - cs))))
    feat = jnp.concatenate(feats, axis=-1)                   # (B, FC_IN)

    logits = jnp.dot(feat, wfc_ref[...], preferred_element_type=jnp.float32)
    o_ref[...] = (logits + bfc_ref[...]).astype(o_ref.dtype)


# ------------------------------- wrapper ----------------------------------
def tonynet_forward(x_nchw, params):
    w1, b1, w2, b2, wfc_t, bfc = params  # wfc_t: (NUM_CLASSES, C2*POOL*POOL), CHW order

    x = jnp.transpose(x_nchw, (0, 2, 3, 1)).astype(jnp.float32)   # NCHW -> NHWC
    x_pad = jnp.pad(x, ((0, 0), (1, 1), (1, 1), (0, 0)))          # conv1 pad=1

    # conv1 im2col in the wrapper (XLA handles the strided gather); pad K to 128
    # so the kernel sees a lane-dense operand.
    cols = [x_pad[:, kh:kh + H1, kw:kw + H1, :]
            for kh in range(K1) for kw in range(K1)]
    patches1 = jnp.concatenate(cols, axis=-1).reshape(B * H1 * H1, K1_FLAT)
    patches1 = jnp.pad(patches1, ((0, 0), (0, K1_PAD - K1_FLAT)))

    w1_flat = jnp.pad(w1.reshape(K1_FLAT, C1), ((0, K1_PAD - K1_FLAT), (0, 0)))
    w2_flat = w2.reshape(K2_FLAT, C2)

    # permute fc weight from PyTorch CHW-flatten rows to the kernel's HWC-flatten rows
    wfc_hwc = (wfc_t.T.reshape(C2, POOL, POOL, NUM_CLASSES)
               .transpose(1, 2, 0, 3)
               .reshape(FC_IN, NUM_CLASSES))

    b1_2d = b1.reshape(1, C1)
    b2_2d = b2.reshape(1, C2)
    bfc_2d = bfc.reshape(1, NUM_CLASSES)

    grid_spec = pltpu.PrefetchScalarGridSpec(
        num_scalar_prefetch=0,
        grid=(1,),
        in_specs=[
            pl.BlockSpec((B * H1 * H1, K1_PAD), lambda i: (0, 0)),
            pl.BlockSpec((K1_PAD, C1), lambda i: (0, 0)),
            pl.BlockSpec((1, C1), lambda i: (0, 0)),
            pl.BlockSpec((K2_FLAT, C2), lambda i: (0, 0)),
            pl.BlockSpec((1, C2), lambda i: (0, 0)),
            pl.BlockSpec((FC_IN, NUM_CLASSES), lambda i: (0, 0)),
            pl.BlockSpec((1, NUM_CLASSES), lambda i: (0, 0)),
        ],
        out_specs=pl.BlockSpec((B, NUM_CLASSES), lambda i: (0, 0)),
    )

    return pl.pallas_call(
        tonynet_kernel,
        out_shape=jax.ShapeDtypeStruct((B, NUM_CLASSES), jnp.float32),
        grid_spec=grid_spec,
        compiler_params=pltpu.CompilerParams(dimension_semantics=("arbitrary",)),
    )(patches1, w1_flat, b1_2d, w2_flat, b2_2d, wfc_hwc, bfc_2d)


# ----------------------- pure-JAX reference (for checking) -----------------------
def ref_forward(x_nchw, params):
    w1, b1, w2, b2, wfc_t, bfc = params
    x = jnp.transpose(x_nchw, (0, 2, 3, 1)).astype(jnp.float32)
    y = lax.conv_general_dilated(x, w1, (1, 1), ((1, 1), (1, 1)),
                                 dimension_numbers=('NHWC', 'HWIO', 'NHWC'))
    y = jax.nn.relu(y + b1)
    y = lax.reduce_window(y, -jnp.inf, lax.max, (1, 2, 2, 1), (1, 2, 2, 1), 'VALID')
    y = lax.conv_general_dilated(y, w2, (1, 1), ((1, 1), (1, 1)),
                                 dimension_numbers=('NHWC', 'HWIO', 'NHWC'))
    y = jax.nn.relu(y + b2)
    pooled = jnp.stack(
        [jnp.stack([y[:, rs:re, cs:ce, :].mean(axis=(1, 2)) for (cs, ce) in _BINS],
                   axis=1) for (rs, re) in _BINS], axis=1)   # (B, 4, 4, C2)
    flat = jnp.transpose(pooled, (0, 3, 1, 2)).reshape(x.shape[0], -1)  # CHW flatten
    return flat @ wfc_t.T + bfc


# --------------------------------- main -----------------------------------
if __name__ == "__main__":
    key = jax.random.PRNGKey(0)
    ks = jax.random.split(key, 7)
    w1 = jax.random.normal(ks[0], (K1, K1, IN_CH, C1), jnp.float32) * 0.10
    b1 = jax.random.normal(ks[1], (C1,), jnp.float32) * 0.10
    w2 = jax.random.normal(ks[2], (K2, K2, C1, C2), jnp.float32) * 0.05
    b2 = jax.random.normal(ks[3], (C2,), jnp.float32) * 0.10
    wfc = jax.random.normal(ks[4], (NUM_CLASSES, POOL * POOL * C2), jnp.float32) * 0.03
    bfc = jax.random.normal(ks[5], (NUM_CLASSES,), jnp.float32) * 0.10
    x = jax.random.normal(ks[6], (B, IN_CH, H, W), jnp.float32)

    params = (w1, b1, w2, b2, wfc, bfc)

    out = tonynet_forward(x, params)
    out = jax.block_until_ready(out)

    ref = jax.block_until_ready(ref_forward(x, params))
    np.testing.assert_allclose(np.asarray(out), np.asarray(ref), rtol=2e-3, atol=2e-3)

    print("KERNEL_OK")
</pallas_src>

<mosaic_0001>
module attributes {stable_mosaic.version = 11 : i64} {
  func.func @tonynet_kernel(%arg0: i32, %arg1: memref<392x128xf32, #tpu.memory_space<vmem>>, %arg2: memref<128x32xf32, #tpu.memory_space<vmem>>, %arg3: memref<1x32xf32, #tpu.memory_space<vmem>>, %arg4: memref<288x64xf32, #tpu.memory_space<vmem>>, %arg5: memref<1x64xf32, #tpu.memory_space<vmem>>, %arg6: memref<1024x10xf32, #tpu.memory_space<vmem>>, %arg7: memref<1x10xf32, #tpu.memory_space<vmem>>, %arg8: memref<2x10xf32, #tpu.memory_space<vmem>>) attributes {dimension_semantics = [#tpu.dimension_semantics<arbitrary>], iteration_bounds = array<i64: 1>, scalar_prefetch = 0 : i64, scratch_operands = 0 : i64, tpu.core_type = #tpu.core_type<tc>, window_params = [{pipeline_mode = #tpu.pipeline_mode<synchronous>, transform_indices = @transform_0, window_bounds = array<i64: 392, 128>}, {pipeline_mode = #tpu.pipeline_mode<synchronous>, transform_indices = @transform_1, window_bounds = array<i64: 128, 32>}, {pipeline_mode = #tpu.pipeline_mode<synchronous>, transform_indices = @transform_2, window_bounds = array<i64: 1, 32>}, {pipeline_mode = #tpu.pipeline_mode<synchronous>, transform_indices = @transform_3, window_bounds = array<i64: 288, 64>}, {pipeline_mode = #tpu.pipeline_mode<synchronous>, transform_indices = @transform_4, window_bounds = array<i64: 1, 64>}, {pipeline_mode = #tpu.pipeline_mode<synchronous>, transform_indices = @transform_5, window_bounds = array<i64: 1024, 10>}, {pipeline_mode = #tpu.pipeline_mode<synchronous>, transform_indices = @transform_6, window_bounds = array<i64: 1, 10>}, {pipeline_mode = #tpu.pipeline_mode<synchronous>, transform_indices = @transform_7, window_bounds = array<i64: 2, 10>}]} {
    %c0 = arith.constant 0 : index
    %c0_0 = arith.constant 0 : index
    %0 = vector.load %arg1[%c0, %c0_0] : memref<392x128xf32, #tpu.memory_space<vmem>>, vector<392x128xf32>
    %c0_1 = arith.constant 0 : index
    %c0_2 = arith.constant 0 : index
    %1 = vector.load %arg2[%c0_1, %c0_2] : memref<128x32xf32, #tpu.memory_space<vmem>>, vector<128x32xf32>
    %cst = arith.constant dense<0.000000e+00> : vector<392x32xf32>
    %2 = tpu.matmul %0, %1, %cst {dimension_numbers = #tpu.dot_dimension_numbers<[1], [0], [0], [1], [0, 0, 1, 1], [], []>} : vector<392x128xf32>, vector<128x32xf32>, vector<392x32xf32> -> vector<392x32xf32>
    %c0_3 = arith.constant 0 : index
    %c0_4 = arith.constant 0 : index
    %3 = vector.load %arg3[%c0_3, %c0_4] : memref<1x32xf32, #tpu.memory_space<vmem>>, vector<1x32xf32>
    %4 = vector.broadcast %3 : vector<1x32xf32> to vector<392x32xf32>
    %5 = arith.addf %2, %4 : vector<392x32xf32>
    %cst_5 = arith.constant 0.000000e+00 : f32
    %6 = vector.broadcast %cst_5 : f32 to vector<392x32xf32>
    %7 = arith.maximumf %5, %6 : vector<392x32xf32>
    %8 = vector.shape_cast %7 : vector<392x32xf32> to vector<2x14x14x32xf32>
    %9 = vector.shape_cast %8 : vector<2x14x14x32xf32> to vector<2x7x2x14x32xf32>
    %cst_6 = arith.constant dense<0xFF800000> : vector<2x7x14x32xf32>
    %10 = vector.multi_reduction <maximumf>, %9, %cst_6 [2] : vector<2x7x2x14x32xf32> to vector<2x7x14x32xf32>
    %11 = vector.shape_cast %10 : vector<2x7x14x32xf32> to vector<2x7x7x2x32xf32>
    %cst_7 = arith.constant dense<0xFF800000> : vector<2x7x7x32xf32>
    %12 = vector.multi_reduction <maximumf>, %11, %cst_7 [3] : vector<2x7x7x2x32xf32> to vector<2x7x7x32xf32>
    %cst_8 = arith.constant 0.000000e+00 : f32
    %13 = vector.broadcast %cst_8 : f32 to vector<2x7x1x32xf32>
    %14 = tpu.concatenate %13, %12, %13 in 2 : vector<2x7x1x32xf32>, vector<2x7x7x32xf32>, vector<2x7x1x32xf32> -> vector<2x7x9x32xf32>
    %cst_9 = arith.constant 0.000000e+00 : f32
    %15 = vector.broadcast %cst_9 : f32 to vector<2x1x9x32xf32>
    %16 = tpu.concatenate %15, %14, %15 in 1 : vector<2x1x9x32xf32>, vector<2x7x9x32xf32>, vector<2x1x9x32xf32> -> vector<2x9x9x32xf32>
    %17 = vector.extract_strided_slice %16 {offsets = [0, 0, 0, 0], sizes = [2, 7, 7, 32], strides = [1, 1, 1, 1]} : vector<2x9x9x32xf32> to vector<2x7x7x32xf32>
    %18 = vector.extract_strided_slice %16 {offsets = [0, 0, 1, 0], sizes = [2, 7, 7, 32], strides = [1, 1, 1, 1]} : vector<2x9x9x32xf32> to vector<2x7x7x32xf32>
    %19 = vector.extract_strided_slice %16 {offsets = [0, 0, 2, 0], sizes = [2, 7, 7, 32], strides = [1, 1, 1, 1]} : vector<2x9x9x32xf32> to vector<2x7x7x32xf32>
    %20 = vector.extract_strided_slice %16 {offsets = [0, 1, 0, 0], sizes = [2, 7, 7, 32], strides = [1, 1, 1, 1]} : vector<2x9x9x32xf32> to vector<2x7x7x32xf32>
    %21 = vector.extract_strided_slice %16 {offsets = [0, 1, 1, 0], sizes = [2, 7, 7, 32], strides = [1, 1, 1, 1]} : vector<2x9x9x32xf32> to vector<2x7x7x32xf32>
    %22 = vector.extract_strided_slice %16 {offsets = [0, 1, 2, 0], sizes = [2, 7, 7, 32], strides = [1, 1, 1, 1]} : vector<2x9x9x32xf32> to vector<2x7x7x32xf32>
    %23 = vector.extract_strided_slice %16 {offsets = [0, 2, 0, 0], sizes = [2, 7, 7, 32], strides = [1, 1, 1, 1]} : vector<2x9x9x32xf32> to vector<2x7x7x32xf32>
    %24 = vector.extract_strided_slice %16 {offsets = [0, 2, 1, 0], sizes = [2, 7, 7, 32], strides = [1, 1, 1, 1]} : vector<2x9x9x32xf32> to vector<2x7x7x32xf32>
    %25 = vector.extract_strided_slice %16 {offsets = [0, 2, 2, 0], sizes = [2, 7, 7, 32], strides = [1, 1, 1, 1]} : vector<2x9x9x32xf32> to vector<2x7x7x32xf32>
    %26 = tpu.concatenate %17, %18, %19, %20, %21, %22, %23, %24, %25 in 3 : vector<2x7x7x32xf32>, vector<2x7x7x32xf32>, vector<2x7x7x32xf32>, vector<2x7x7x32xf32>, vector<2x7x7x32xf32>, vector<2x7x7x32xf32>, vector<2x7x7x32xf32>, vector<2x7x7x32xf32>, vector<2x7x7x32xf32> -> vector<2x7x7x288xf32>
    %27 = vector.shape_cast %26 : vector<2x7x7x288xf32> to vector<98x288xf32>
    %c0_10 = arith.constant 0 : index
    %c0_11 = arith.constant 0 : index
    %28 = vector.load %arg4[%c0_10, %c0_11] : memref<288x64xf32, #tpu.memory_space<vmem>>, vector<288x64xf32>
    %cst_12 = arith.constant dense<0.000000e+00> : vector<98x64xf32>
    %29 = tpu.matmul %27, %28, %cst_12 {dimension_numbers = #tpu.dot_dimension_numbers<[1], [0], [0], [1], [0, 0, 1, 1], [], []>} : vector<98x288xf32>, vector<288x64xf32>, vector<98x64xf32> -> vector<98x64xf32>
    %c0_13 = arith.constant 0 : index
    %c0_14 = arith.constant 0 : index
    %30 = vector.load %arg5[%c0_13, %c0_14] : memref<1x64xf32, #tpu.memory_space<vmem>>, vector<1x64xf32>
    %31 = vector.broadcast %30 : vector<1x64xf32> to vector<98x64xf32>
    %32 = arith.addf %29, %31 : vector<98x64xf32>
    %cst_15 = arith.constant 0.000000e+00 : f32
    %33 = vector.broadcast %cst_15 : f32 to vector<98x64xf32>
    %34 = arith.maximumf %32, %33 : vector<98x64xf32>
    %35 = vector.shape_cast %34 : vector<98x64xf32> to vector<2x7x7x64xf32>
    %36 = vector.extract_strided_slice %35 {offsets = [0, 0, 0, 0], sizes = [2, 2, 2, 64], strides = [1, 1, 1, 1]} : vector<2x7x7x64xf32> to vector<2x2x2x64xf32>
    %cst_16 = arith.constant dense<0.000000e+00> : vector<2x2x64xf32>
    %37 = vector.multi_reduction <add>, %36, %cst_16 [1] : vector<2x2x2x64xf32> to vector<2x2x64xf32>
    %cst_17 = arith.constant dense<0.000000e+00> : vector<2x64xf32>
    %38 = vector.multi_reduction <add>, %37, %cst_17 [1] : vector<2x2x64xf32> to vector<2x64xf32>
    %cst_18 = arith.constant 2.500000e-01 : f32
    %39 = vector.broadcast %cst_18 : f32 to vector<2x64xf32>
    %40 = arith.mulf %38, %39 : vector<2x64xf32>
    %41 = vector.extract_strided_slice %35 {offsets = [0, 0, 1, 0], sizes = [2, 2, 3, 64], strides = [1, 1, 1, 1]} : vector<2x7x7x64xf32> to vector<2x2x3x64xf32>
    %cst_19 = arith.constant dense<0.000000e+00> : vector<2x3x64xf32>
    %42 = vector.multi_reduction <add>, %41, %cst_19 [1] : vector<2x2x3x64xf32> to vector<2x3x64xf32>
    %cst_20 = arith.constant dense<0.000000e+00> : vector<2x64xf32>
    %43 = vector.multi_reduction <add>, %42, %cst_20 [1] : vector<2x3x64xf32> to vector<2x64xf32>
    %cst_21 = arith.constant 0.166666672 : f32
    %44 = vector.broadcast %cst_21 : f32 to vector<2x64xf32>
    %45 = arith.mulf %43, %44 : vector<2x64xf32>
    %46 = vector.extract_strided_slice %35 {offsets = [0, 0, 3, 0], sizes = [2, 2, 3, 64], strides = [1, 1, 1, 1]} : vector<2x7x7x64xf32> to vector<2x2x3x64xf32>
    %cst_22 = arith.constant dense<0.000000e+00> : vector<2x3x64xf32>
    %47 = vector.multi_reduction <add>, %46, %cst_22 [1] : vector<2x2x3x64xf32> to vector<2x3x64xf32>
    %cst_23 = arith.constant dense<0.000000e+00> : vector<2x64xf32>
    %48 = vector.multi_reduction <add>, %47, %cst_23 [1] : vector<2x3x64xf32> to vector<2x64xf32>
    %cst_24 = arith.constant 0.166666672 : f32
    %49 = vector.broadcast %cst_24 : f32 to vector<2x64xf32>
    %50 = arith.mulf %48, %49 : vector<2x64xf32>
    %51 = vector.extract_strided_slice %35 {offsets = [0, 0, 5, 0], sizes = [2, 2, 2, 64], strides = [1, 1, 1, 1]} : vector<2x7x7x64xf32> to vector<2x2x2x64xf32>
    %cst_25 = arith.constant dense<0.000000e+00> : vector<2x2x64xf32>
    %52 = vector.multi_reduction <add>, %51, %cst_25 [1] : vector<2x2x2x64xf32> to vector<2x2x64xf32>
    %cst_26 = arith.constant dense<0.000000e+00> : vector<2x64xf32>
    %53 = vector.multi_reduction <add>, %52, %cst_26 [1] : vector<2x2x64xf32> to vector<2x64xf32>
    %cst_27 = arith.constant 2.500000e-01 : f32
    %54 = vector.broadcast %cst_27 : f32 to vector<2x64xf32>
    %55 = arith.mulf %53, %54 : vector<2x64xf32>
    %56 = vector.extract_strided_slice %35 {offsets = [0, 1, 0, 0], sizes = [2, 3, 2, 64], strides = [1, 1, 1, 1]} : vector<2x7x7x64xf32> to vector<2x3x2x64xf32>
    %cst_28 = arith.constant dense<0.000000e+00> : vector<2x2x64xf32>
    %57 = vector.multi_reduction <add>, %56, %cst_28 [1] : vector<2x3x2x64xf32> to vector<2x2x64xf32>
    %cst_29 = arith.constant dense<0.000000e+00> : vector<2x64xf32>
    %58 = vector.multi_reduction <add>, %57, %cst_29 [1] : vector<2x2x64xf32> to vector<2x64xf32>
    %cst_30 = arith.constant 0.166666672 : f32
    %59 = vector.broadcast %cst_30 : f32 to vector<2x64xf32>
    %60 = arith.mulf %58, %59 : vector<2x64xf32>
    %61 = vector.extract_strided_slice %35 {offsets = [0, 1, 1, 0], sizes = [2, 3, 3, 64], strides = [1, 1, 1, 1]} : vector<2x7x7x64xf32> to vector<2x3x3x64xf32>
    %cst_31 = arith.constant dense<0.000000e+00> : vector<2x3x64xf32>
    %62 = vector.multi_reduction <add>, %61, %cst_31 [1] : vector<2x3x3x64xf32> to vector<2x3x64xf32>
    %cst_32 = arith.constant dense<0.000000e+00> : vector<2x64xf32>
    %63 = vector.multi_reduction <add>, %62, %cst_32 [1] : vector<2x3x64xf32> to vector<2x64xf32>
    %cst_33 = arith.constant 0.111111112 : f32
    %64 = vector.broadcast %cst_33 : f32 to vector<2x64xf32>
    %65 = arith.mulf %63, %64 : vector<2x64xf32>
    %66 = vector.extract_strided_slice %35 {offsets = [0, 1, 3, 0], sizes = [2, 3, 3, 64], strides = [1, 1, 1, 1]} : vector<2x7x7x64xf32> to vector<2x3x3x64xf32>
    %cst_34 = arith.constant dense<0.000000e+00> : vector<2x3x64xf32>
    %67 = vector.multi_reduction <add>, %66, %cst_34 [1] : vector<2x3x3x64xf32> to vector<2x3x64xf32>
    %cst_35 = arith.constant dense<0.000000e+00> : vector<2x64xf32>
    %68 = vector.multi_reduction <add>, %67, %cst_35 [1] : vector<2x3x64xf32> to vector<2x64xf32>
    %cst_36 = arith.constant 0.111111112 : f32
    %69 = vector.broadcast %cst_36 : f32 to vector<2x64xf32>
    %70 = arith.mulf %68, %69 : vector<2x64xf32>
    %71 = vector.extract_strided_slice %35 {offsets = [0, 1, 5, 0], sizes = [2, 3, 2, 64], strides = [1, 1, 1, 1]} : vector<2x7x7x64xf32> to vector<2x3x2x64xf32>
    %cst_37 = arith.constant dense<0.000000e+00> : vector<2x2x64xf32>
    %72 = vector.multi_reduction <add>, %71, %cst_37 [1] : vector<2x3x2x64xf32> to vector<2x2x64xf32>
    %cst_38 = arith.constant dense<0.000000e+00> : vector<2x64xf32>
    %73 = vector.multi_reduction <add>, %72, %cst_38 [1] : vector<2x2x64xf32> to vector<2x64xf32>
    %cst_39 = arith.constant 0.166666672 : f32
    %74 = vector.broadcast %cst_39 : f32 to vector<2x64xf32>
    %75 = arith.mulf %73, %74 : vector<2x64xf32>
    %76 = vector.extract_strided_slice %35 {offsets = [0, 3, 0, 0], sizes = [2, 3, 2, 64], strides = [1, 1, 1, 1]} : vector<2x7x7x64xf32> to vector<2x3x2x64xf32>
    %cst_40 = arith.constant dense<0.000000e+00> : vector<2x2x64xf32>
    %77 = vector.multi_reduction <add>, %76, %cst_40 [1] : vector<2x3x2x64xf32> to vector<2x2x64xf32>
    %cst_41 = arith.constant dense<0.000000e+00> : vector<2x64xf32>
    %78 = vector.multi_reduction <add>, %77, %cst_41 [1] : vector<2x2x64xf32> to vector<2x64xf32>
    %cst_42 = arith.constant 0.166666672 : f32
    %79 = vector.broadcast %cst_42 : f32 to vector<2x64xf32>
    %80 = arith.mulf %78, %79 : vector<2x64xf32>
    %81 = vector.extract_strided_slice %35 {offsets = [0, 3, 1, 0], sizes = [2, 3, 3, 64], strides = [1, 1, 1, 1]} : vector<2x7x7x64xf32> to vector<2x3x3x64xf32>
    %cst_43 = arith.constant dense<0.000000e+00> : vector<2x3x64xf32>
    %82 = vector.multi_reduction <add>, %81, %cst_43 [1] : vector<2x3x3x64xf32> to vector<2x3x64xf32>
    %cst_44 = arith.constant dense<0.000000e+00> : vector<2x64xf32>
    %83 = vector.multi_reduction <add>, %82, %cst_44 [1] : vector<2x3x64xf32> to vector<2x64xf32>
    %cst_45 = arith.constant 0.111111112 : f32
    %84 = vector.broadcast %cst_45 : f32 to vector<2x64xf32>
    %85 = arith.mulf %83, %84 : vector<2x64xf32>
    %86 = vector.extract_strided_slice %35 {offsets = [0, 3, 3, 0], sizes = [2, 3, 3, 64], strides = [1, 1, 1, 1]} : vector<2x7x7x64xf32> to vector<2x3x3x64xf32>
    %cst_46 = arith.constant dense<0.000000e+00> : vector<2x3x64xf32>
    %87 = vector.multi_reduction <add>, %86, %cst_46 [1] : vector<2x3x3x64xf32> to vector<2x3x64xf32>
    %cst_47 = arith.constant dense<0.000000e+00> : vector<2x64xf32>
    %88 = vector.multi_reduction <add>, %87, %cst_47 [1] : vector<2x3x64xf32> to vector<2x64xf32>
    %cst_48 = arith.constant 0.111111112 : f32
    %89 = vector.broadcast %cst_48 : f32 to vector<2x64xf32>
    %90 = arith.mulf %88, %89 : vector<2x64xf32>
    %91 = vector.extract_strided_slice %35 {offsets = [0, 3, 5, 0], sizes = [2, 3, 2, 64], strides = [1, 1, 1, 1]} : vector<2x7x7x64xf32> to vector<2x3x2x64xf32>
    %cst_49 = arith.constant dense<0.000000e+00> : vector<2x2x64xf32>
    %92 = vector.multi_reduction <add>, %91, %cst_49 [1] : vector<2x3x2x64xf32> to vector<2x2x64xf32>
    %cst_50 = arith.constant dense<0.000000e+00> : vector<2x64xf32>
    %93 = vector.multi_reduction <add>, %92, %cst_50 [1] : vector<2x2x64xf32> to vector<2x64xf32>
    %cst_51 = arith.constant 0.166666672 : f32
    %94 = vector.broadcast %cst_51 : f32 to vector<2x64xf32>
    %95 = arith.mulf %93, %94 : vector<2x64xf32>
    %96 = vector.extract_strided_slice %35 {offsets = [0, 5, 0, 0], sizes = [2, 2, 2, 64], strides = [1, 1, 1, 1]} : vector<2x7x7x64xf32> to vector<2x2x2x64xf32>
    %cst_52 = arith.constant dense<0.000000e+00> : vector<2x2x64xf32>
    %97 = vector.multi_reduction <add>, %96, %cst_52 [1] : vector<2x2x2x64xf32> to vector<2x2x64xf32>
    %cst_53 = arith.constant dense<0.000000e+00> : vector<2x64xf32>
    %98 = vector.multi_reduction <add>, %97, %cst_53 [1] : vector<2x2x64xf32> to vector<2x64xf32>
    %cst_54 = arith.constant 2.500000e-01 : f32
    %99 = vector.broadcast %cst_54 : f32 to vector<2x64xf32>
    %100 = arith.mulf %98, %99 : vector<2x64xf32>
    %101 = vector.extract_strided_slice %35 {offsets = [0, 5, 1, 0], sizes = [2, 2, 3, 64], strides = [1, 1, 1, 1]} : vector<2x7x7x64xf32> to vector<2x2x3x64xf32>
    %cst_55 = arith.constant dense<0.000000e+00> : vector<2x3x64xf32>
    %102 = vector.multi_reduction <add>, %101, %cst_55 [1] : vector<2x2x3x64xf32> to vector<2x3x64xf32>
    %cst_56 = arith.constant dense<0.000000e+00> : vector<2x64xf32>
    %103 = vector.multi_reduction <add>, %102, %cst_56 [1] : vector<2x3x64xf32> to vector<2x64xf32>
    %cst_57 = arith.constant 0.166666672 : f32
    %104 = vector.broadcast %cst_57 : f32 to vector<2x64xf32>
    %105 = arith.mulf %103, %104 : vector<2x64xf32>
    %106 = vector.extract_strided_slice %35 {offsets = [0, 5, 3, 0], sizes = [2, 2, 3, 64], strides = [1, 1, 1, 1]} : vector<2x7x7x64xf32> to vector<2x2x3x64xf32>
    %cst_58 = arith.constant dense<0.000000e+00> : vector<2x3x64xf32>
    %107 = vector.multi_reduction <add>, %106, %cst_58 [1] : vector<2x2x3x64xf32> to vector<2x3x64xf32>
    %cst_59 = arith.constant dense<0.000000e+00> : vector<2x64xf32>
    %108 = vector.multi_reduction <add>, %107, %cst_59 [1] : vector<2x3x64xf32> to vector<2x64xf32>
    %cst_60 = arith.constant 0.166666672 : f32
    %109 = vector.broadcast %cst_60 : f32 to vector<2x64xf32>
    %110 = arith.mulf %108, %109 : vector<2x64xf32>
    %111 = vector.extract_strided_slice %35 {offsets = [0, 5, 5, 0], sizes = [2, 2, 2, 64], strides = [1, 1, 1, 1]} : vector<2x7x7x64xf32> to vector<2x2x2x64xf32>
    %cst_61 = arith.constant dense<0.000000e+00> : vector<2x2x64xf32>
    %112 = vector.multi_reduction <add>, %111, %cst_61 [1] : vector<2x2x2x64xf32> to vector<2x2x64xf32>
    %cst_62 = arith.constant dense<0.000000e+00> : vector<2x64xf32>
    %113 = vector.multi_reduction <add>, %112, %cst_62 [1] : vector<2x2x64xf32> to vector<2x64xf32>
    %cst_63 = arith.constant 2.500000e-01 : f32
    %114 = vector.broadcast %cst_63 : f32 to vector<2x64xf32>
    %115 = arith.mulf %113, %114 : vector<2x64xf32>
    %116 = tpu.concatenate %40, %45, %50, %55, %60, %65, %70, %75, %80, %85, %90, %95, %100, %105, %110, %115 in 1 : vector<2x64xf32>, vector<2x64xf32>, vector<2x64xf32>, vector<2x64xf32>, vector<2x64xf32>, vector<2x64xf32>, vector<2x64xf32>, vector<2x64xf32>, vector<2x64xf32>, vector<2x64xf32>, vector<2x64xf32>, vector<2x64xf32>, vector<2x64xf32>, vector<2x64xf32>, vector<2x64xf32>, vector<2x64xf32> -> vector<2x1024xf32>
    %c0_64 = arith.constant 0 : index
    %c0_65 = arith.constant 0 : index
    %117 = vector.load %arg6[%c0_64, %c0_65] : memref<1024x10xf32, #tpu.memory_space<vmem>>, vector<1024x10xf32>
    %cst_66 = arith.constant dense<0.000000e+00> : vector<2x10xf32>
    %118 = tpu.matmul %116, %117, %cst_66 {dimension_numbers = #tpu.dot_dimension_numbers<[1], [0], [0], [1], [0, 0, 1, 1], [], []>} : vector<2x1024xf32>, vector<1024x10xf32>, vector<2x10xf32> -> vector<2x10xf32>
    %c0_67 = arith.constant 0 : index
    %c0_68 = arith.constant 0 : index
    %119 = vector.load %arg7[%c0_67, %c0_68] : memref<1x10xf32, #tpu.memory_space<vmem>>, vector<1x10xf32>
    %120 = vector.broadcast %119 : vector<1x10xf32> to vector<2x10xf32>
    %121 = arith.addf %118, %120 : vector<2x10xf32>
    %c0_69 = arith.constant 0 : index
    %c0_70 = arith.constant 0 : index
    %122 = vector.load %arg8[%c0_69, %c0_70] : memref<2x10xf32, #tpu.memory_space<vmem>>, vector<2x10xf32>
    tpu.vector_store %arg8[%c0_69, %c0_70], %121 {strides = array<i32>} : memref<2x10xf32, #tpu.memory_space<vmem>>, vector<2x10xf32>,
    return
  }
  func.func @transform_0(%arg0: i32) -> (i32, i32) {
    %c0_i32 = arith.constant 0 : i32
    %c0_i32_0 = arith.constant 0 : i32
    %c0_i32_1 = arith.constant 0 : i32
    return %c0_i32, %c0_i32_0 : i32, i32
  }
  func.func @transform_1(%arg0: i32) -> (i32, i32) {
    %c0_i32 = arith.constant 0 : i32
    %c0_i32_0 = arith.constant 0 : i32
    %c0_i32_1 = arith.constant 0 : i32
    return %c0_i32, %c0_i32_0 : i32, i32
  }
  func.func @transform_2(%arg0: i32) -> (i32, i32) {
    %c0_i32 = arith.constant 0 : i32
    %c0_i32_0 = arith.constant 0 : i32
    %c0_i32_1 = arith.constant 0 : i32
    return %c0_i32, %c0_i32_0 : i32, i32
  }
  func.func @transform_3(%arg0: i32) -> (i32, i32) {
    %c0_i32 = arith.constant 0 : i32
    %c0_i32_0 = arith.constant 0 : i32
    %c0_i32_1 = arith.constant 0 : i32
    return %c0_i32, %c0_i32_0 : i32, i32
  }
  func.func @transform_4(%arg0: i32) -> (i32, i32) {
    %c0_i32 = arith.constant 0 : i32
    %c0_i32_0 = arith.constant 0 : i32
    %c0_i32_1 = arith.constant 0 : i32
    return %c0_i32, %c0_i32_0 : i32, i32
  }
  func.func @transform_5(%arg0: i32) -> (i32, i32) {
    %c0_i32 = arith.constant 0 : i32
    %c0_i32_0 = arith.constant 0 : i32
    %c0_i32_1 = arith.constant 0 : i32
    return %c0_i32, %c0_i32_0 : i32, i32
  }
  func.func @transform_6(%arg0: i32) -> (i32, i32) {
    %c0_i32 = arith.constant 0 : i32
    %c0_i32_0 = arith.constant 0 : i32
    %c0_i32_1 = arith.constant 0 : i32
    return %c0_i32, %c0_i32_0 : i32, i32
  }
  func.func @transform_7(%arg0: i32) -> (i32, i32) {
    %c0_i32 = arith.constant 0 : i32
    %c0_i32_0 = arith.constant 0 : i32
    %c0_i32_1 = arith.constant 0 : i32
    return %c0_i32, %c0_i32_0 : i32, i32
  }
}

</mosaic_0001>

<bundles_post_ra>
// kernel: tpu_custom_call.1
= control target key start
LH: loop header
LB: loop body
LE: loop exit
PB: predicated region body
PF: predicated region fallthrough
CT: control target
= control target key end

     0   :  { %v12831_v3 = vmov 0.0|0.0   ;;  %vm8699_vm0 = vmmov 0   ;;  %v12829_v6 = vmov 0.0   ;;  %s12821_s0 = inlined_call_operand.vmem [shape: f32[392,128], index: 0, kind: input, shape index: {}]   ;;  %s12822_s1 = inlined_call_operand.vmem [shape: f32[128,32], index: 1, kind: input, shape index: {}]   ;;  %s12823_s2 = inlined_call_operand.vmem [shape: f32[1,32], index: 2, kind: input, shape index: {}]   ;;  %s12824_s3 = inlined_call_operand.vmem [shape: f32[288,64], index: 3, kind: input, shape index: {}]   ;;  %s12825_s4 = inlined_call_operand.vmem [shape: f32[1,64], index: 4, kind: input, shape index: {}]   ;;  %s12826_s5 = inlined_call_operand.vmem [shape: f32[1024,10], index: 5, kind: input, shape index: {}]   ;;  %s12827_s6 = inlined_call_operand.vmem [shape: f32[1,10], index: 6, kind: input, shape index: {}]   ;;  %s12828_s7 = inlined_call_operand.hbm [shape: f32[2,10], index: 7, kind: output, shape index: {}]  }
   0x1   :  { %v76_v0 = vld [vmem:[%s12822_s1] sm:$0xff]  ;;  %v77_v1 = vld [vmem:[%s12822_s1 + $0x8] sm:$0xff]  ;;  %v78_v2 = vld [vmem:[%s12822_s1 + $0x10] sm:$0xff]  ;;  %8447 = vmatprep.subr.bf16.mxu0 %v12831_v3  ;;  %8253 = vmatprep.mubr.msk.f32.mxu0 %vm8699_vm0, %v12829_v6 }
   0x2   :  { %v8448_v4 = vpack.c.bf16 %v77_v1, %v76_v0  ;;  %v79_v5 = vld [vmem:[%s12822_s1 + $0x18] sm:$0xff]  ;;  %v80_v8 = vld [vmem:[%s12822_s1 + $0x20] sm:$0xff]  ;;  %v81_v9 = vld [vmem:[%s12822_s1 + $0x28] sm:$0xff] }
   0x3   :  { %v8451_v7 = vpack.c.bf16 %v79_v5, %v78_v2  ;;  %v8454_v10 = vpack.c.bf16 %v81_v9, %v80_v8  ;;  %v82_v11 = vld [vmem:[%s12822_s1 + $0x30] sm:$0xff]  ;;  %v83_v12 = vld [vmem:[%s12822_s1 + $0x38] sm:$0xff]  ;;  %v84_v14 = vld [vmem:[%s12822_s1 + $0x40] sm:$0xff] }
   0x4   :  { %8449 = vmatpush3.bf16.msra.mxu0 %v8448_v4  ;;  %v8457_v13 = vpack.c.bf16 %v83_v12, %v82_v11  ;;  %v85_v15 = vld [vmem:[%s12822_s1 + $0x48] sm:$0xff] }
   0x5   :  { %8450 = vmatprep.subr.bf16.mxu0 %v12831_v3 }
   0x8   :  { %8452 = vmatpush3.bf16.msra.mxu0 %v8451_v7 }
   0x9   :  { %8453 = vmatprep.subr.bf16.mxu0 %v12831_v3 }
   0xc   :  { %8455 = vmatpush3.bf16.msra.mxu0 %v8454_v10 }
   0xd   :  { %8456 = vmatprep.subr.bf16.mxu0 %v12831_v3 }
   0xe   :  { %12 = vsyncpa [#allocation3], 0  ;;  %v8460_v16 = vpack.c.bf16 %v85_v15, %v84_v14  ;;  %v86_v17 = vld [vmem:[%s12822_s1 + $0x50] sm:$0xff]  ;;  %v87_v18 = vld [vmem:[%s12822_s1 + $0x58] sm:$0xff]  ;;  %v8969_v59 = vrot.slane %v12829_v6, 2  ;;  %s8701_s29 = smov 64  }
   0xf   :  { %v8463_v19 = vpack.c.bf16 %v87_v18, %v86_v17  ;;  %v88_v20 = vld [vmem:[%s12822_s1 + $0x60] sm:$0xff]  ;;  %v89_v21 = vld [vmem:[%s12822_s1 + $0x68] sm:$0xff]  ;;  %v90_v23 = vld [vmem:[%s12822_s1 + $0x70] sm:$0xff]  ;;  %v2747_v63 = vrot.slane %v12829_v6, 1  ;;  %s8702_s9 = smov 96   ;;  %v511_v18 = vlaneseq  ;;  %vm1536_vm1 = vcmask 254976  }
  0x10   :  { %8458 = vmatpush3.bf16.msra.mxu0 %v8457_v13  ;;  %v8466_v22 = vpack.c.bf16 %v89_v21, %v88_v20  ;;  %v91_v24 = vld [vmem:[%s12822_s1 + $0x78] sm:$0xff]  ;;  %v27_v26 = vld [vmem:[%s12821_s0] sm:$0xff]  ;;  %v28_v27 = vld [vmem:[%s12821_s0 + $0x8] sm:$0xff]  ;;  %v8646_v60 = vpack.i.bf16 %v12829_v6, %v8969_v59  ;;  %s8703_s1 = smov 32   ;;  %vm2615_vm2 = vcmask 1042434   ;;  %vm2617_vm3 = vcmask 1043459  }
  0x11   :  { %8459 = vmatprep.subr.bf16.mxu0 %v12831_v3  ;;  %v8469_v25 = vpack.c.bf16 %v91_v24, %v90_v23  ;;  %v29_v28 = vld [vmem:[%s12821_s0 + $0x10] sm:$0xff]  ;;  %v30_v29 = vld [vmem:[%s12821_s0 + $0x18] sm:$0xff]  ;;  %v31_v30 = vld [vmem:[%s12821_s0 + $0x20] sm:$0xff]  ;;  %2760 = vrot.lane.b32.xlu0 %v2747_v63, %s8703_s1  ;;  %v9062_v21 = vshrl.u32 %v511_v18, 7  ;;  %vm2619_vm4 = vcmask 1044484   ;;  %vm2621_vm5 = vcmask 1045509  }
  0x12   :  { %v32_v31 = vld [vmem:[%s12821_s0 + $0x28] sm:$0xff]  ;;  %v33_v32 = vld [vmem:[%s12821_s0 + $0x30] sm:$0xff]  ;;  %v34_v33 = vld [vmem:[%s12821_s0 + $0x38] sm:$0xff]  ;;  %8647 = vrot.lane.b32.xlu1 %v8646_v60, %s8701_s29  ;;  %vm2623_vm6 = vcmask 1046534   ;;  %vm2625_vm7 = vcmask 1047559   ;;  %vm2719_vm8 = vcmask 1040384  }
  0x13   :  { %v35_v34 = vld [vmem:[%s12821_s0 + $0x40] sm:$0xff]  ;;  %v36_v35 = vld [vmem:[%s12821_s0 + $0x48] sm:$0xff]  ;;  %v37_v36 = vld [vmem:[%s12821_s0 + $0x50] sm:$0xff]  ;;  %vm2799_vm9 = vcmask 1045504   ;;  %vm3049_vm10 = vcmask 261120   ;;  %vm3063_vm11 = vcmask 523264  }
  0x14   :  { %8461 = vmatpush3.bf16.msra.mxu0 %v8460_v16  ;;  %v38_v37 = vld [vmem:[%s12821_s0 + $0x58] sm:$0xff]  ;;  %v39_v38 = vld [vmem:[%s12821_s0 + $0x60] sm:$0xff]  ;;  %v40_v39 = vld [vmem:[%s12821_s0 + $0x68] sm:$0xff]  ;;  %v8704_v16 = vmov 1983009808   ;;  %vm3077_vm12 = vcmask 785408  }
  0x15   :  { %8462 = vmatprep.subr.bf16.mxu0 %v12831_v3  ;;  %v41_v40 = vld [vmem:[%s12821_s0 + $0x70] sm:$0xff]  ;;  %v42_v41 = vld [vmem:[%s12821_s0 + $0x78] sm:$0xff]  ;;  %v43_v42 = vld [vmem:[%s12821_s0 + $0x80] sm:$0xff]  ;;  %v509_v17 = vunpack.c.l.s4 %v8704_v16  ;;  %vm5954_vm13 = vcmask 517120   ;;  %vm6073_vm14 = vcmask 518144   ;;  %vm7374_vm15 = vcmask 1041409  }
  0x16   :  { %v44_v43 = vld [vmem:[%s12821_s0 + $0x88] sm:$0xff]  ;;  %v45_v44 = vld [vmem:[%s12821_s0 + $0x90] sm:$0xff]  ;;  %v46_v45 = vld [vmem:[%s12821_s0 + $0x98] sm:$0xff]  ;;  %3022 = vrot.lane.b32.xlu1 %v2747_v63, %s8702_s9 }
  0x17   :  { %v47_v46 = vld [vmem:[%s12821_s0 + $0xa0] sm:$0xff]  ;;  %v48_v47 = vld [vmem:[%s12821_s0 + $0xa8] sm:$0xff]  ;;  %v49_v48 = vld [vmem:[%s12821_s0 + $0xb0] sm:$0xff]  ;;  %v510_v20 = vunpack.c.0.s8 %v509_v17 }
  0x18   :  { %8464 = vmatpush3.bf16.msra.mxu0 %v8463_v19  ;;  %v50_v49 = vld [vmem:[%s12821_s0 + $0xb8] sm:$0xff]  ;;  %v51_v50 = vld [vmem:[%s12821_s0 + $0xc0] sm:$0xff]  ;;  %v52_v51 = vld [vmem:[%s12821_s0 + $0xc8] sm:$0xff] }
  0x19   :  { %8465 = vmatprep.subr.bf16.mxu0 %v12831_v3  ;;  %v53_v52 = vld [vmem:[%s12821_s0 + $0xd0] sm:$0xff]  ;;  %v54_v53 = vld [vmem:[%s12821_s0 + $0xd8] sm:$0xff]  ;;  %v55_v54 = vld [vmem:[%s12821_s0 + $0xe0] sm:$0xff] }
  0x1a   :  { %v56_v55 = vld [vmem:[%s12821_s0 + $0xe8] sm:$0xff]  ;;  %v57_v56 = vld [vmem:[%s12821_s0 + $0xf0] sm:$0xff]  ;;  %v58_v57 = vld [vmem:[%s12821_s0 + $0xf8] sm:$0xff] }
  0x1b   :  { %v59_v58 = vld [vmem:[%s12821_s0 + $0x100] sm:$0xff]  ;;  %v60_v61 = vld [vmem:[%s12821_s0 + $0x108] sm:$0xff]  ;;  %v61_v62 = vld [vmem:[%s12821_s0 + $0x110] sm:$0xff] }
  0x1c   :  { %8467 = vmatpush3.bf16.msra.mxu0 %v8466_v22  ;;  %v62_v0 = vld [vmem:[%s12821_s0 + $0x118] sm:$0xff]  ;;  %v63_v1 = vld [vmem:[%s12821_s0 + $0x120] sm:$0xff]  ;;  %v64_v2 = vld [vmem:[%s12821_s0 + $0x128] sm:$0xff] }
  0x1d   :  { %8468 = vmatprep.subr.bf16.mxu0 %v12831_v3  ;;  %v65_v4 = vld [vmem:[%s12821_s0 + $0x130] sm:$0xff]  ;;  %v66_v5 = vld [vmem:[%s12821_s0 + $0x138] sm:$0xff]  ;;  %v67_v7 = vld [vmem:[%s12821_s0 + $0x140] sm:$0xff] }
  0x1e   :  { %v68_v8 = vld [vmem:[%s12821_s0 + $0x148] sm:$0xff]  ;;  %v69_v9 = vld [vmem:[%s12821_s0 + $0x150] sm:$0xff]  ;;  %v70_v10 = vld [vmem:[%s12821_s0 + $0x158] sm:$0xff] }
  0x1f   :  { %v71_v11 = vld [vmem:[%s12821_s0 + $0x160] sm:$0xff]  ;;  %v72_v12 = vld [vmem:[%s12821_s0 + $0x168] sm:$0xff]  ;;  %v73_v13 = vld [vmem:[%s12821_s0 + $0x170] sm:$0xff] }
  0x20   :  { %8470 = vmatpush3.bf16.msra.mxu0 %v8469_v25  ;;  %v74_v14 = vld [vmem:[%s12821_s0 + $0x178] sm:$0xff]  ;;  %v75_v15 = vld [vmem:[%s12821_s0 + $0x180] sm:$0xff] }
  0x21   :  { %v9060_v19 = vld [vmem:[%s12823_s2] ss:$0 sm:$0xff] }
  0x23   :  { %8254 = vmatmul.mubr.f32.vlgmr.msra.gmra.mrb[0].mxu0 %v27_v26  ;;  %v9066_v26 = vsub.s32 %v510_v20, %v9062_v21 }
  0x24   :  { %8256 = vmatprep.mubr.msk.f32.mxu0 %vm8699_vm0, %v12829_v6 }
  0x27   :  { %8257 = vmatmul.mubr.f32.gmra.mrb[2].mxu0 %v28_v27 }
  0x28   :  { %8259 = vmatprep.mubr.msk.f32.mxu0 %vm8699_vm0, %v12829_v6 }
  0x2b   :  { %8260 = vmatmul.mubr.f32.gmra.mrb[4].mxu0 %v29_v28 }
  0x2c   :  { %8262 = vmatprep.mubr.msk.f32.mxu0 %vm8699_vm0, %v12829_v6 }
  0x2f   :  { %8263 = vmatmul.mubr.f32.gmra.mrb[6].mxu0 %v30_v29 }
  0x30   :  { %8265 = vmatprep.mubr.msk.f32.mxu0 %vm8699_vm0, %v12829_v6 }
  0x33   :  { %8266 = vmatmul.mubr.f32.gmra.mrb[8].mxu0 %v31_v30 }
  0x34   :  { %8268 = vmatprep.mubr.msk.f32.mxu0 %vm8699_vm0, %v12829_v6 }
  0x37   :  { %8269 = vmatmul.mubr.f32.gmra.mrb[10].mxu0 %v32_v31 }
  0x38   :  { %8271 = vmatprep.mubr.msk.f32.mxu0 %vm8699_vm0, %v12829_v6 }
  0x3b   :  { %8272 = vmatmul.mubr.f32.gmra.mrb[12].mxu0 %v33_v32 }
  0x3c   :  { %8274 = vmatprep.mubr.msk.f32.mxu0 %vm8699_vm0, %v12829_v6 }
  0x3f   :  { %8275 = vmatmul.mubr.f32.gmra.mrb[14].mxu0 %v34_v33 }
  0x40   :  { %8277 = vmatprep.mubr.msk.f32.mxu0 %vm8699_vm0, %v12829_v6 }
  0x43   :  { %8278 = vmatmul.mubr.f32.gmra.mrb[16].mxu0 %v35_v34 }
  0x44   :  { %8280 = vmatprep.mubr.msk.f32.mxu0 %vm8699_vm0, %v12829_v6 }
  0x47   :  { %8281 = vmatmul.mubr.f32.gmra.mrb[18].mxu0 %v36_v35 }
  0x48   :  { %8283 = vmatprep.mubr.msk.f32.mxu0 %vm8699_vm0, %v12829_v6 }
  0x4b   :  { %8284 = vmatmul.mubr.f32.gmra.mrb[20].mxu0 %v37_v36 }
  0x4c   :  { %8286 = vmatprep.mubr.msk.f32.mxu0 %vm8699_vm0, %v12829_v6 }
  0x4f   :  { %8287 = vmatmul.mubr.f32.gmra.mrb[22].mxu0 %v38_v37 }
  0x50   :  { %8289 = vmatprep.mubr.msk.f32.mxu0 %vm8699_vm0, %v12829_v6 }
  0x53   :  { %8290 = vmatmul.mubr.f32.gmra.mrb[24].mxu0 %v39_v38 }
  0x54   :  { %8292 = vmatprep.mubr.msk.f32.mxu0 %vm8699_vm0, %v12829_v6 }
  0x57   :  { %8293 = vmatmul.mubr.f32.gmra.mrb[26].mxu0 %v40_v39 }
  0x58   :  { %8295 = vmatprep.mubr.msk.f32.mxu0 %vm8699_vm0, %v12829_v6 }
  0x5b   :  { %8296 = vmatmul.mubr.f32.gmra.mrb[28].mxu0 %v41_v40 }
  0x5c   :  { %8298 = vmatprep.mubr.msk.f32.mxu0 %vm8699_vm0, %v12829_v6 }
  0x5f   :  { %8299 = vmatmul.mubr.f32.gmra.mrb[30].mxu0 %v42_v41 }
  0x60   :  { %8301 = vmatprep.mubr.msk.f32.mxu0 %vm8699_vm0, %v12829_v6 }
  0x63   :  { %8302 = vmatmul.mubr.f32.gmra.mrb[32].mxu0 %v43_v42 }
  0x64   :  { %8304 = vmatprep.mubr.msk.f32.mxu0 %vm8699_vm0, %v12829_v6 }
  0x67   :  { %8305 = vmatmul.mubr.f32.gmra.mrb[34].mxu0 %v44_v43 }
  0x68   :  { %8307 = vmatprep.mubr.msk.f32.mxu0 %vm8699_vm0, %v12829_v6 }
  0x6b   :  { %8308 = vmatmul.mubr.f32.gmra.mrb[36].mxu0 %v45_v44 }
  0x6c   :  { %8310 = vmatprep.mubr.msk.f32.mxu0 %vm8699_vm0, %v12829_v6 }
  0x6f   :  { %8311 = vmatmul.mubr.f32.gmra.mrb[38].mxu0 %v46_v45 }
  0x70   :  { %8313 = vmatprep.mubr.msk.f32.mxu0 %vm8699_vm0, %v12829_v6 }
  0x73   :  { %8314 = vmatmul.mubr.f32.gmra.mrb[40].mxu0 %v47_v46 }
  0x74   :  { %8316 = vmatprep.mubr.msk.f32.mxu0 %vm8699_vm0, %v12829_v6 }
  0x77   :  { %8317 = vmatmul.mubr.f32.gmra.mrb[42].mxu0 %v48_v47 }
  0x78   :  { %8319 = vmatprep.mubr.msk.f32.mxu0 %vm8699_vm0, %v12829_v6 }
  0x7b   :  { %8320 = vmatmul.mubr.f32.gmra.mrb[44].mxu0 %v49_v48 }
  0x7c   :  { %8322 = vmatprep.mubr.msk.f32.mxu0 %vm8699_vm0, %v12829_v6 }
  0x7f   :  { %8323 = vmatmul.mubr.f32.gmra.mrb[46].mxu0 %v50_v49 }
  0x80   :  { %8325 = vmatprep.mubr.msk.f32.mxu0 %vm8699_vm0, %v12829_v6 }
  0x83   :  { %8326 = vmatmul.mubr.f32.gmra.mrb[48].mxu0 %v51_v50 }
  0x84   :  { %8328 = vmatprep.mubr.msk.f32.mxu0 %vm8699_vm0, %v12829_v6 }
  0x87   :  { %8329 = vmatmul.mubr.f32.gmra.mrb[50].mxu0 %v52_v51 }
  0x88   :  { %8331 = vmatprep.mubr.msk.f32.mxu0 %vm8699_vm0, %v12829_v6 }
  0x8b   :  { %8332 = vmatmul.mubr.f32.gmra.mrb[52].mxu0 %v53_v52 }
  0x8c   :  { %8334 = vmatprep.mubr.msk.f32.mxu0 %vm8699_vm0, %v12829_v6 }
  0x8f   :  { %8335 = vmatmul.mubr.f32.gmra.mrb[54].mxu0 %v54_v53 }
  0x90   :  { %8337 = vmatprep.mubr.msk.f32.mxu0 %vm8699_vm0, %v12829_v6 }
  0x93   :  { %8338 = vmatmul.mubr.f32.gmra.mrb[56].mxu0 %v55_v54 }
  0x94   :  { %8340 = vmatprep.mubr.msk.f32.mxu0 %vm8699_vm0, %v12829_v6 }
  0x97   :  { %8341 = vmatmul.mubr.f32.gmra.mrb[58].mxu0 %v56_v55 }
  0x98   :  { %8343 = vmatprep.mubr.msk.f32.mxu0 %vm8699_vm0, %v12829_v6 }
  0x9b   :  { %8344 = vmatmul.mubr.f32.gmra.mrb[60].mxu0 %v57_v56 }
  0x9c   :  { %8346 = vmatprep.mubr.msk.f32.mxu0 %vm8699_vm0, %v12829_v6 }
  0x9f   :  { %8347 = vmatmul.mubr.f32.gmra.mrb[62].mxu0 %v58_v57 }
  0xa0   :  { %8349 = vmatprep.mubr.msk.f32.mxu0 %vm8699_vm0, %v12829_v6 }
  0xa3   :  { %8350 = vmatmul.mubr.f32.gmra.mrb[64].mxu0 %v59_v58 }
  0xa4   :  { %8352 = vmatprep.mubr.msk.f32.mxu0 %vm8699_vm0, %v12829_v6 }
  0xa7   :  { %8353 = vmatmul.mubr.f32.gmra.mrb[66].mxu0 %v60_v61 }
  0xa8   :  { %8355 = vmatprep.mubr.msk.f32.mxu0 %vm8699_vm0, %v12829_v6 }
  0xab   :  { %8356 = vmatmul.mubr.f32.gmra.mrb[68].mxu0 %v61_v62 }
  0xac   :  { %8358 = vmatprep.mubr.msk.f32.mxu0 %vm8699_vm0, %v12829_v6 }
  0xaf   :  { %8359 = vmatmul.mubr.f32.gmra.mrb[70].mxu0 %v62_v0 }
  0xb0   :  { %8361 = vmatprep.mubr.msk.f32.mxu0 %vm8699_vm0, %v12829_v6 }
  0xb3   :  { %8362 = vmatmul.mubr.f32.gmra.mrb[72].mxu0 %v63_v1 }
  0xb4   :  { %8364 = vmatprep.mubr.msk.f32.mxu0 %vm8699_vm0, %v12829_v6 }
  0xb7   :  { %8365 = vmatmul.mubr.f32.gmra.mrb[74].mxu0 %v64_v2 }
  0xb8   :  { %8367 = vmatprep.mubr.msk.f32.mxu0 %vm8699_vm0, %v12829_v6 }
  0xbb   :  { %8368 = vmatmul.mubr.f32.gmra.mrb[76].mxu0 %v65_v4 }
  0xbc   :  { %8370 = vmatprep.mubr.msk.f32.mxu0 %vm8699_vm0, %v12829_v6 }
  0xbf   :  { %8371 = vmatmul.mubr.f32.gmra.mrb[78].mxu0 %v66_v5 }
  0xc0   :  { %8373 = vmatprep.mubr.msk.f32.mxu0 %vm8699_vm0, %v12829_v6 }
  0xc3   :  { %8374 = vmatmul.mubr.f32.gmra.mrb[80].mxu0 %v67_v7 }
  0xc4   :  { %8376 = vmatprep.mubr.msk.f32.mxu0 %vm8699_vm0, %v12829_v6 }
  0xc7   :  { %8377 = vmatmul.mubr.f32.gmra.mrb[82].mxu0 %v68_v8 }
  0xc8   :  { %8379 = vmatprep.mubr.msk.f32.mxu0 %vm8699_vm0, %v12829_v6 }
  0xcb   :  { %8380 = vmatmul.mubr.f32.gmra.mrb[84].mxu0 %v69_v9 }
  0xcc   :  { %8382 = vmatprep.mubr.msk.f32.mxu0 %vm8699_vm0, %v12829_v6 }
  0xcf   :  { %8383 = vmatmul.mubr.f32.gmra.mrb[86].mxu0 %v70_v10 }
  0xd0   :  { %8385 = vmatprep.mubr.msk.f32.mxu0 %vm8699_vm0, %v12829_v6 }
  0xd3   :  { %8386 = vmatmul.mubr.f32.gmra.mrb[88].mxu0 %v71_v11 }
  0xd4   :  { %8388 = vmatprep.mubr.msk.f32.mxu0 %vm8699_vm0, %v12829_v6 }
  0xd7   :  { %8389 = vmatmul.mubr.f32.gmra.mrb[90].mxu0 %v72_v12 }
  0xd8   :  { %8391 = vmatprep.mubr.msk.f32.mxu0 %vm8699_vm0, %v12829_v6 }
  0xdb   :  { %8392 = vmatmul.mubr.f32.gmra.mrb[92].mxu0 %v73_v13 }
  0xdc   :  { %8394 = vmatprep.mubr.msk.f32.mxu0 %vm8699_vm0, %v12829_v6 }
  0xdf   :  { %8395 = vmatmul.mubr.f32.gmra.mrb[94].mxu0 %v74_v14 }
  0xe0   :  { %8397 = vmatprep.mubr.msk.f32.mxu0 %vm8699_vm0, %v12829_v6 }
  0xe3   :  { %8398 = vmatmul.mubr.f32.gmra.mrb[96].mxu0 %v75_v15 }
  0xf6   :  { %v165_v22 = vpop.f32.mrb[0].mxu0 }
  0xf7   :  { %v166_v23 = vadd.f32 %v9060_v19, %v165_v22  ;;  %v8255_v24 = vpop.f32.mrb[1].mxu0 }
  0xf9   :  { %v409_v25 = vmax.f32 %v166_v23, 0.0 }
  0xfa   :  { %v170_v27 = vpop.f32.mrb[2].mxu0 }
  0xfb   :  { %v507_v28 = vcombine.high %v409_v25, %v409_v25  ;;  %v171_v29 = vadd.f32 %v9060_v19, %v170_v27  ;;  %v8258_v30 = vpop.f32.mrb[3].mxu0  ;;  %v514_v31 = vrot.slane %v409_v25, %v9066_v26 }
  0xfd   :  { %v410_v32 = vmax.f32 %v171_v29, 0.0  ;;  %v521_v34 = vrot.slane %v507_v28, %v9066_v26  ;;  %v522_v38 = vcombine.high %v514_v31, %v514_v31  ;;  %v1537_v47 = vsel %vm1536_vm1, %v514_v31, -inf }
  0xfe   :  { %v175_v33 = vpop.f32.mrb[4].mxu0 }
  0xff   :  { %v524_v35 = vcombine.high %v410_v32, %v410_v32  ;;  %v8261_v36 = vpop.f32.mrb[5].mxu0  ;;  %v176_v37 = vadd.f32 %v9060_v19, %v175_v33  ;;  %v523_v42 = vcombine.high %v521_v34, %v521_v34  ;;  %v531_v43 = vrot.slane %v410_v32, %v9066_v26 }
 0x100   :  { %v1543_v50 = vsel %vm1536_vm1, %v521_v34, -inf  ;;  %v1540_v52 = vsel %vm1536_vm1, %v522_v38, -inf  ;;  %v8705_v34 = vmov 1966171168  }
 0x101   :  { %v538_v39 = vrot.slane %v524_v35, %v9066_v26  ;;  %v411_v40 = vmax.f32 %v176_v37, 0.0  ;;  %v539_v60 = vcombine.high %v531_v43, %v531_v43  ;;  %v1546_v62 = vsel %vm1536_vm1, %v523_v42, -inf }
 0x102   :  { %v180_v41 = vpop.f32.mrb[6].mxu0  ;;  %v1549_v11 = vsel %vm1536_vm1, %v531_v43, -inf  ;;  %v3166_v35 = vunpack.c.l.s4 %v8705_v34 }
 0x103   :  { %v540_v44 = vcombine.high %v538_v39, %v538_v39  ;;  %v181_v45 = vadd.f32 %v9060_v19, %v180_v41  ;;  %v8264_v46 = vpop.f32.mrb[7].mxu0  ;;  %v541_v48 = vcombine.high %v411_v40, %v411_v40  ;;  %v548_v49 = vrot.slane %v411_v40, %v9066_v26 }
 0x104   :  { %v1555_v30 = vsel %vm1536_vm1, %v538_v39, -inf  ;;  %v1552_v32 = vsel %vm1536_vm1, %v539_v60, -inf }
 0x105   :  { %v1538_v51 = vsel %vm1536_vm1, %v540_v44, -inf  ;;  %v412_v53 = vmax.f32 %v181_v45, 0.0  ;;  %v555_v55 = vrot.slane %v541_v48, %v9066_v26  ;;  %v556_v56 = vcombine.high %v548_v49, %v548_v49 }
 0x106   :  { %v1539_v54 = vmax.f32 %v1537_v47, %v1538_v51  ;;  %v1541_v57 = vsel %vm1536_vm1, %v548_v49, -inf  ;;  %v185_v58 = vpop.f32.mrb[8].mxu0  ;;  %v3167_v49 = vunpack.c.0.s8 %v3166_v35 }
 0x107   :  { %v1542_v61 = vmax.f32 %v1540_v52, %v1541_v57  ;;  %v565_v63 = vrot.slane %v412_v53, %v9066_v26  ;;  %v8267_v0 = vpop.f32.mrb[9].mxu0  ;;  %v557_v2 = vcombine.high %v555_v55, %v555_v55  ;;  %v1544_v4 = vsel %vm1536_vm1, %v556_v56, -inf }
 0x108   :  { %v1831_v1 = vsel %vm1536_vm1, %v1539_v54, -inf  ;;  %v1547_v5 = vsel %vm1536_vm1, %v555_v55, -inf  ;;  %v1545_v8 = vmax.f32 %v1543_v50, %v1544_v4  ;;  %v186_v24 = vadd.f32 %v9060_v19, %v185_v58 }
 0x109   :  { %v1832_v7 = vrot.slane %v1831_v1, 4  ;;  %v1548_v9 = vmax.f32 %v1546_v62, %v1547_v5  ;;  %v1838_v10 = vsel %vm1536_vm1, %v1542_v61, -inf  ;;  %v1550_v12 = vsel %vm1536_vm1, %v557_v2, -inf }
 0x10a   :  { %v1839_v13 = vrot.slane %v1838_v10, 4  ;;  %v573_v14 = vcombine.high %v565_v63, %v565_v63  ;;  %v190_v15 = vpop.f32.mrb[10].mxu0  ;;  %v1551_v17 = vmax.f32 %v1549_v11, %v1550_v12  ;;  %v1845_v18 = vsel %vm1536_vm1, %v1545_v8, -inf }
 0x10b   :  { %v1833_v16 = vmax.f32 %v1831_v1, %v1832_v7  ;;  %v1852_v20 = vsel %vm1536_vm1, %v1548_v9, -inf  ;;  %v8270_v22 = vpop.f32.mrb[11].mxu0  ;;  %v1846_v25 = vrot.slane %v1845_v18, 4  ;;  %v1553_v28 = vsel %vm1536_vm1, %v565_v63, -inf }
 0x10c   :  { %v1840_v23 = vmax.f32 %v1838_v10, %v1839_v13  ;;  %v1853_v27 = vrot.slane %v1852_v20, 4  ;;  %v1556_v29 = vsel %vm1536_vm1, %v573_v14, -inf  ;;  %v558_v31 = vcombine.high %v412_v53, %v412_v53 }
 0x10d   :  { %v1834_v36 = vrot.slane %v1833_v16, 2  ;;  %v1859_v37 = vsel %vm1536_vm1, %v1551_v17, -inf  ;;  %v1554_v38 = vmax.f32 %v1552_v32, %v1553_v28  ;;  %v1557_v40 = vmax.f32 %v1555_v30, %v1556_v29 }
 0x10e   :  { %v195_v33 = vpop.f32.mrb[12].mxu0  ;;  %v1841_v42 = vrot.slane %v1840_v23, 2  ;;  %v1847_v43 = vmax.f32 %v1845_v18, %v1846_v25  ;;  %v1854_v44 = vmax.f32 %v1852_v20, %v1853_v27  ;;  %v413_v46 = vmax.f32 %v186_v24, 0.0 }
 0x10f   :  { %v8273_v41 = vpop.f32.mrb[13].mxu0  ;;  %v1866_v45 = vsel %vm1536_vm1, %v1554_v38, -inf  ;;  %v1860_v47 = vrot.slane %v1859_v37, 4  ;;  %v572_v39 = vrot.slane %v558_v31, %v9066_v26  ;;  %v9100_v50 = vmax.f32 %v1833_v16, %v1834_v36 }
 0x110   :  { %v1867_v51 = vrot.slane %v1866_v45, 4  ;;  %v575_v52 = vcombine.high %v413_v46, %v413_v46  ;;  %v9102_v54 = vmax.f32 %v1840_v23, %v1841_v42  ;;  %v1848_v55 = vrot.slane %v1847_v43, 2 }
 0x111   :  { %v1855_v56 = vrot.slane %v1854_v44, 2  ;;  %v582_v57 = vrot.slane %v413_v46, %v9066_v26  ;;  %v9106_v60 = vmax.f32 %v1859_v37, %v1860_v47  ;;  %v574_v61 = vcombine.high %v572_v39, %v572_v39 }
 0x112   :  { %v200_v48 = vpop.f32.mrb[14].mxu0  ;;  %v589_v58 = vrot.slane %v575_v52, %v9066_v26  ;;  %v191_v62 = vadd.f32 %v9060_v19, %v190_v15  ;;  %v9110_v0 = vsub.s32 %v3167_v49, %v9062_v21  ;;  %v1836_v1 = vrot.slane %v9100_v50, 1 }
 0x113   :  { %v8276_v53 = vpop.f32.mrb[15].mxu0  ;;  %v1558_v2 = vsel %vm1536_vm1, %v572_v39, -inf  ;;  %v9114_v4 = vmax.f32 %v1866_v45, %v1867_v51  ;;  %v9117_v5 = vsel %vm1536_vm1, %v1557_v40, -inf  ;;  %v1843_v8 = vrot.slane %v9102_v54, 1 }
 0x114   :  { %v590_v9 = vcombine.high %v582_v57, %v582_v57  ;;  %v414_v10 = vmax.f32 %v191_v62, 0.0  ;;  %v196_v11 = vadd.f32 %v9060_v19, %v195_v33  ;;  %v9121_v12 = vmax.f32 %v1847_v43, %v1848_v55 }
 0x115   :  { %v9123_v21 = vmax.f32 %v1854_v44, %v1855_v56  ;;  %v591_v13 = vcombine.high %v589_v58, %v589_v58  ;;  %v201_v14 = vadd.f32 %v9060_v19, %v200_v48  ;;  %v1862_v15 = vrot.slane %v9106_v60, 2 }
 0x116   :  { %v205_v63 = vpop.f32.mrb[16].mxu0  ;;  %v592_v16 = vcombine.high %v414_v10, %v414_v10  ;;  %v599_v17 = vrot.slane %v414_v10, %v9066_v26  ;;  %v415_v18 = vmax.f32 %v196_v11, 0.0  ;;  %v1869_v22 = vrot.slane %v9114_v4, 2 }
 0x117   :  { %v8279_v7 = vpop.f32.mrb[17].mxu0  ;;  %v1564_v23 = vsel %vm1536_vm1, %v582_v57, -inf  ;;  %v1570_v24 = vsel %vm1536_vm1, %v589_v58, -inf  ;;  %v1561_v25 = vsel %vm1536_vm1, %v574_v61, -inf  ;;  %v1567_v31 = vsel %vm1536_vm1, %v590_v9, -inf }
 0x118   :  { %v606_v28 = vrot.slane %v592_v16, %v9066_v26  ;;  %v607_v29 = vcombine.high %v599_v17, %v599_v17  ;;  %v609_v30 = vcombine.high %v415_v18, %v415_v18  ;;  %v616_v32 = vrot.slane %v415_v18, %v9066_v26 }
 0x119   :  { %v1573_v33 = vsel %vm1536_vm1, %v591_v13, -inf  ;;  %v416_v34 = vmax.f32 %v201_v14, 0.0  ;;  %v206_v35 = vadd.f32 %v9060_v19, %v205_v63  ;;  %v1576_v63 = vsel %vm1536_vm1, %v599_v17, -inf }
 0x11a   :  { %v9128_v20 = vpop.f32.mrb[18].mxu0  ;;  %v608_v36 = vcombine.high %v606_v28, %v606_v28  ;;  %v1559_v37 = vsel %vm1536_vm1, %v607_v29, -inf  ;;  %v1562_v38 = vsel %vm1536_vm1, %v606_v28, -inf  ;;  %v623_v40 = vrot.slane %v609_v30, %v9066_v26 }
 0x11b   :  { %v8282_v27 = vpop.f32.mrb[19].mxu0  ;;  %v1560_v42 = vmax.f32 %v1558_v2, %v1559_v37  ;;  %v1563_v43 = vmax.f32 %v1561_v25, %v1562_v38  ;;  %v624_v44 = vcombine.high %v616_v32, %v616_v32  ;;  %v1568_v45 = vsel %vm1536_vm1, %v616_v32, -inf }
 0x11c   :  { %v1565_v47 = vsel %vm1536_vm1, %v608_v36, -inf  ;;  %v625_v39 = vcombine.high %v623_v40, %v623_v40  ;;  %v1569_v48 = vmax.f32 %v1567_v31, %v1568_v45  ;;  %v1574_v49 = vsel %vm1536_vm1, %v623_v40, -inf }
 0x11d   :  { %v1566_v51 = vmax.f32 %v1564_v23, %v1565_v47  ;;  %v1880_v52 = vsel %vm1536_vm1, %v1560_v42, -inf  ;;  %v1887_v53 = vsel %vm1536_vm1, %v1563_v43, -inf  ;;  %v1571_v55 = vsel %vm1536_vm1, %v624_v44, -inf }
 0x11e   :  { %v9142_v41 = vpop.f32.mrb[20].mxu0  ;;  %v1881_v56 = vrot.slane %v1880_v52, 4  ;;  %v1888_v57 = vrot.slane %v1887_v53, 4  ;;  %v1572_v58 = vmax.f32 %v1570_v24, %v1571_v55  ;;  %v1575_v61 = vmax.f32 %v1573_v33, %v1574_v49 }
 0x11f   :  { %v8285_v46 = vpop.f32.mrb[21].mxu0  ;;  %v1894_v2 = vsel %vm1536_vm1, %v1566_v51, -inf  ;;  %v1577_v7 = vsel %vm1536_vm1, %v625_v39, -inf  ;;  %v1901_v9 = vsel %vm1536_vm1, %v1569_v48, -inf  ;;  %v1874_v18 = vrot.slane %v9117_v5, 4 }
 0x120   :  { %v1882_v11 = vmax.f32 %v1880_v52, %v1881_v56  ;;  %v1889_v13 = vmax.f32 %v1887_v53, %v1888_v57  ;;  %v1895_v14 = vrot.slane %v1894_v2, 4  ;;  %v1578_v16 = vmax.f32 %v1576_v63, %v1577_v7 }
 0x121   :  { %v1902_v23 = vrot.slane %v1901_v9, 4  ;;  %v1908_v24 = vsel %vm1536_vm1, %v1572_v58, -inf  ;;  %v626_v25 = vcombine.high %v416_v34, %v416_v34  ;;  %v9161_v17 = vmax.f32 %v9100_v50, %v1836_v1 }
 0x122   :  { %v9150_v62 = vpop.f32.mrb[22].mxu0  ;;  %v9166_v27 = vmax.f32 %v9102_v54, %v1843_v8  ;;  %v1850_v28 = vrot.slane %v9121_v12, 1  ;;  %v417_v29 = vmax.f32 %v206_v35, 0.0  ;;  %v1883_v31 = vrot.slane %v1882_v11, 2 }
 0x123   :  { %v8288_v10 = vpop.f32.mrb[23].mxu0  ;;  %v1890_v32 = vrot.slane %v1889_v13, 2  ;;  %v1896_v33 = vmax.f32 %v1894_v2, %v1895_v14  ;;  %v1915_v36 = vsel %vm1536_vm1, %v1575_v61, -inf  ;;  %v1857_v38 = vrot.slane %v9123_v21, 1 }
 0x124   :  { %v1863_v50 = vmax.f32 %v9106_v60, %v1862_v15  ;;  %v9177_v54 = vmax.f32 %v9114_v4, %v1869_v22  ;;  %v1909_v1 = vrot.slane %v1908_v24, 4  ;;  %v1875_v8 = vmax.f32 %v9117_v5, %v1874_v18 }
 0x125   :  { %v9180_v35 = vmax.f32 %v1901_v9, %v1902_v23  ;;  %v633_v40 = vrot.slane %v416_v34, %v9066_v26  ;;  %v640_v42 = vrot.slane %v626_v25, %v9066_v26  ;;  %v1851_v43 = vmax.f32 %v9121_v12, %v1850_v28 }
 0x126   :  { %v9169_v30 = vpop.f32.mrb[24].mxu0  ;;  %v1916_v44 = vrot.slane %v1915_v36, 4  ;;  %v643_v45 = vcombine.high %v417_v29, %v417_v29  ;;  %v211_v60 = vadd.f32 %v9060_v19, %v9128_v20  ;;  %v9189_v15 = vmax.f32 %v1882_v11, %v1883_v31 }
 0x127   :  { %v8291_v37 = vpop.f32.mrb[25].mxu0  ;;  %v9191_v22 = vmax.f32 %v1889_v13, %v1890_v32  ;;  %v1897_v5 = vrot.slane %v1896_v33, 2  ;;  %v9194_v46 = vsel %vm1536_vm1, %v1578_v16, -inf  ;;  %v9197_v47 = vmax.f32 %v9123_v21, %v1857_v38 }
 0x128   :  { %v1871_v12 = vrot.slane %v9177_v54, 1  ;;  %v9200_v39 = vmax.f32 %v1908_v24, %v1909_v1  ;;  %v1864_v20 = vrot.slane %v1863_v50, 1  ;;  %v1904_v48 = vrot.slane %v9180_v35, 2 }
 0x129   :  { %v641_v49 = vcombine.high %v633_v40, %v633_v40  ;;  %v642_v51 = vcombine.high %v640_v42, %v640_v42  ;;  %v9204_v52 = vrot.slane %v417_v29, %v9066_v26  ;;  %v9206_v53 = vmax.f32 %v1915_v36, %v1916_v44 }
 0x12a   :  { %v9187_v4 = vpop.f32.mrb[26].mxu0  ;;  %v1923_v55 = vrot.slane %v9194_v46, 4  ;;  %v9210_v21 = vrot.slane %v643_v45, %v9066_v26  ;;  %v418_v56 = vmax.f32 %v211_v60, 0.0  ;;  %v1885_v58 = vrot.slane %v9189_v15, 1 }
 0x12b   :  { %v8294_v34 = vpop.f32.mrb[27].mxu0  ;;  %v1892_v61 = vrot.slane %v9191_v22, 1  ;;  %v9216_v63 = vmax.f32 %v1896_v33, %v1897_v5  ;;  %v1579_v2 = vsel %vm1536_vm1, %v633_v40, -inf  ;;  %v1911_v9 = vrot.slane %v9200_v39, 2 }
 0x12c   :  { %v1585_v10 = vsel %vm1536_vm1, %v640_v42, -inf  ;;  %v659_v11 = vcombine.high %v9210_v21, %v9210_v21  ;;  %v660_v13 = vcombine.high %v418_v56, %v418_v56  ;;  %v1591_v14 = vsel %vm1536_vm1, %v9204_v52, -inf }
 0x12d   :  { %v667_v16 = vrot.slane %v418_v56, %v9066_v26  ;;  %v1582_v18 = vsel %vm1536_vm1, %v641_v49, -inf  ;;  %v1588_v23 = vsel %vm1536_vm1, %v642_v51, -inf  ;;  %v1865_v28 = vmax.f32 %v1863_v50, %v1864_v20 }
 0x12e   :  { %v9212_v57 = vpop.f32.mrb[28].mxu0  ;;  %v1580_v24 = vsel %vm1536_vm1, %v659_v11, -inf  ;;  %v674_v25 = vrot.slane %v660_v13, %v9066_v26  ;;  %v1876_v29 = vrot.slane %v1875_v8, 2  ;;  %v2616_v37 = vsel %vm2615_vm2, %v9166_v27, %v9161_v17 }
 0x12f   :  { %v8297_v7 = vpop.f32.mrb[29].mxu0  ;;  %v1581_v32 = vmax.f32 %v1579_v2, %v1580_v24  ;;  %v675_v33 = vcombine.high %v667_v16, %v667_v16  ;;  %v1583_v36 = vsel %vm1536_vm1, %v667_v16, -inf  ;;  %v2618_v5 = vsel %vm2617_vm3, %v1851_v43, %v2616_v37 }
 0x130   :  { %v676_v1 = vcombine.high %v674_v25, %v674_v25  ;;  %v1584_v40 = vmax.f32 %v1582_v18, %v1583_v36  ;;  %v1589_v42 = vsel %vm1536_vm1, %v674_v25, -inf  ;;  %v1877_v44 = vmax.f32 %v1875_v8, %v1876_v29 }
 0x131   :  { %v1929_v50 = vsel %vm1536_vm1, %v1581_v32, -inf  ;;  %v1586_v45 = vsel %vm1536_vm1, %v675_v33, -inf  ;;  %v1590_v60 = vmax.f32 %v1588_v23, %v1589_v42  ;;  %v1872_v2 = vmax.f32 %v9177_v54, %v1871_v12 }
 0x132   :  { %v9230_v31 = vpop.f32.mrb[30].mxu0  ;;  %v1930_v34 = vrot.slane %v1929_v50, 4  ;;  %v1587_v20 = vmax.f32 %v1585_v10, %v1586_v45  ;;  %v1592_v49 = vsel %vm1536_vm1, %v676_v1, -inf  ;;  %v1936_v51 = vsel %vm1536_vm1, %v1584_v40, -inf }
 0x133   :  { %v8300_v38 = vpop.f32.mrb[31].mxu0  ;;  %v1593_v27 = vmax.f32 %v1591_v14, %v1592_v49  ;;  %v1937_v56 = vrot.slane %v1936_v51, 4  ;;  %v1878_v8 = vrot.slane %v1877_v44, 1  ;;  %v9246_v11 = vmax.f32 %v9180_v35, %v1904_v48 }
 0x134   :  { %v1931_v13 = vmax.f32 %v1929_v50, %v1930_v34  ;;  %v1950_v43 = vsel %vm1536_vm1, %v1590_v60, -inf  ;;  %v2620_v10 = vsel %vm2619_vm4, %v9197_v47, %v2618_v5  ;;  %v1918_v16 = vrot.slane %v9206_v53, 2 }
 0x135   :  { %v1938_v18 = vmax.f32 %v1936_v51, %v1937_v56  ;;  %v1943_v23 = vsel %vm1536_vm1, %v1587_v20, -inf  ;;  %v1879_v14 = vmax.f32 %v1877_v44, %v1878_v8  ;;  %v9254_v24 = vmax.f32 %v9189_v15, %v1885_v58 }
 0x136   :  { %v9242_v17 = vpop.f32.mrb[32].mxu0  ;;  %v9257_v54 = vmax.f32 %v9194_v46, %v1923_v55  ;;  %v1932_v35 = vrot.slane %v1931_v13, 2  ;;  %v2622_v12 = vsel %vm2621_vm5, %v1865_v28, %v2620_v10  ;;  %v1951_v29 = vrot.slane %v1950_v43, 4 }
 0x137   :  { %v8303_v7 = vpop.f32.mrb[33].mxu0  ;;  %v1939_v25 = vrot.slane %v1938_v18, 2  ;;  %v2624_v47 = vsel %vm2623_vm6, %v1872_v2, %v2622_v12  ;;  %v216_v32 = vadd.f32 %v9060_v19, %v9142_v41  ;;  %v9268_v15 = vmax.f32 %v9191_v22, %v1892_v61 }
 0x138   :  { %v1933_v46 = vmax.f32 %v1931_v13, %v1932_v35  ;;  %v1944_v55 = vrot.slane %v1943_v23, 4  ;;  %v2626_v58 = vsel %vm2625_vm7, %v1879_v14, %v2624_v47  ;;  %v1957_v36 = vsel %vm1536_vm1, %v1593_v27, -inf }
 0x139   :  { %v1940_v28 = vmax.f32 %v1938_v18, %v1939_v25  ;;  %v9273_v37 = vsel %vm2719_vm8, 0.0, %v2626_v58  ;;  %v419_v38 = vmax.f32 %v216_v32, 0.0  ;;  %v1899_v41 = vrot.slane %v9216_v63, 1 }
 0x13a   :  { %v9260_v48 = vpop.f32.mrb[34].mxu0  ;;  %v9279_v1 = vmax.f32 %v9200_v39, %v1911_v9  ;;  %v658_v22 = vcombine.high %v9204_v52, %v9204_v52  ;;  %v1934_v61 = vrot.slane %v1933_v46, 1  ;;  %2867 = vrot.lane.b32.xlu1 %v9273_v37, %s8702_s9  ;;  %v1952_v44 = vmax.f32 %v1950_v43, %v1951_v29 }
 0x13b   :  { %v8306_v33 = vpop.f32.mrb[35].mxu0  ;;  %v1941_v42 = vrot.slane %v1940_v28, 1  ;;  %v677_v50 = vcombine.high %v419_v38, %v419_v38  ;;  %v684_v45 = vrot.slane %v419_v38, %v9066_v26  ;;  %v1906_v5 = vrot.slane %v9246_v11, 1 }
 0x13c   :  { %v1935_v34 = vmax.f32 %v1933_v46, %v1934_v61  ;;  %v1958_v39 = vrot.slane %v1957_v36, 4  ;;  %v12833_v9 = vrot.slane %v9273_v37, 1  ;;  %v9291_v52 = vmax.f32 %v9206_v53, %v1918_v16 }
 0x13d   :  { %v1942_v20 = vmax.f32 %v1940_v28, %v1941_v42  ;;  %v1945_v49 = vmax.f32 %v1943_v23, %v1944_v55  ;;  %v692_v51 = vcombine.high %v684_v45, %v684_v45  ;;  %v691_v27 = vrot.slane %v677_v50, %v9066_v26 }
 0x13e   :  { %v9285_v40 = vpop.f32.mrb[36].mxu0  ;;  %v1594_v56 = vsel %vm1536_vm1, %v658_v22, -inf  ;;  %v1595_v2 = vsel %vm1536_vm1, %v684_v45, -inf  ;;  %2762 = vrot.lane.b32.xlu0 %v12833_v9, %s8703_s1  ;;  %v221_v8 = vadd.f32 %v9060_v19, %v9150_v62  ;;  %v1597_v53 = vsel %vm1536_vm1, %v9210_v21, -inf }
 0x13f   :  { %v8309_v60 = vpop.f32.mrb[37].mxu0  ;;  %v1953_v13 = vrot.slane %v1952_v44, 2  ;;  %v9306_v43 = vsel %vm2615_vm2, %v1942_v20, %v1935_v34  ;;  %v1596_v10 = vmax.f32 %v1594_v56, %v1595_v2  ;;  %v9308_v18 = vmax.f32 %v1957_v36, %v1958_v39 }
 0x140   :  { %v1598_v23 = vsel %vm1536_vm1, %v692_v51, -inf  ;;  %v420_v14 = vmax.f32 %v221_v8, 0.0  ;;  %v2802_v35 = vrot.slane %v9273_v37, 2  ;;  %v1946_v12 = vrot.slane %v1945_v49, 2 }
 0x141   :  { %v1599_v62 = vmax.f32 %v1597_v53, %v1598_v23  ;;  %v1964_v25 = vsel %vm1536_vm1, %v1596_v10, -inf  ;;  %v226_v21 = vadd.f32 %v9060_v19, %v9169_v30  ;;  %v693_v29 = vcombine.high %v691_v27, %v691_v27 }
 0x142   :  { %v9301_v7 = vpop.f32.mrb[38].mxu0  ;;  %v1965_v47 = vrot.slane %v1964_v25, 4  ;;  %v694_v32 = vcombine.high %v420_v14, %v420_v14  ;;  %v2803_v33 = vsel %vm2799_vm9, %v2802_v35, %v8969_v59  ;;  %v1925_v55 = vrot.slane %v9257_v54, 2 }
 0x143   :  { %v8312_v16 = vpop.f32.mrb[39].mxu0  ;;  %v701_v58 = vrot.slane %v420_v14, %v9066_v26  ;;  %2929 = vrot.lane.b32.xlu0 %v2803_v33, %s8703_s1  ;;  %v421_v28 = vmax.f32 %v226_v21, 0.0  ;;  %v231_v36 = vadd.f32 %v9060_v19, %v9187_v4  ;;  %v1913_v30 = vrot.slane %v9279_v1, 1 }
 0x144   :  { %v9325_v22 = vmax.f32 %v1952_v44, %v1953_v13  ;;  %v1960_v61 = vrot.slane %v9308_v18, 2  ;;  %v1966_v42 = vmax.f32 %v1964_v25, %v1965_v47  ;;  %v1971_v50 = vsel %vm1536_vm1, %v1599_v62, -inf }
 0x145   :  { %v711_v45 = vcombine.high %v421_v28, %v421_v28  ;;  %v718_v60 = vrot.slane %v421_v28, %v9066_v26  ;;  %v422_v34 = vmax.f32 %v231_v36, 0.0  ;;  %v9330_v39 = vmax.f32 %v1945_v49, %v1946_v12 }
 0x146   :  { %v9317_v46 = vpop.f32.mrb[40].mxu0  ;;  %v1600_v20 = vsel %vm1536_vm1, %v691_v27, -inf  ;;  %v708_v4 = vrot.slane %v694_v32, %v9066_v26  ;;  %v1603_v51 = vsel %vm1536_vm1, %v693_v29, -inf  ;;  %v709_v44 = vcombine.high %v701_v58, %v701_v58 }
 0x147   :  { %v8315_v38 = vpop.f32.mrb[41].mxu0  ;;  %v725_v2 = vrot.slane %v711_v45, %v9066_v26  ;;  %v726_v8 = vcombine.high %v718_v60, %v718_v60  ;;  %2828 = vrot.lane.b32.xlu0 %v2803_v33, %s8701_s29  ;;  %v728_v53 = vcombine.high %v422_v34, %v422_v34  ;;  %v1967_v10 = vrot.slane %v1966_v42, 2 }
 0x148   :  { %v1972_v16 = vrot.slane %v1971_v50, 4  ;;  %v1606_v49 = vsel %vm1536_vm1, %v701_v58, -inf  ;;  %v735_v27 = vrot.slane %v422_v34, %v9066_v26  ;;  %v710_v62 = vcombine.high %v708_v4, %v708_v4 }
 0x149   :  { %v727_v23 = vcombine.high %v725_v2, %v725_v2  ;;  %v1601_v14 = vsel %vm1536_vm1, %v726_v8, -inf  ;;  %v1604_v35 = vsel %vm1536_vm1, %v725_v2, -inf  ;;  %v742_v12 = vrot.slane %v728_v53, %v9066_v26 }
 0x14a   :  { %v9335_v56 = vpop.f32.mrb[42].mxu0  ;;  %v1612_v25 = vsel %vm1536_vm1, %v708_v4, -inf  ;;  %v1602_v21 = vmax.f32 %v1600_v20, %v1601_v14  ;;  %v1605_v29 = vmax.f32 %v1603_v51, %v1604_v35  ;;  %v743_v33 = vcombine.high %v735_v27, %v735_v27 }
 0x14b   :  { %v8318_v13 = vpop.f32.mrb[43].mxu0  ;;  %v1607_v32 = vsel %vm1536_vm1, %v727_v23, -inf  ;;  %v1609_v58 = vsel %vm1536_vm1, %v709_v44, -inf  ;;  %v1610_v28 = vsel %vm1536_vm1, %v735_v27, -inf  ;;  %v744_v2 = vcombine.high %v742_v12, %v742_v12 }
 0x14c   :  { %v1608_v38 = vmax.f32 %v1606_v49, %v1607_v32  ;;  %v1978_v45 = vsel %vm1536_vm1, %v1602_v21, -inf  ;;  %v1985_v34 = vsel %vm1536_vm1, %v1605_v29, -inf  ;;  %v1611_v20 = vmax.f32 %v1609_v58, %v1610_v28 }
 0x14d   :  { %v1979_v8 = vrot.slane %v1978_v45, 4  ;;  %v1986_v4 = vrot.slane %v1985_v34, 4  ;;  %v1613_v51 = vsel %vm1536_vm1, %v743_v33, -inf  ;;  %v1615_v23 = vsel %vm1536_vm1, %v710_v62, -inf }
 0x14e   :  { %v9345_v47 = vpop.f32.mrb[44].mxu0  ;;  %v1992_v53 = vsel %vm1536_vm1, %v1608_v38, -inf  ;;  %v1614_v13 = vmax.f32 %v1612_v25, %v1613_v51  ;;  %v1616_v44 = vsel %vm1536_vm1, %v742_v12, -inf  ;;  %v1973_v49 = vmax.f32 %v1971_v50, %v1972_v16 }
 0x14f   :  { %v8321_v36 = vpop.f32.mrb[45].mxu0  ;;  %v1980_v14 = vmax.f32 %v1978_v45, %v1979_v8  ;;  %v1987_v35 = vmax.f32 %v1985_v34, %v1986_v4  ;;  %v1617_v21 = vmax.f32 %v1615_v23, %v1616_v44  ;;  %v1618_v32 = vsel %vm1536_vm1, %v718_v60, -inf }
 0x150   :  { %v1993_v36 = vrot.slane %v1992_v53, 4  ;;  %v1619_v58 = vsel %vm1536_vm1, %v744_v2, -inf  ;;  %v1926_v25 = vmax.f32 %v9257_v54, %v1925_v55  ;;  %v1900_v12 = vmax.f32 %v9216_v63, %v1899_v41 }
 0x151   :  { %v1955_v62 = vrot.slane %v9325_v22, 1  ;;  %v1968_v50 = vmax.f32 %v1966_v42, %v1967_v10  ;;  %v1620_v16 = vmax.f32 %v1618_v32, %v1619_v58  ;;  %v1920_v33 = vrot.slane %v9291_v52, 1 }
 0x152   :  { %v9356_v27 = vpop.f32.mrb[46].mxu0  ;;  %v9369_v28 = vmax.f32 %v9308_v18, %v1960_v61  ;;  %v1981_v60 = vrot.slane %v1980_v14, 2  ;;  %v1999_v38 = vsel %vm1536_vm1, %v1611_v20, -inf  ;;  %v1948_v54 = vrot.slane %v9330_v39, 1 }
 0x153   :  { %v8324_v29 = vpop.f32.mrb[47].mxu0  ;;  %v1974_v55 = vrot.slane %v1973_v49, 2  ;;  %v1988_v34 = vrot.slane %v1987_v35, 2  ;;  %v2006_v63 = vsel %vm1536_vm1, %v1614_v13, -inf  ;;  %v1907_v42 = vmax.f32 %v9246_v11, %v1906_v5 }
 0x154   :  { %v1914_v18 = vmax.f32 %v9279_v1, %v1913_v30  ;;  %v1994_v61 = vmax.f32 %v1992_v53, %v1993_v36  ;;  %v1927_v10 = vrot.slane %v1926_v25, 1  ;;  %v9383_v2 = vmax.f32 %v9325_v22, %v1955_v62 }
 0x155   :  { %v1969_v8 = vrot.slane %v1968_v50, 1  ;;  %v2000_v4 = vrot.slane %v1999_v38, 4  ;;  %v2013_v20 = vsel %vm1536_vm1, %v1617_v21, -inf  ;;  %v1962_v51 = vrot.slane %v9369_v28, 1 }
 0x156   :  { %v9372_v45 = vpop.f32.mrb[48].mxu0  ;;  %v1982_v13 = vmax.f32 %v1980_v14, %v1981_v60  ;;  %v2007_v23 = vrot.slane %v2006_v63, 4  ;;  %v2627_v11 = vsel %vm2615_vm2, %v9268_v15, %v9254_v24  ;;  %v9393_v1 = vmax.f32 %v9330_v39, %v1948_v54 }
 0x157   :  { %v8327_v41 = vpop.f32.mrb[49].mxu0  ;;  %v9395_v30 = vmax.f32 %v1973_v49, %v1974_v55  ;;  %v9397_v22 = vmax.f32 %v1987_v35, %v1988_v34  ;;  %v1921_v53 = vmax.f32 %v9291_v52, %v1920_v33  ;;  %v1995_v21 = vrot.slane %v1994_v61, 2 }
 0x158   :  { %v2014_v29 = vrot.slane %v2013_v20, 4  ;;  %v1928_v14 = vmax.f32 %v1926_v25, %v1927_v10  ;;  %v2628_v32 = vsel %vm2617_vm3, %v1900_v12, %v2627_v11  ;;  %v9401_v36 = vmax.f32 %v1968_v50, %v1969_v8 }
 0x159   :  { %v9403_v24 = vmax.f32 %v1999_v38, %v2000_v4  ;;  %v2629_v15 = vsel %vm2619_vm4, %v1907_v42, %v2628_v32  ;;  %v236_v39 = vadd.f32 %v9060_v19, %v9212_v57  ;;  %v1983_v49 = vrot.slane %v1982_v13, 1 }
 0x15a   :  { %v9390_v5 = vpop.f32.mrb[50].mxu0  ;;  %v9408_v35 = vmax.f32 %v2006_v63, %v2007_v23  ;;  %v9411_v52 = vsel %vm1536_vm1, %v1620_v16, -inf  ;;  %v2630_v58 = vsel %vm2621_vm5, %v1914_v18, %v2629_v15  ;;  %v1990_v12 = vrot.slane %v9397_v22, 1 }
 0x15b   :  { %v8330_v44 = vpop.f32.mrb[51].mxu0  ;;  %v2631_v62 = vsel %vm2623_vm6, %v1921_v53, %v2630_v58  ;;  %v423_v50 = vmax.f32 %v236_v39, 0.0  ;;  %v241_v33 = vadd.f32 %v9060_v19, %v9230_v31  ;;  %v9420_v57 = vmax.f32 %v1994_v61, %v1995_v21 }
 0x15c   :  { %v9422_v38 = vmax.f32 %v2013_v20, %v2014_v29  ;;  %v2632_v16 = vsel %vm2625_vm7, %v1928_v14, %v2631_v62  ;;  %v246_v54 = vadd.f32 %v9060_v19, %v9242_v17  ;;  %v2002_v42 = vrot.slane %v9403_v24, 2 }
 0x15d   :  { %v9428_v55 = vsel %vm2719_vm8, 0.0, %v2632_v16  ;;  %v745_v34 = vcombine.high %v423_v50, %v423_v50  ;;  %v752_v63 = vrot.slane %v423_v50, %v9066_v26  ;;  %v424_v41 = vmax.f32 %v241_v33, 0.0 }
 0x15e   :  { %v9414_v25 = vpop.f32.mrb[52].mxu0  ;;  %12884 = vst [vmem:[#allocation5_spill] sm:$0xff] %v9428_v55  ;;  %v2009_v31 = vrot.slane %v9408_v35, 2  ;;  %2869 = vrot.lane.b32.xlu0 %v9428_v55, %s8702_s9  ;;  %2971 = vrot.lane.b32.xlu1 %v9428_v55, %s8701_s29  ;;  %v2804_v18 = vrot.slane %v9428_v55, 2  ;;  %v425_v19 = vmax.f32 %v246_v54, 0.0  ;;  %v2021_v61 = vrot.slane %v9411_v52, 4 }
 0x15f   :  { %v8333_v60 = vpop.f32.mrb[53].mxu0  ;;  %v759_v10 = vrot.slane %v745_v34, %v9066_v26  ;;  %v760_v8 = vcombine.high %v752_v63, %v752_v63  ;;  %v762_v4 = vcombine.high %v424_v41, %v424_v41  ;;  %v9443_v23 = vrot.slane %v9428_v55, 1 }
 0x160   :  { %v9446_v11 = vrot.slane %v424_v41, %v9066_v26  ;;  %v779_v53 = vcombine.high %v425_v19, %v425_v19  ;;  %v786_v44 = vrot.slane %v425_v19, %v9066_v26  ;;  %v9449_v21 = vmax.f32 %v1982_v13, %v1983_v49 }
 0x161   :  { %12885 = vst [vmem:[#allocation6_spill] sm:$0xff] %v9443_v23  ;;  %v761_v29 = vcombine.high %v759_v10, %v759_v10  ;;  %v9452_v14 = vrot.slane %v762_v4, %v9066_v26  ;;  %v1963_v32 = vmax.f32 %v9369_v28, %v1962_v51  ;;  %v1621_v15 = vsel %vm1536_vm1, %v752_v63, -inf }
 0x162   :  { %v9438_v17 = vpop.f32.mrb[54].mxu0  ;;  %v1627_v39 = vsel %vm1536_vm1, %v759_v10, -inf  ;;  %2764 = vrot.lane.b32.xlu0 %v9443_v23, %s8703_s1  ;;  %3010 = vrot.lane.b32.xlu1 %v9443_v23, %s8702_s9  ;;  %v9463_v13 = vsel %vm2799_vm9, %v2804_v18, %v8969_v59  ;;  %v793_v49 = vrot.slane %v779_v53, %v9066_v26  ;;  %v1633_v51 = vsel %vm1536_vm1, %v9446_v11, -inf }
 0x163   :  { %v8336_v20 = vpop.f32.mrb[55].mxu0  ;;  %v778_v28 = vcombine.high %v9452_v14, %v9452_v14  ;;  %v794_v62 = vcombine.high %v786_v44, %v786_v44  ;;  %v1624_v50 = vsel %vm1536_vm1, %v760_v8, -inf  ;;  %v1625_v16 = vsel %vm1536_vm1, %v786_v44, -inf }
 0x164   :  { %v795_v60 = vcombine.high %v793_v49, %v793_v49  ;;  %v1630_v54 = vsel %vm1536_vm1, %v761_v29, -inf  ;;  %v1631_v34 = vsel %vm1536_vm1, %v793_v49, -inf  ;;  %v1626_v41 = vmax.f32 %v1624_v50, %v1625_v16 }
 0x165   :  { %v1622_v63 = vsel %vm1536_vm1, %v778_v28, -inf  ;;  %v1628_v18 = vsel %vm1536_vm1, %v794_v62, -inf  ;;  %v1632_v19 = vmax.f32 %v1630_v54, %v1631_v34  ;;  %v1976_v20 = vrot.slane %v9395_v30, 1 }
 0x166   :  { %v9466_v58 = vpop.f32.mrb[56].mxu0  ;;  %v1623_v10 = vmax.f32 %v1621_v15, %v1622_v63  ;;  %2931 = vrot.lane.b32.xlu0 %v9463_v13, %s8703_s1  ;;  %v1629_v4 = vmax.f32 %v1627_v39, %v1628_v18  ;;  %v1634_v8 = vsel %vm1536_vm1, %v795_v60, -inf  ;;  %v2034_v29 = vsel %vm1536_vm1, %v1626_v41, -inf }
 0x167   :  { %v8339_v33 = vpop.f32.mrb[57].mxu0  ;;  %v1635_v44 = vmax.f32 %v1633_v51, %v1634_v8  ;;  %v2048_v49 = vsel %vm1536_vm1, %v1632_v19, -inf  ;;  %v2634_v28 = vsel %vm2617_vm3, %v9393_v1, %v9306_v43  ;;  %v9492_v39 = vmax.f32 %v9397_v22, %v1990_v12 }
 0x168   :  { %v2027_v62 = vsel %vm1536_vm1, %v1623_v10, -inf  ;;  %v2035_v50 = vrot.slane %v2034_v29, 4  ;;  %v2041_v33 = vsel %vm1536_vm1, %v1629_v4, -inf  ;;  %v1997_v51 = vrot.slane %v9420_v57, 1 }
 0x169   :  { %v2016_v60 = vrot.slane %v9422_v38, 2  ;;  %v2028_v16 = vrot.slane %v2027_v62, 4  ;;  %v1977_v54 = vmax.f32 %v9395_v30, %v1976_v20  ;;  %v9500_v43 = vmax.f32 %v9403_v24, %v2002_v42  ;;  %v9512_v30 = vld [vmem:[%s12823_s2] ss:$0 sm:$0xff] }
 0x16a   :  { %v9482_v53 = vpop.f32.mrb[58].mxu0  ;;  %v2036_v1 = vmax.f32 %v2034_v29, %v2035_v50  ;;  %v2049_v34 = vrot.slane %v2048_v49, 4  ;;  %2830 = vrot.lane.b32.xlu0 %v9463_v13, %s8701_s29  ;;  %v2635_v22 = vsel %vm2619_vm4, %v9383_v2, %v2634_v28  ;;  %v2042_v41 = vrot.slane %v2041_v33, 4 }
 0x16b   :  { %v8342_v15 = vpop.f32.mrb[59].mxu0  ;;  %v2029_v63 = vmax.f32 %v2027_v62, %v2028_v16  ;;  %v2636_v18 = vsel %vm2621_vm5, %v1963_v32, %v2635_v22  ;;  %v251_v24 = vadd.f32 %v9512_v30, %v9260_v48  ;;  %v9519_v19 = vmax.f32 %v9408_v35, %v2009_v31 }
 0x16c   :  { %v2037_v2 = vrot.slane %v2036_v1, 2  ;;  %v2055_v10 = vsel %vm1536_vm1, %v1635_v44, -inf  ;;  %v2637_v32 = vsel %vm2623_vm6, %v9401_v36, %v2636_v18  ;;  %v9527_v4 = vmax.f32 %v9411_v52, %v2021_v61 }
 0x16d   :  { %v2030_v8 = vrot.slane %v2029_v63, 2  ;;  %v2638_v48 = vsel %vm2625_vm7, %v1977_v54, %v2637_v32  ;;  %v426_v20 = vmax.f32 %v251_v24, 0.0  ;;  %v777_v29 = vcombine.high %v9446_v11, %v9446_v11 }
 0x16e   :  { %v9506_v12 = vpop.f32.mrb[60].mxu0  ;;  %v2038_v35 = vmax.f32 %v2036_v1, %v2037_v2  ;;  %v2050_v31 = vmax.f32 %v2048_v49, %v2049_v34  ;;  %v9533_v28 = vsel %vm2719_vm8, 0.0, %v2638_v48  ;;  %v2043_v15 = vmax.f32 %v2041_v33, %v2042_v41 }
 0x16f   :  { %v8345_v42 = vpop.f32.mrb[61].mxu0  ;;  %12886 = vst [vmem:[#allocation7_spill] sm:$0xff] %v9533_v28  ;;  %v2031_v36 = vmax.f32 %v2029_v63, %v2030_v8  ;;  %v2056_v62 = vrot.slane %v2055_v10, 4  ;;  %2973 = vrot.lane.b32.xlu1 %v9533_v28, %s8701_s29  ;;  %v803_v52 = vrot.slane %v426_v20, %v9066_v26  ;;  %v9541_v50 = vmax.f32 %v9420_v57, %v1997_v51 }
 0x170   :  { %v9544_v11 = vmax.f32 %v9422_v38, %v2016_v60  ;;  %v2039_v49 = vrot.slane %v2038_v35, 1  ;;  %v796_v16 = vcombine.high %v426_v20, %v426_v20  ;;  %v1639_v33 = vsel %vm1536_vm1, %v9452_v14, -inf }
 0x171   :  { %v2032_v1 = vrot.slane %v2031_v36, 1  ;;  %v811_v34 = vcombine.high %v803_v52, %v803_v52  ;;  %v2051_v63 = vrot.slane %v2050_v31, 2  ;;  %v1636_v41 = vsel %vm1536_vm1, %v777_v29, -inf }
 0x172   :  { %v9535_v44 = vpop.f32.mrb[62].mxu0  ;;  %v2040_v22 = vmax.f32 %v2038_v35, %v2039_v49  ;;  %v1637_v18 = vsel %vm1536_vm1, %v803_v52, -inf  ;;  %v2044_v38 = vrot.slane %v2043_v15, 2  ;;  %v9553_v60 = vmax.f32 %v2055_v10, %v2056_v62 }
 0x173   :  { %v8348_v61 = vpop.f32.mrb[63].mxu0  ;;  %v2033_v51 = vmax.f32 %v2031_v36, %v2032_v1  ;;  %v1638_v24 = vmax.f32 %v1636_v41, %v1637_v18  ;;  %2871 = vrot.lane.b32.xlu1 %v9533_v28, %s8702_s9  ;;  %v810_v14 = vrot.slane %v796_v16, %v9066_v26  ;;  %v1640_v2 = vsel %vm1536_vm1, %v811_v34, -inf }
 0x174   :  { %v9560_v32 = vrot.slane %v9533_v28, 1  ;;  %v256_v8 = vadd.f32 %v9512_v30, %v9285_v40  ;;  %v1641_v10 = vmax.f32 %v1639_v33, %v1640_v2  ;;  %v2806_v29 = vrot.slane %v9533_v28, 2 }
 0x175   :  { %v9565_v48 = vsel %vm2615_vm2, %v2040_v22, %v2033_v51  ;;  %v2062_v20 = vsel %vm1536_vm1, %v1638_v24, -inf  ;;  %v9569_v35 = vmax.f32 %v2050_v31, %v2051_v63  ;;  %v261_v52 = vadd.f32 %v9512_v30, %v9301_v7 }
 0x176   :  { %v9551_v57 = vpop.f32.mrb[64].mxu0  ;;  %12887 = vst [vmem:[#allocation8_spill] sm:$0xff] %v9560_v32  ;;  %v2063_v36 = vrot.slane %v2062_v20, 4  ;;  %2766 = vrot.lane.b32.xlu0 %v9560_v32, %s8703_s1  ;;  %v427_v62 = vmax.f32 %v256_v8, 0.0  ;;  %v266_v31 = vadd.f32 %v9512_v30, %v9317_v46  ;;  %v812_v1 = vcombine.high %v810_v14, %v810_v14 }
 0x177   :  { %v8351_v42 = vpop.f32.mrb[65].mxu0  ;;  %3012 = vrot.lane.b32.xlu1 %v9560_v32, %s8702_s9  ;;  %v2069_v63 = vsel %vm1536_vm1, %v1641_v10, -inf  ;;  %v9588_v41 = vsel %vm2799_vm9, %v2806_v29, %v8969_v59  ;;  %v428_v18 = vmax.f32 %v261_v52, 0.0  ;;  %v9590_v24 = vmax.f32 %v2043_v15, %v2044_v38 }
 0x178   :  { %v2064_v34 = vmax.f32 %v2062_v20, %v2063_v36  ;;  %v813_v22 = vcombine.high %v427_v62, %v427_v62  ;;  %v820_v7 = vrot.slane %v427_v62, %v9066_v26  ;;  %12888 = vst [vmem:[#allocation9_spill] sm:$0xff] %v9588_v41  ;;  %v429_v51 = vmax.f32 %v266_v31, 0.0 }
 0x179   :  { %v2058_v46 = vrot.slane %v9553_v60, 2  ;;  %v1642_v10 = vsel %vm1536_vm1, %v810_v14, -inf  ;;  %v830_v20 = vcombine.high %v428_v18, %v428_v18  ;;  %v837_v29 = vrot.slane %v428_v18, %v9066_v26 }
 0x17a   :  { %v9575_v61 = vpop.f32.mrb[66].mxu0  ;;  %v827_v2 = vrot.slane %v813_v22, %v9066_v26  ;;  %2832 = vrot.lane.b32.xlu0 %v9588_v41, %s8701_s29  ;;  %v847_v15 = vcombine.high %v429_v51, %v429_v51  ;;  %v2065_v36 = vrot.slane %v2064_v34, 2  ;;  %v2070_v62 = vrot.slane %v2069_v63, 4 }
 0x17b   :  { %v8354_v33 = vpop.f32.mrb[67].mxu0  ;;  %2933 = vrot.lane.b32.xlu1 %v9588_v41, %s8703_s1  ;;  %v828_v52 = vcombine.high %v820_v7, %v820_v7  ;;  %v1645_v31 = vsel %vm1536_vm1, %v812_v1, -inf  ;;  %v844_v22 = vrot.slane %v830_v20, %v9066_v26  ;;  %v845_v6 = vcombine.high %v837_v29, %v837_v29 }
 0x17c   :  { %v829_v33 = vcombine.high %v827_v2, %v827_v2  ;;  %v854_v3 = vrot.slane %v429_v51, %v9066_v26  ;;  %v1648_v14 = vsel %vm1536_vm1, %v820_v7, -inf  ;;  %v1654_v18 = vsel %vm1536_vm1, %v827_v2, -inf }
 0x17d   :  { %v9609_v9 = vsel %vm1536_vm1, %v837_v29, -inf  ;;  %v846_v42 = vcombine.high %v844_v22, %v844_v22  ;;  %v1643_v1 = vsel %vm1536_vm1, %v845_v6, -inf  ;;  %v1646_v40 = vsel %vm1536_vm1, %v844_v22, -inf }
 0x17e   :  { %v9597_v8 = vpop.f32.mrb[68].mxu0  ;;  %v862_v20 = vcombine.high %v854_v3, %v854_v3  ;;  %v1644_v16 = vmax.f32 %v1642_v10, %v1643_v1  ;;  %v1647_v51 = vmax.f32 %v1645_v31, %v1646_v40  ;;  %v1651_v7 = vsel %vm1536_vm1, %v828_v52, -inf }
 0x17f   :  { %v8357_v38 = vpop.f32.mrb[69].mxu0  ;;  %v1649_v2 = vsel %vm1536_vm1, %v846_v42, -inf  ;;  %v1652_v29 = vsel %vm1536_vm1, %v854_v3, -inf  ;;  %v1657_v28 = vsel %vm1536_vm1, %v829_v33, -inf }
 0x180   :  { %v861_v38 = vrot.slane %v847_v15, %v9066_v26  ;;  %v1655_v15 = vsel %vm1536_vm1, %v862_v20, -inf  ;;  %v1650_v23 = vmax.f32 %v1648_v14, %v1649_v2  ;;  %v2076_v6 = vsel %vm1536_vm1, %v1644_v16, -inf }
 0x181   :  { %v2083_v22 = vsel %vm1536_vm1, %v1647_v51, -inf  ;;  %v1653_v55 = vmax.f32 %v1651_v7, %v1652_v29  ;;  %v2077_v40 = vrot.slane %v2076_v6, 4  ;;  %v1656_v31 = vmax.f32 %v1654_v18, %v1655_v15 }
 0x182   :  { %v9612_v49 = vpop.f32.mrb[70].mxu0  ;;  %v863_v32 = vcombine.high %v861_v38, %v861_v38  ;;  %v2084_v10 = vrot.slane %v2083_v22, 4  ;;  %v1658_v52 = vsel %vm1536_vm1, %v861_v38, -inf  ;;  %v2090_v3 = vsel %vm1536_vm1, %v1650_v23, -inf }
 0x183   :  { %v8360_v54 = vpop.f32.mrb[71].mxu0  ;;  %v1659_v1 = vmax.f32 %v1657_v28, %v1658_v52  ;;  %v2097_v33 = vsel %vm1536_vm1, %v1653_v55, -inf  ;;  %v2066_v14 = vmax.f32 %v2064_v34, %v2065_v36  ;;  %v2071_v16 = vmax.f32 %v2069_v63, %v2070_v62 }
 0x184   :  { %v1661_v20 = vsel %vm1536_vm1, %v863_v32, -inf  ;;  %v2078_v2 = vmax.f32 %v2076_v6, %v2077_v40  ;;  %v9631_v7 = vmax.f32 %v9553_v60, %v2058_v46  ;;  %v2085_v29 = vmax.f32 %v2083_v22, %v2084_v10 }
 0x185   :  { %v1662_v51 = vmax.f32 %v9609_v9, %v1661_v20  ;;  %v2091_v18 = vrot.slane %v2090_v3, 4  ;;  %v12889_v38 = vrot.slane %v9527_v4, 2  ;;  %v12890_v28 = vrot.slane %v9500_v43, 1 }
 0x186   :  { %v9623_v54 = vpop.f32.mrb[72].mxu0  ;;  %v12891_v32 = vrot.slane %v9519_v19, 1  ;;  %v2046_v9 = vrot.slane %v9590_v24, 1  ;;  %v2098_v60 = vrot.slane %v2097_v33, 4  ;;  %v12892_v36 = vrot.slane %v9569_v35, 1 }
 0x187   :  { %v8363_v42 = vpop.f32.mrb[73].mxu0  ;;  %v2024_v15 = vmax.f32 %v9527_v4, %v12889_v38  ;;  %v2005_v55 = vmax.f32 %v9500_v43, %v12890_v28  ;;  %v9649_v4 = vrot.slane %v9463_v13, %v9110_v0  ;;  %v2104_v43 = vsel %vm1536_vm1, %v1656_v31, -inf }
 0x188   :  { %v2012_v34 = vmax.f32 %v9519_v19, %v12891_v32  ;;  %v9654_v62 = vmax.f32 %v9569_v35, %v12892_v36  ;;  %v2067_v6 = vrot.slane %v2066_v14, 1  ;;  %v2072_v19 = vrot.slane %v2071_v16, 2 }
 0x189   :  { %v2079_v22 = vrot.slane %v2078_v2, 2  ;;  %v2111_v40 = vsel %vm1536_vm1, %v1659_v1, -inf  ;;  %v2060_v10 = vrot.slane %v9631_v7, 1  ;;  %v2086_v52 = vrot.slane %v2085_v29, 2 }
 0x18a   :  { %v9636_v23 = vpop.f32.mrb[74].mxu0  ;;  %v2092_v42 = vmax.f32 %v2090_v3, %v2091_v18  ;;  %v2025_v20 = vrot.slane %v2024_v15, 1  ;;  %v9660_v38 = vmax.f32 %v9590_v24, %v2046_v9  ;;  %v2099_v28 = vmax.f32 %v2097_v33, %v2098_v60 }
 0x18b   :  { %v8366_v63 = vpop.f32.mrb[75].mxu0  ;;  %v2105_v32 = vrot.slane %v2104_v43, 4  ;;  %v12893_v35 = vrot.slane %v9544_v11, 1  ;;  %v9669_v1 = vrot.slane %v9588_v41, %v9110_v0  ;;  %v2112_v36 = vrot.slane %v2111_v40, 4 }
 0x18c   :  { %v2639_v3 = vsel %vm2615_vm2, %v9492_v39, %v9449_v21  ;;  %v9674_v24 = vmax.f32 %v2066_v14, %v2067_v6  ;;  %v2073_v33 = vmax.f32 %v2071_v16, %v2072_v19  ;;  %v9676_v18 = vmax.f32 %v2078_v2, %v2079_v22 }
 0x18d   :  { %v2019_v63 = vmax.f32 %v9544_v11, %v12893_v35  ;;  %12894 = vst [vmem:[#allocation10_spill] sm:$0xff] %v9669_v1  ;;  %v9679_v9 = vsel %vm1536_vm1, %v1662_v51, -inf  ;;  %v9681_v11 = vmax.f32 %v2085_v29, %v2086_v52  ;;  %v2093_v60 = vrot.slane %v2092_v42, 2 }
 0x18e   :  { %v2026_v35 = vmax.f32 %v2024_v15, %v2025_v20  ;;  %v2640_v31 = vsel %vm2617_vm3, %v9541_v50, %v2639_v3  ;;  %v2100_v46 = vrot.slane %v2099_v28, 2  ;;  %v9685_v1 = vmax.f32 %v2104_v43, %v2105_v32  ;;  %v9700_v43 = vpop.f32.mrb[76].mxu0 }
 0x18f   :  { %v2641_v21 = vsel %vm2619_vm4, %v2005_v55, %v2640_v31  ;;  %v271_v39 = vadd.f32 %v9512_v30, %v9335_v56  ;;  %v9690_v14 = vmax.f32 %v2111_v40, %v2112_v36  ;;  %v2119_v16 = vrot.slane %v9679_v9, 4  ;;  %v8369_v22 = vpop.f32.mrb[77].mxu0 }
 0x190   :  { %v2642_v2 = vsel %vm2621_vm5, %v2012_v34, %v2641_v21  ;;  %v276_v51 = vadd.f32 %v9512_v30, %v9345_v47  ;;  %v2081_v29 = vrot.slane %v9676_v18, 1  ;;  %v281_v55 = vadd.f32 %v9512_v30, %v9356_v27 }
 0x191   :  { %v2643_v50 = vsel %vm2623_vm6, %v2019_v63, %v2642_v2  ;;  %v430_v15 = vmax.f32 %v271_v39, 0.0  ;;  %v9703_v6 = vmax.f32 %v2092_v42, %v2093_v60  ;;  %v2074_v60 = vrot.slane %v2073_v33, 1 }
 0x192   :  { %v2644_v19 = vsel %vm2625_vm7, %v2026_v35, %v2643_v50  ;;  %v431_v34 = vmax.f32 %v276_v51, 0.0  ;;  %v432_v20 = vmax.f32 %v281_v55, 0.0  ;;  %v9720_v35 = vmax.f32 %v2099_v28, %v2100_v46  ;;  %v9752_v32 = vpop.f32.mrb[78].mxu0 }
 0x193   :  { %v9707_v47 = vsel %vm2719_vm8, 0.0, %v2644_v19  ;;  %v864_v40 = vcombine.high %v430_v15, %v430_v15  ;;  %v871_v52 = vrot.slane %v430_v15, %v9066_v26  ;;  %v2061_v2 = vmax.f32 %v9631_v7, %v2060_v10 }
 0x194   :  { %12895 = vst [vmem:[#allocation11_spill] sm:$0xff] %v9707_v47  ;;  %2873 = vrot.lane.b32.xlu0 %v9707_v47, %s8702_s9  ;;  %2975 = vrot.lane.b32.xlu1 %v9707_v47, %s8701_s29  ;;  %v881_v27 = vcombine.high %v431_v34, %v431_v34  ;;  %v9716_v42 = vrot.slane %v431_v34, %v9066_v26  ;;  %v2808_v63 = vrot.slane %v9707_v47, 2  ;;  %v9723_v21 = vrot.slane %v9707_v47, 1 }
 0x195   :  { %v878_v31 = vrot.slane %v864_v40, %v9066_v26  ;;  %v879_v36 = vcombine.high %v871_v52, %v871_v52  ;;  %v898_v3 = vcombine.high %v432_v20, %v432_v20  ;;  %v1663_v50 = vsel %vm1536_vm1, %v871_v52, -inf }
 0x196   :  { %12896 = vst [vmem:[#allocation12_spill] sm:$0xff] %v9723_v21  ;;  %v9726_v39 = vrot.slane %v881_v27, %v9066_v26  ;;  %v1675_v15 = vsel %vm1536_vm1, %v9716_v42, -inf  ;;  %v9734_v55 = vsel %vm2799_vm9, %v2808_v63, %v8969_v59  ;;  %v905_v10 = vrot.slane %v432_v20, %v9066_v26 }
 0x197   :  { %v880_v51 = vcombine.high %v878_v31, %v878_v31  ;;  %12897 = vst [vmem:[#allocation13_spill] sm:$0xff] %v9734_v55  ;;  %v1669_v46 = vsel %vm1536_vm1, %v878_v31, -inf  ;;  %v912_v28 = vrot.slane %v898_v3, %v9066_v26  ;;  %v1666_v19 = vsel %vm1536_vm1, %v879_v36, -inf }
 0x198   :  { %2768 = vrot.lane.b32.xlu0 %v9723_v21, %s8703_s1  ;;  %3014 = vrot.lane.b32.xlu1 %v9723_v21, %s8702_s9  ;;  %v897_v7 = vcombine.high %v9726_v39, %v9726_v39  ;;  %v2075_v22 = vmax.f32 %v2073_v33, %v2074_v60  ;;  %v2646_v40 = vsel %vm2617_vm3, %v9660_v38, %v9565_v48  ;;  %v1667_v31 = vsel %vm1536_vm1, %v905_v10, -inf  ;;  %v8372_v33 = vpop.f32.mrb[79].mxu0 }
 0x199   :  { %v1672_v34 = vsel %vm1536_vm1, %v880_v51, -inf  ;;  %v913_v27 = vcombine.high %v905_v10, %v905_v10  ;;  %v914_v63 = vcombine.high %v912_v28, %v912_v28  ;;  %v1668_v56 = vmax.f32 %v1666_v19, %v1667_v31 }
 0x19a   :  { %v1664_v52 = vsel %vm1536_vm1, %v897_v7, -inf  ;;  %v1673_v3 = vsel %vm1536_vm1, %v912_v28, -inf  ;;  %v2647_v36 = vsel %vm2619_vm4, %v9654_v62, %v2646_v40 }
 0x19b   :  { %v1665_v20 = vmax.f32 %v1663_v50, %v1664_v52  ;;  %v1670_v48 = vsel %vm1536_vm1, %v913_v27, -inf  ;;  %v1674_v38 = vmax.f32 %v1672_v34, %v1673_v3  ;;  %v1676_v60 = vsel %vm1536_vm1, %v914_v63, -inf }
 0x19c   :  { %2935 = vrot.lane.b32.xlu0 %v9734_v55, %s8703_s1  ;;  %v2648_v51 = vsel %vm2621_vm5, %v2061_v2, %v2647_v36  ;;  %v1671_v50 = vmax.f32 %v1669_v46, %v1670_v48  ;;  %v1677_v10 = vmax.f32 %v1675_v15, %v1676_v60  ;;  %v2132_v28 = vsel %vm1536_vm1, %v1668_v56, -inf }
 0x19d   :  { %v2125_v7 = vsel %vm1536_vm1, %v1665_v20, -inf  ;;  %v2133_v52 = vrot.slane %v2132_v28, 4  ;;  %v2146_v62 = vsel %vm1536_vm1, %v1674_v38, -inf  ;;  %v2649_v40 = vsel %vm2623_vm6, %v9674_v24, %v2648_v51 }
 0x19e   :  { %v2126_v19 = vrot.slane %v2125_v7, 4  ;;  %v9770_v34 = vmax.f32 %v9676_v18, %v2081_v29  ;;  %v2114_v2 = vrot.slane %v9690_v14, 2  ;;  %v9776_v15 = vmax.f32 %v9679_v9, %v2119_v16 }
 0x19f   :  { %v2650_v56 = vsel %vm2625_vm7, %v2075_v22, %v2649_v40  ;;  %v12898_v46 = vrot.slane %v9681_v11, 1  ;;  %v2095_v24 = vrot.slane %v9703_v6, 1  ;;  %v2139_v63 = vsel %vm1536_vm1, %v1671_v50, -inf  ;;  %v9794_v22 = vpop.f32.mrb[80].mxu0 }
 0x1a0   :  { %v2147_v18 = vrot.slane %v2146_v62, 4  ;;  %2834 = vrot.lane.b32.xlu0 %v9734_v55, %s8701_s29  ;;  %v2127_v29 = vmax.f32 %v2125_v7, %v2126_v19  ;;  %v2153_v31 = vsel %vm1536_vm1, %v1677_v10, -inf  ;;  %v9790_v9 = vsel %vm2719_vm8, 0.0, %v2650_v56  ;;  %v8375_v48 = vpop.f32.mrb[81].mxu0 }
 0x1a1   :  { %v9782_v27 = vmax.f32 %v9681_v11, %v12898_v46  ;;  %12899 = vst [vmem:[#allocation14_spill] sm:$0xff] %v9790_v9  ;;  %v286_v16 = vadd.f32 %v9512_v30, %v9372_v45  ;;  %v2102_v11 = vrot.slane %v9720_v35, 1  ;;  %v12900_v20 = vrot.slane %v9685_v1, 2  ;;  %2977 = vrot.lane.b32.xlu1 %v9790_v9, %s8701_s29  ;;  %v9819_v40 = vpop.f32.mrb[82].mxu0 }
 0x1a2   :  { %v896_v36 = vcombine.high %v9716_v42, %v9716_v42  ;;  %v2134_v33 = vmax.f32 %v2132_v28, %v2133_v52  ;;  %v2140_v38 = vrot.slane %v2139_v63, 4  ;;  %v9805_v45 = vrot.slane %v9790_v9, 1 }
 0x1a3   :  { %v2108_v3 = vmax.f32 %v9685_v1, %v12900_v20  ;;  %v433_v60 = vmax.f32 %v286_v16, 0.0  ;;  %v291_v51 = vadd.f32 %v9512_v30, %v9390_v5  ;;  %v9810_v7 = vmax.f32 %v9703_v6, %v2095_v24 }
 0x1a4   :  { %12901 = vst [vmem:[#allocation15_spill] sm:$0xff] %v9805_v45  ;;  %v9813_v1 = vmax.f32 %v9690_v14, %v2114_v2  ;;  %v2154_v50 = vrot.slane %v2153_v31, 4  ;;  %v2128_v10 = vrot.slane %v2127_v29, 2  ;;  %v2148_v28 = vmax.f32 %v2146_v62, %v2147_v18  ;;  %2770 = vrot.lane.b32.xlu0 %v9805_v45, %s8703_s1  ;;  %v8378_v2 = vpop.f32.mrb[83].mxu0 }
 0x1a5   :  { %v915_v19 = vcombine.high %v433_v60, %v433_v60  ;;  %v922_v52 = vrot.slane %v433_v60, %v9066_v26  ;;  %v9822_v5 = vmax.f32 %v9720_v35, %v2102_v11  ;;  %v2109_v6 = vrot.slane %v2108_v3, 1  ;;  %2875 = vrot.lane.b32.xlu1 %v9790_v9, %s8702_s9  ;;  %v9899_v41 = vpop.f32.mrb[84].mxu0 }
 0x1a6   :  { %v2135_v56 = vrot.slane %v2134_v33, 2  ;;  %v434_v14 = vmax.f32 %v291_v51, 0.0  ;;  %v2141_v46 = vmax.f32 %v2139_v63, %v2140_v38  ;;  %v1678_v24 = vsel %vm1536_vm1, %v896_v36, -inf }
 0x1a7   :  { %v930_v62 = vcombine.high %v922_v52, %v922_v52  ;;  %v1679_v18 = vsel %vm1536_vm1, %v922_v52, -inf  ;;  %v9831_v20 = vsel %vm1536_vm1, %v9726_v39, -inf  ;;  %v9833_v35 = vmax.f32 %v2153_v31, %v2154_v50 }
 0x1a8   :  { %v1680_v11 = vmax.f32 %v1678_v24, %v1679_v18  ;;  %v9835_v48 = vmax.f32 %v2127_v29, %v2128_v10  ;;  %v2149_v60 = vrot.slane %v2148_v28, 2  ;;  %v929_v51 = vrot.slane %v915_v19, %v9066_v26 }
 0x1a9   :  { %v9839_v63 = vsel %vm1536_vm1, %v930_v62, -inf  ;;  %v9841_v36 = vmax.f32 %v2134_v33, %v2135_v56  ;;  %v932_v39 = vcombine.high %v434_v14, %v434_v14  ;;  %3016 = vrot.lane.b32.xlu1 %v9805_v45, %s8702_s9  ;;  %v2142_v31 = vrot.slane %v2141_v46, 2 }
 0x1aa   :  { %v2160_v52 = vsel %vm1536_vm1, %v1680_v11, -inf  ;;  %v939_v29 = vrot.slane %v434_v14, %v9066_v26  ;;  %v2810_v50 = vrot.slane %v9790_v9, 2  ;;  %v296_v10 = vadd.f32 %v9512_v30, %v9414_v25 }
 0x1ab   :  { %v9852_v19 = vmax.f32 %v2108_v3, %v2109_v6  ;;  %v946_v56 = vrot.slane %v932_v39, %v9066_v26  ;;  %v301_v2 = vadd.f32 %v9512_v30, %v9438_v17  ;;  %v9861_v62 = vrot.slane %v9734_v55, %v9110_v0 }
 0x1ac   :  { %v2156_v14 = vrot.slane %v9833_v35, 2  ;;  %v931_v24 = vcombine.high %v929_v51, %v929_v51  ;;  %v2161_v18 = vrot.slane %v2160_v52, 4  ;;  %v9864_v11 = vmax.f32 %v2148_v28, %v2149_v60 }
 0x1ad   :  { %12902 = vst [vmem:[#allocation16_spill] sm:$0xff] %v9861_v62  ;;  %v947_v25 = vcombine.high %v939_v29, %v939_v29  ;;  %v9868_v3 = vsel %vm2799_vm9, %v2810_v50, %v8969_v59  ;;  %v435_v6 = vmax.f32 %v296_v10, 0.0  ;;  %v2130_v39 = vrot.slane %v9835_v48, 1 }
 0x1ae   :  { %12903 = vst [vmem:[#allocation17_spill] sm:$0xff] %v9868_v3  ;;  %v9872_v33 = vmax.f32 %v2141_v46, %v2142_v31  ;;  %v948_v16 = vcombine.high %v946_v56, %v946_v56  ;;  %2836 = vrot.lane.b32.xlu0 %v9868_v3, %s8701_s29  ;;  %2937 = vrot.lane.b32.xlu1 %v9868_v3, %s8703_s1  ;;  %v1684_v28 = vsel %vm1536_vm1, %v929_v51, -inf  ;;  %v436_v38 = vmax.f32 %v301_v2, 0.0 }
 0x1af   :  { %v949_v60 = vcombine.high %v435_v6, %v435_v6  ;;  %v956_v50 = vrot.slane %v435_v6, %v9066_v26  ;;  %v2162_v10 = vmax.f32 %v2160_v52, %v2161_v18  ;;  %v1690_v42 = vsel %vm1536_vm1, %v939_v29, -inf }
 0x1b0   :  { %v1696_v17 = vsel %vm1536_vm1, %v946_v56, -inf  ;;  %v1687_v46 = vsel %vm1536_vm1, %v931_v24, -inf  ;;  %v966_v9 = vcombine.high %v436_v38, %v436_v38  ;;  %v1693_v21 = vsel %vm1536_vm1, %v947_v25, -inf }
 0x1b1   :  { %v963_v31 = vrot.slane %v949_v60, %v9066_v26  ;;  %v964_v45 = vcombine.high %v956_v50, %v956_v50  ;;  %v973_v62 = vrot.slane %v436_v38, %v9066_v26  ;;  %v1699_v51 = vsel %vm1536_vm1, %v948_v16, -inf }
 0x1b2   :  { %v12904_v6 = vrot.slane %v9776_v15, 2  ;;  %v2651_v29 = vsel %vm2615_vm2, %v9782_v27, %v9770_v34  ;;  %v980_v18 = vrot.slane %v966_v9, %v9066_v26 }
 0x1b3   :  { %v965_v56 = vcombine.high %v963_v31, %v963_v31  ;;  %v1685_v2 = vsel %vm1536_vm1, %v964_v45, -inf  ;;  %v1688_v24 = vsel %vm1536_vm1, %v963_v31, -inf  ;;  %v981_v38 = vcombine.high %v973_v62, %v973_v62 }
 0x1b4   :  { %v2122_v52 = vmax.f32 %v9776_v15, %v12904_v6  ;;  %v1686_v25 = vmax.f32 %v1684_v28, %v1685_v2  ;;  %v1689_v60 = vmax.f32 %v1687_v46, %v1688_v24  ;;  %v1694_v16 = vsel %vm1536_vm1, %v973_v62, -inf  ;;  %v8381_v28 = vpop.f32.mrb[85].mxu0 }
 0x1b5   :  { %v1691_v47 = vsel %vm1536_vm1, %v965_v56, -inf  ;;  %v982_v55 = vcombine.high %v980_v18, %v980_v18  ;;  %v1695_v15 = vmax.f32 %v1693_v21, %v1694_v16  ;;  %v1700_v6 = vsel %vm1536_vm1, %v980_v18, -inf }
 0x1b6   :  { %v1692_v34 = vmax.f32 %v1690_v42, %v1691_v47  ;;  %v2174_v27 = vsel %vm1536_vm1, %v1686_v25, -inf  ;;  %v2181_v45 = vsel %vm1536_vm1, %v1689_v60, -inf  ;;  %v1697_v9 = vsel %vm1536_vm1, %v981_v38, -inf }
 0x1b7   :  { %v2175_v46 = vrot.slane %v2174_v27, 4  ;;  %v2182_v31 = vrot.slane %v2181_v45, 4  ;;  %v1698_v2 = vmax.f32 %v1696_v17, %v1697_v9  ;;  %v1701_v62 = vmax.f32 %v1699_v51, %v1700_v6 }
 0x1b8   :  { %v12905_v56 = vmax.f32 %v9831_v20, %v9839_v63  ;;  %v1702_v24 = vsel %vm1536_vm1, %v956_v50, -inf  ;;  %v2188_v47 = vsel %vm1536_vm1, %v1692_v34, -inf  ;;  %v1703_v42 = vsel %vm1536_vm1, %v982_v55, -inf  ;;  %v9919_v55 = vpop.f32.mrb[86].mxu0 }
 0x1b9   :  { %v2151_v18 = vrot.slane %v9864_v11, 1  ;;  %v2163_v25 = vrot.slane %v2162_v10, 2  ;;  %v1704_v60 = vmax.f32 %v1702_v24, %v1703_v42  ;;  %v2195_v38 = vsel %vm1536_vm1, %v1695_v15, -inf }
 0x1ba   :  { %v2167_v21 = vsel %vm1536_vm1, %v12905_v56, -inf  ;;  %v9914_v17 = vmax.f32 %v9833_v35, %v2156_v14  ;;  %v2176_v51 = vmax.f32 %v2174_v27, %v2175_v46  ;;  %v2123_v16 = vrot.slane %v2122_v52, 1  ;;  %v8384_v27 = vpop.f32.mrb[87].mxu0 }
 0x1bb   :  { %v2652_v20 = vsel %vm2617_vm3, %v9810_v7, %v2651_v29  ;;  %v2144_v63 = vrot.slane %v9872_v33, 1  ;;  %v2168_v50 = vrot.slane %v2167_v21, 4  ;;  %v2183_v6 = vmax.f32 %v2181_v45, %v2182_v31 }
 0x1bc   :  { %v2189_v34 = vrot.slane %v2188_v47, 4  ;;  %v9922_v9 = vmax.f32 %v9835_v48, %v2130_v39  ;;  %v2196_v28 = vrot.slane %v2195_v38, 4  ;;  %v12906_v15 = vrot.slane %v9813_v1, 1 }
 0x1bd   :  { %v2653_v14 = vsel %vm2619_vm4, %v9822_v5, %v2652_v20  ;;  %v12907_v7 = vrot.slane %v9841_v36, 1  ;;  %v9935_v45 = vmax.f32 %v9864_v11, %v2151_v18  ;;  %v2164_v46 = vmax.f32 %v2162_v10, %v2163_v25 }
 0x1be   :  { %v2117_v35 = vmax.f32 %v9813_v1, %v12906_v15  ;;  %v2202_v48 = vsel %vm1536_vm1, %v1698_v2, -inf  ;;  %v2177_v39 = vrot.slane %v2176_v51, 2  ;;  %v2209_v31 = vsel %vm1536_vm1, %v1701_v62, -inf }
 0x1bf   :  { %v9932_v29 = vmax.f32 %v9841_v36, %v12907_v7  ;;  %v2124_v56 = vmax.f32 %v2122_v52, %v2123_v16  ;;  %v2654_v1 = vsel %vm2621_vm5, %v9852_v19, %v2653_v14  ;;  %v9942_v5 = vmax.f32 %v9872_v33, %v2144_v63 }
 0x1c0   :  { %v9944_v24 = vmax.f32 %v2167_v21, %v2168_v50  ;;  %v2184_v36 = vrot.slane %v2183_v6, 2  ;;  %v9946_v42 = vmax.f32 %v2188_v47, %v2189_v34  ;;  %v9948_v11 = vmax.f32 %v2195_v38, %v2196_v28 }
 0x1c1   :  { %v2203_v10 = vrot.slane %v2202_v48, 4  ;;  %v2655_v2 = vsel %vm2623_vm6, %v2117_v35, %v2654_v1  ;;  %v306_v62 = vadd.f32 %v9512_v30, %v9466_v58  ;;  %v2165_v52 = vrot.slane %v2164_v46, 1 }
 0x1c2   :  { %v9957_v33 = vrot.slane %v9868_v3, %v9110_v0  ;;  %v2210_v21 = vrot.slane %v2209_v31, 4  ;;  %v9959_v18 = vmax.f32 %v2176_v51, %v2177_v39  ;;  %v9962_v47 = vsel %vm1536_vm1, %v1704_v60, -inf }
 0x1c3   :  { %v2656_v25 = vsel %vm2625_vm7, %v2124_v56, %v2655_v2  ;;  %v437_v38 = vmax.f32 %v306_v62, 0.0  ;;  %v9965_v16 = vmax.f32 %v2183_v6, %v2184_v36  ;;  %v2191_v58 = vrot.slane %v9946_v42, 2 }
 0x1c4   :  { %12908 = vst [vmem:[#allocation18_spill] sm:$0xff] %v9957_v33  ;;  %v9969_v20 = vsel %vm2719_vm8, 0.0, %v2656_v25  ;;  %v311_v63 = vadd.f32 %v9512_v30, %v9482_v53  ;;  %v9974_v51 = vmax.f32 %v2202_v48, %v2203_v10  ;;  %v9981_v34 = vmax.f32 %v2209_v31, %v2210_v21 }
 0x1c5   :  { %12909 = vst [vmem:[#allocation19_spill] sm:$0xff] %v9969_v20  ;;  %2877 = vrot.lane.b32.xlu0 %v9969_v20, %s8702_s9  ;;  %2979 = vrot.lane.b32.xlu1 %v9969_v20, %s8701_s29  ;;  %v983_v60 = vcombine.high %v437_v38, %v437_v38  ;;  %v990_v6 = vrot.slane %v437_v38, %v9066_v26  ;;  %v2812_v15 = vrot.slane %v9969_v20, 2  ;;  %v9989_v7 = vrot.slane %v9969_v20, 1 }
 0x1c6   :  { %v438_v28 = vmax.f32 %v311_v63, 0.0  ;;  %v316_v53 = vadd.f32 %v9512_v30, %v9506_v12  ;;  %v2158_v56 = vrot.slane %v9914_v17, 1  ;;  %v2166_v10 = vmax.f32 %v2164_v46, %v2165_v52 }
 0x1c7   :  { %v997_v14 = vrot.slane %v983_v60, %v9066_v26  ;;  %v998_v27 = vcombine.high %v990_v6, %v990_v6  ;;  %12910 = vst [vmem:[#allocation20_spill] sm:$0xff] %v9989_v7  ;;  %v1705_v12 = vsel %vm1536_vm1, %v990_v6, -inf  ;;  %v10007_v21 = vsel %vm2799_vm9, %v2812_v15, %v8969_v59 }
 0x1c8   :  { %v1000_v48 = vcombine.high %v438_v28, %v438_v28  ;;  %v9992_v39 = vrot.slane %v438_v28, %v9066_v26  ;;  %v439_v31 = vmax.f32 %v316_v53, 0.0  ;;  %12911 = vst [vmem:[#allocation21_spill] sm:$0xff] %v10007_v21  ;;  %v2159_v28 = vmax.f32 %v9914_v17, %v2158_v56 }
 0x1c9   :  { %v999_v36 = vcombine.high %v997_v14, %v997_v14  ;;  %2772 = vrot.lane.b32.xlu0 %v9989_v7, %s8703_s1  ;;  %3018 = vrot.lane.b32.xlu1 %v9989_v7, %s8702_s9  ;;  %v1711_v2 = vsel %vm1536_vm1, %v997_v14, -inf  ;;  %v1708_v60 = vsel %vm1536_vm1, %v998_v27, -inf  ;;  %v2170_v15 = vrot.slane %v9944_v24, 2 }
 0x1ca   :  { %v10003_v62 = vrot.slane %v1000_v48, %v9066_v26  ;;  %v1017_v25 = vcombine.high %v439_v31, %v439_v31  ;;  %v1717_v38 = vsel %vm1536_vm1, %v9992_v39, -inf  ;;  %v1024_v63 = vrot.slane %v439_v31, %v9066_v26 }
 0x1cb   :  { %v1714_v6 = vsel %vm1536_vm1, %v999_v36, -inf  ;;  %v2657_v27 = vsel %vm2615_vm2, %v9932_v29, %v9922_v9  ;;  %v321_v48 = vadd.f32 %v9512_v30, %v9535_v44  ;;  %v2171_v1 = vmax.f32 %v9944_v24, %v2170_v15 }
 0x1cc   :  { %v1016_v46 = vcombine.high %v10003_v62, %v10003_v62  ;;  %v1031_v52 = vrot.slane %v1017_v25, %v9066_v26  ;;  %v1032_v53 = vcombine.high %v1024_v63, %v1024_v63  ;;  %v1709_v14 = vsel %vm1536_vm1, %v1024_v63, -inf  ;;  %v10031_v63 = vpop.f32.mrb[88].mxu0 }
 0x1cd   :  { %2939 = vrot.lane.b32.xlu0 %v10007_v21, %s8703_s1  ;;  %v1710_v25 = vmax.f32 %v1708_v60, %v1709_v14  ;;  %v2658_v30 = vsel %vm2617_vm3, %v9942_v5, %v2657_v27  ;;  %v8387_v24 = vpop.f32.mrb[89].mxu0  ;;  %v2186_v15 = vrot.slane %v9965_v16, 1  ;;  %v2192_v5 = vmax.f32 %v9946_v42, %v2191_v58 }
 0x1ce   :  { %v1706_v31 = vsel %vm1536_vm1, %v1016_v46, -inf  ;;  %v1033_v36 = vcombine.high %v1031_v52, %v1031_v52  ;;  %v1715_v17 = vsel %vm1536_vm1, %v1031_v52, -inf  ;;  %v1712_v19 = vsel %vm1536_vm1, %v1032_v53, -inf }
 0x1cf   :  { %v1707_v56 = vmax.f32 %v1705_v12, %v1706_v31  ;;  %v1716_v35 = vmax.f32 %v1714_v6, %v1715_v17  ;;  %v1713_v50 = vmax.f32 %v1711_v2, %v1712_v19  ;;  %v2230_v29 = vsel %vm1536_vm1, %v1710_v25, -inf }
 0x1d0   :  { %v1718_v9 = vsel %vm1536_vm1, %v1033_v36, -inf  ;;  %v2231_v46 = vrot.slane %v2230_v29, 4  ;;  %v2172_v52 = vrot.slane %v2171_v1, 1  ;;  %v2205_v14 = vrot.slane %v9974_v51, 2 }
 0x1d1   :  { %v2223_v44 = vsel %vm1536_vm1, %v1707_v56, -inf  ;;  %v1719_v60 = vmax.f32 %v1717_v38, %v1718_v9  ;;  %v2244_v12 = vsel %vm1536_vm1, %v1716_v35, -inf  ;;  %2838 = vrot.lane.b32.xlu0 %v10007_v21, %s8701_s29  ;;  %v2237_v19 = vsel %vm1536_vm1, %v1713_v50, -inf  ;;  %v10048_v35 = vpop.f32.mrb[90].mxu0 }
 0x1d2   :  { %v2224_v6 = vrot.slane %v2223_v44, 4  ;;  %v2245_v2 = vrot.slane %v2244_v12, 4  ;;  %v2232_v53 = vmax.f32 %v2230_v29, %v2231_v46  ;;  %v2659_v38 = vsel %vm2619_vm4, %v9935_v45, %v2658_v30  ;;  %v8390_v9 = vpop.f32.mrb[91].mxu0 }
 0x1d3   :  { %v2238_v31 = vrot.slane %v2237_v19, 4  ;;  %v2173_v36 = vmax.f32 %v2171_v1, %v2172_v52  ;;  %v2251_v25 = vsel %vm1536_vm1, %v1719_v60, -inf  ;;  %v2660_v17 = vsel %vm2621_vm5, %v2159_v28, %v2659_v38 }
 0x1d4   :  { %v2225_v27 = vmax.f32 %v2223_v44, %v2224_v6  ;;  %v2233_v50 = vrot.slane %v2232_v53, 2  ;;  %v440_v56 = vmax.f32 %v321_v48, 0.0  ;;  %v12912_v42 = vrot.slane %v9948_v11, 2 }
 0x1d5   :  { %v2246_v45 = vmax.f32 %v2244_v12, %v2245_v2  ;;  %v2661_v30 = vsel %vm2623_vm6, %v2166_v10, %v2660_v17  ;;  %v12913_v46 = vrot.slane %v9959_v18, 1  ;;  %v2212_v1 = vrot.slane %v9981_v34, 2 }
 0x1d6   :  { %v2199_v58 = vmax.f32 %v9948_v11, %v12912_v42  ;;  %v2226_v29 = vrot.slane %v2225_v27, 2  ;;  %v2234_v60 = vmax.f32 %v2232_v53, %v2233_v50  ;;  %v2662_v28 = vsel %vm2625_vm7, %v2173_v36, %v2661_v30 }
 0x1d7   :  { %v10060_v44 = vmax.f32 %v9959_v18, %v12913_v46  ;;  %v1015_v48 = vcombine.high %v9992_v39, %v9992_v39  ;;  %v2252_v6 = vrot.slane %v2251_v25, 4  ;;  %v10067_v11 = vsel %vm2719_vm8, 0.0, %v2662_v28  ;;  %v10093_v46 = vld [vmem:[%s12823_s2] ss:$0 sm:$0xff] }
 0x1d8   :  { %v2227_v24 = vmax.f32 %v2225_v27, %v2226_v29  ;;  %12914 = vst [vmem:[#allocation22_spill] sm:$0xff] %v10067_v11  ;;  %v10070_v10 = vmax.f32 %v9965_v16, %v2186_v15  ;;  %v2235_v12 = vrot.slane %v2234_v60, 1  ;;  %v2239_v2 = vmax.f32 %v2237_v19, %v2238_v31  ;;  %2981 = vrot.lane.b32.xlu1 %v10067_v11, %s8701_s29 }
 0x1d9   :  { %v1041_v18 = vrot.slane %v440_v56, %v9066_v26  ;;  %v2193_v52 = vrot.slane %v2192_v5, 1  ;;  %v10076_v53 = vmax.f32 %v9974_v51, %v2205_v14  ;;  %v2247_v38 = vrot.slane %v2246_v45, 2  ;;  %v10085_v14 = vpop.f32.mrb[92].mxu0 }
 0x1da   :  { %v2228_v39 = vrot.slane %v2227_v24, 1  ;;  %v2200_v27 = vrot.slane %v2199_v58, 1  ;;  %v2236_v36 = vmax.f32 %v2234_v60, %v2235_v12  ;;  %v1034_v50 = vcombine.high %v440_v56, %v440_v56  ;;  %v8393_v60 = vpop.f32.mrb[93].mxu0 }
 0x1db   :  { %v1049_v17 = vcombine.high %v1041_v18, %v1041_v18  ;;  %v2253_v16 = vmax.f32 %v2251_v25, %v2252_v6  ;;  %v1720_v15 = vsel %vm1536_vm1, %v1015_v48, -inf  ;;  %v1721_v19 = vsel %vm1536_vm1, %v1041_v18, -inf  ;;  %v10104_v6 = vpop.f32.mrb[94].mxu0 }
 0x1dc   :  { %v2229_v9 = vmax.f32 %v2227_v24, %v2228_v39  ;;  %v1723_v31 = vsel %vm1536_vm1, %v10003_v62, -inf  ;;  %v2240_v42 = vrot.slane %v2239_v2, 2  ;;  %v1722_v29 = vmax.f32 %v1720_v15, %v1721_v19  ;;  %2879 = vrot.lane.b32.xlu1 %v10067_v11, %s8702_s9  ;;  %12915 = vst [vmem:[#allocation23_spill] sm:$0xff] %v10104_v6 }
 0x1dd   :  { %v1724_v51 = vsel %vm1536_vm1, %v1049_v17, -inf  ;;  %v2248_v56 = vmax.f32 %v2246_v45, %v2247_v38  ;;  %v326_v62 = vadd.f32 %v10093_v46, %v9551_v57  ;;  %v10098_v28 = vmax.f32 %v9981_v34, %v2212_v1  ;;  %v8396_v57 = vpop.f32.mrb[95].mxu0 }
 0x1de   :  { %v10088_v30 = vsel %vm2615_vm2, %v2236_v36, %v2229_v9  ;;  %v1725_v25 = vmax.f32 %v1723_v31, %v1724_v51  ;;  %v1048_v48 = vrot.slane %v1034_v50, %v9066_v26  ;;  %v12848_v45 = vrot.slane %v10067_v11, 1 }
 0x1df   :  { %v331_v24 = vadd.f32 %v10093_v46, %v9575_v61  ;;  %v10106_v12 = vmax.f32 %v2192_v5, %v2193_v52  ;;  %v2254_v18 = vrot.slane %v2253_v16, 2  ;;  %v441_v39 = vmax.f32 %v326_v62, 0.0 }
 0x1e0   :  { %v2925_v38 = vrot.slane %v10067_v11, 2  ;;  %v10109_v36 = vmax.f32 %v2199_v58, %v2200_v27  ;;  %v2258_v1 = vsel %vm1536_vm1, %v1722_v29, -inf  ;;  %3020 = vrot.lane.b32.xlu1 %v12848_v45, %s8702_s9  ;;  %v10118_v52 = vmax.f32 %v2239_v2, %v2240_v42 }
 0x1e1   :  { %v442_v61 = vmax.f32 %v331_v24, 0.0  ;;  %v2249_v50 = vrot.slane %v2248_v56, 1  ;;  %v1051_v17 = vcombine.high %v441_v39, %v441_v39  ;;  %v10122_v58 = vrot.slane %v10007_v21, %v9110_v0 }
 0x1e2   :  { %v1050_v27 = vcombine.high %v1048_v48, %v1048_v48  ;;  %v10125_v19 = vmax.f32 %v2253_v16, %v2254_v18  ;;  %v2259_v31 = vrot.slane %v2258_v1, 4  ;;  %v10129_v29 = vsel %vm2799_vm9, %v2925_v38, %v8969_v59 }
 0x1e3   :  { %12916 = vst [vmem:[#allocation24_spill] sm:$0xff] %v10122_v58  ;;  %v1068_v9 = vcombine.high %v442_v61, %v442_v61  ;;  %v1075_v15 = vrot.slane %v442_v61, %v9066_v26  ;;  %v336_v2 = vadd.f32 %v10093_v46, %v9597_v8  ;;  %v10134_v42 = vsel %vm1536_vm1, %v1725_v25, -inf }
 0x1e4   :  { %v1058_v51 = vrot.slane %v441_v39, %v9066_v26  ;;  %2941 = vrot.lane.b32.xlu1 %v10129_v29, %s8703_s1  ;;  %v2242_v16 = vrot.slane %v10118_v52, 1  ;;  %v10141_v24 = vmax.f32 %v2248_v56, %v2249_v50  ;;  %v1726_v18 = vsel %vm1536_vm1, %v1048_v48, -inf }
 0x1e5   :  { %v1082_v62 = vrot.slane %v1068_v9, %v9066_v26  ;;  %v1083_v60 = vcombine.high %v1075_v15, %v1075_v15  ;;  %v1065_v38 = vrot.slane %v1051_v17, %v9066_v26  ;;  %v1729_v57 = vsel %vm1536_vm1, %v1050_v27, -inf }
 0x1e6   :  { %v2266_v61 = vrot.slane %v10134_v42, 4  ;;  %v443_v5 = vmax.f32 %v336_v2, 0.0  ;;  %v2260_v34 = vmax.f32 %v2258_v1, %v2259_v31  ;;  %v1066_v11 = vcombine.high %v1058_v51, %v1058_v51 }
 0x1e7   :  { %v1084_v8 = vcombine.high %v1082_v62, %v1082_v62  ;;  %v1727_v25 = vsel %vm1536_vm1, %v1083_v60, -inf  ;;  %v1730_v39 = vsel %vm1536_vm1, %v1082_v62, -inf  ;;  %v1732_v56 = vsel %vm1536_vm1, %v1058_v51, -inf }
 0x1e8   :  { %v1728_v9 = vmax.f32 %v1726_v18, %v1727_v25  ;;  %v1731_v45 = vmax.f32 %v1729_v57, %v1730_v39  ;;  %v1067_v50 = vcombine.high %v1065_v38, %v1065_v38  ;;  %v1085_v62 = vcombine.high %v443_v5, %v443_v5 }
 0x1e9   :  { %v1733_v48 = vsel %vm1536_vm1, %v1084_v8, -inf  ;;  %v1092_v58 = vrot.slane %v443_v5, %v9066_v26  ;;  %v1738_v18 = vsel %vm1536_vm1, %v1065_v38, -inf  ;;  %v12917_v31 = vrot.slane %v9962_v47, 4 }
 0x1ea   :  { %v1734_v17 = vmax.f32 %v1732_v56, %v1733_v48  ;;  %v2272_v20 = vsel %vm1536_vm1, %v1728_v9, -inf  ;;  %v2279_v60 = vsel %vm1536_vm1, %v1731_v45, -inf  ;;  %v2663_v51 = vsel %vm2615_vm2, %v10070_v10, %v10060_v44 }
 0x1eb   :  { %v2273_v27 = vrot.slane %v2272_v20, 4  ;;  %v2280_v7 = vrot.slane %v2279_v60, 4  ;;  %v2218_v2 = vmax.f32 %v9962_v47, %v12917_v31  ;;  %v1099_v45 = vrot.slane %v1085_v62, %v9066_v26  ;;  %v10168_v31 = vpop.f32.mrb[96].mxu0 }
 0x1ec   :  { %v2286_v1 = vsel %vm1536_vm1, %v1734_v17, -inf  ;;  %v1735_v25 = vsel %vm1536_vm1, %v1066_v11, -inf  ;;  %v2214_v57 = vrot.slane %v10098_v28, 1  ;;  %v1100_v5 = vcombine.high %v1092_v58, %v1092_v58  ;;  %v8399_v21 = vpop.f32.mrb[97].mxu0 }
 0x1ed   :  { %v2287_v8 = vrot.slane %v2286_v1, 4  ;;  %v1736_v38 = vsel %vm1536_vm1, %v1092_v58, -inf  ;;  %v2219_v39 = vrot.slane %v2218_v2, 2  ;;  %v2664_v9 = vsel %vm2617_vm3, %v10106_v12, %v2663_v51 }
 0x1ee   :  { %v2274_v56 = vmax.f32 %v2272_v20, %v2273_v27  ;;  %v2281_v47 = vmax.f32 %v2279_v60, %v2280_v7  ;;  %v1101_v17 = vcombine.high %v1099_v45, %v1099_v45  ;;  %v1737_v44 = vmax.f32 %v1735_v25, %v1736_v38 }
 0x1ef   :  { %v2288_v48 = vmax.f32 %v2286_v1, %v2287_v8  ;;  %v1739_v10 = vsel %vm1536_vm1, %v1100_v5, -inf  ;;  %v1742_v11 = vsel %vm1536_vm1, %v1099_v45, -inf  ;;  %v2220_v62 = vmax.f32 %v2218_v2, %v2219_v39 }
 0x1f0   :  { %v2261_v33 = vrot.slane %v2260_v34, 2  ;;  %v1744_v58 = vsel %vm1536_vm1, %v1075_v15, -inf  ;;  %v1740_v3 = vmax.f32 %v1738_v18, %v1739_v10  ;;  %v1741_v6 = vsel %vm1536_vm1, %v1067_v50, -inf }
 0x1f1   :  { %v1743_v12 = vmax.f32 %v1741_v6, %v1742_v11  ;;  %v1745_v20 = vsel %vm1536_vm1, %v1101_v17, -inf  ;;  %v2293_v7 = vsel %vm1536_vm1, %v1737_v44, -inf  ;;  %v2221_v60 = vrot.slane %v2220_v62, 1 }
 0x1f2   :  { %v2275_v27 = vrot.slane %v2274_v56, 2  ;;  %v2282_v1 = vrot.slane %v2281_v47, 2  ;;  %v1746_v51 = vmax.f32 %v1744_v58, %v1745_v20  ;;  %v12918_v8 = vrot.slane %v10076_v53, 1 }
 0x1f3   :  { %v10180_v21 = vmax.f32 %v10118_v52, %v2242_v16  ;;  %v2256_v15 = vrot.slane %v10125_v19, 1  ;;  %v2289_v18 = vrot.slane %v2288_v48, 2  ;;  %v2215_v6 = vmax.f32 %v10098_v28, %v2214_v57 }
 0x1f4   :  { %v2208_v2 = vmax.f32 %v10076_v53, %v12918_v8  ;;  %v2267_v50 = vmax.f32 %v10134_v42, %v2266_v61  ;;  %v2294_v45 = vrot.slane %v2293_v7, 4  ;;  %v2300_v25 = vsel %vm1536_vm1, %v1740_v3, -inf }
 0x1f5   :  { %v2222_v5 = vmax.f32 %v2220_v62, %v2221_v60  ;;  %v2262_v38 = vmax.f32 %v2260_v34, %v2261_v33  ;;  %v3494_v39 = vcombine.high %v10129_v29, %v10129_v29  ;;  %v10190_v53 = vrot.slane %v10129_v29, %v9110_v0 }
 0x1f6   :  { %v2665_v52 = vsel %vm2619_vm4, %v10109_v36, %v2664_v9  ;;  %v2276_v16 = vmax.f32 %v2274_v56, %v2275_v27  ;;  %v2283_v17 = vmax.f32 %v2281_v47, %v2282_v1  ;;  %v2307_v28 = vsel %vm1536_vm1, %v1743_v12, -inf }
 0x1f7   :  { %12919 = vst [vmem:[#allocation25_spill] sm:$0xff] %v10190_v53  ;;  %v2666_v42 = vsel %vm2621_vm5, %v2208_v2, %v2665_v52  ;;  %v2290_v61 = vmax.f32 %v2288_v48, %v2289_v18  ;;  %v2301_v3 = vrot.slane %v2300_v25, 4  ;;  %v341_v34 = vadd.f32 %v10093_v46, %v9612_v49 }
 0x1f8   :  { %v2667_v33 = vsel %vm2623_vm6, %v2215_v6, %v2666_v42  ;;  %v2268_v57 = vrot.slane %v2267_v50, 2  ;;  %v2295_v44 = vmax.f32 %v2293_v7, %v2294_v45  ;;  %v346_v36 = vadd.f32 %v10093_v46, %v9623_v54 }
 0x1f9   :  { %v2668_v29 = vsel %vm2625_vm7, %v2222_v5, %v2667_v33  ;;  %v2308_v9 = vrot.slane %v2307_v28, 4  ;;  %v2314_v56 = vsel %vm1536_vm1, %v1746_v51, -inf  ;;  %v444_v48 = vmax.f32 %v341_v34, 0.0 }
 0x1fa   :  { %v10204_v47 = vsel %vm2719_vm8, 0.0, %v2668_v29  ;;  %v2263_v10 = vrot.slane %v2262_v38, 1  ;;  %v2277_v11 = vrot.slane %v2276_v16, 1  ;;  %v2284_v62 = vrot.slane %v2283_v17, 1 }
 0x1fb   :  { %12920 = vst [vmem:[#allocation26_spill] sm:$0xff] %v10204_v47  ;;  %2881 = vrot.lane.b32.xlu1 %v10204_v47, %s8702_s9  ;;  %v2814_v49 = vrot.slane %v10204_v47, 2  ;;  %v2291_v58 = vrot.slane %v2290_v61, 1  ;;  %v10209_v12 = vmax.f32 %v2300_v25, %v2301_v3  ;;  %v1102_v20 = vcombine.high %v444_v48, %v444_v48 }
 0x1fc   :  { %v1109_v54 = vrot.slane %v444_v48, %v9066_v26  ;;  %v2315_v7 = vrot.slane %v2314_v56, 4  ;;  %v12858_v27 = vrot.slane %v10204_v47, 1  ;;  %v445_v1 = vmax.f32 %v346_v36, 0.0 }
 0x1fd   :  { %v2815_v60 = vsel %vm2799_vm9, %v2814_v49, %v8969_v59  ;;  %v10216_v51 = vrot.slane %v3494_v39, %v9110_v0  ;;  %v2296_v8 = vrot.slane %v2295_v44, 2  ;;  %v10218_v2 = vmax.f32 %v2307_v28, %v2308_v9 }
 0x1fe   :  { %2943 = vrot.lane.b32.xlu0 %v2815_v60, %s8703_s1  ;;  %v1116_v18 = vrot.slane %v1102_v20, %v9066_v26  ;;  %v2264_v6 = vmax.f32 %v2262_v38, %v2263_v10  ;;  %v2269_v45 = vmax.f32 %v2267_v50, %v2268_v57  ;;  %v1117_v25 = vcombine.high %v1109_v54, %v1109_v54 }
 0x1ff   :  { %12921 = vst [vmem:[#allocation27_spill] sm:$0xff] %v10216_v51  ;;  %2774 = vrot.lane.b32.xlu1 %v12858_v27, %s8703_s1  ;;  %v1119_v5 = vcombine.high %v445_v1, %v445_v1  ;;  %v10225_v52 = vmax.f32 %v2276_v16, %v2277_v11  ;;  %v10227_v42 = vmax.f32 %v2283_v17, %v2284_v62  ;;  %v2303_v33 = vrot.slane %v10209_v12, 2 }
 0x200   :  { %v1118_v39 = vcombine.high %v1116_v18, %v1116_v18  ;;  %v351_v28 = vadd.f32 %v10093_v46, %v9636_v23  ;;  %v10231_v3 = vmax.f32 %v2290_v61, %v2291_v58  ;;  %v10234_v38 = vmax.f32 %v2314_v56, %v2315_v7 }
 0x201   :  { %v10237_v50 = vrot.slane %v1119_v5, %v9066_v26  ;;  %v10239_v34 = vmax.f32 %v2295_v44, %v2296_v8  ;;  %v2310_v16 = vrot.slane %v10218_v2, 2  ;;  %v1747_v17 = vsel %vm1536_vm1, %v1109_v54, -inf }
 0x202   :  { %v446_v57 = vmax.f32 %v351_v28, 0.0  ;;  %v1753_v29 = vsel %vm1536_vm1, %v1116_v18, -inf  ;;  %v10245_v23 = vrot.slane %v445_v1, %v9066_v26  ;;  %v1750_v36 = vsel %vm1536_vm1, %v1117_v25, -inf }
 0x203   :  { %v1135_v61 = vcombine.high %v10237_v50, %v10237_v50  ;;  %2840 = vrot.lane.b32.xlu1 %v2815_v60, %s8701_s29  ;;  %v1756_v56 = vsel %vm1536_vm1, %v1118_v39, -inf  ;;  %v2270_v48 = vrot.slane %v2269_v45, 1  ;;  %v2257_v11 = vmax.f32 %v10125_v19, %v2256_v15 }
 0x204   :  { %v1136_v9 = vcombine.high %v446_v57, %v446_v57  ;;  %v1143_v44 = vrot.slane %v446_v57, %v9066_v26  ;;  %v2670_v62 = vsel %vm2617_vm3, %v10180_v21, %v10088_v30  ;;  %v356_v49 = vadd.f32 %v10093_v46, %v9700_v43 }
 0x205   :  { %v1748_v10 = vsel %vm1536_vm1, %v1135_v61, -inf  ;;  %v2271_v1 = vmax.f32 %v2269_v45, %v2270_v48  ;;  %v2671_v8 = vsel %vm2619_vm4, %v10141_v24, %v2670_v62  ;;  %v1759_v28 = vsel %vm1536_vm1, %v10245_v23, -inf }
 0x206   :  { %v1749_v58 = vmax.f32 %v1747_v17, %v1748_v10  ;;  %v1150_v20 = vrot.slane %v1136_v9, %v9066_v26  ;;  %v1151_v54 = vcombine.high %v1143_v44, %v1143_v44  ;;  %v1751_v7 = vsel %vm1536_vm1, %v1143_v44, -inf }
 0x207   :  { %v1752_v60 = vmax.f32 %v1750_v36, %v1751_v7  ;;  %v447_v18 = vmax.f32 %v356_v49, 0.0  ;;  %v2672_v24 = vsel %vm2621_vm5, %v2257_v11, %v2671_v8  ;;  %v2304_v44 = vmax.f32 %v10209_v12, %v2303_v33 }
 0x208   :  { %v2321_v19 = vsel %vm1536_vm1, %v1749_v58, -inf  ;;  %v1152_v15 = vcombine.high %v1150_v20, %v1150_v20  ;;  %v1754_v30 = vsel %vm1536_vm1, %v1151_v54, -inf  ;;  %v1757_v21 = vsel %vm1536_vm1, %v1150_v20, -inf }
 0x209   :  { %v2322_v43 = vrot.slane %v2321_v19, 4  ;;  %v1755_v25 = vmax.f32 %v1753_v29, %v1754_v30  ;;  %v1758_v5 = vmax.f32 %v1756_v56, %v1757_v21  ;;  %v2328_v39 = vsel %vm1536_vm1, %v1752_v60, -inf }
 0x20a   :  { %v1760_v45 = vsel %vm1536_vm1, %v1152_v15, -inf  ;;  %v2329_v17 = vrot.slane %v2328_v39, 4  ;;  %v2673_v48 = vsel %vm2623_vm6, %v2264_v6, %v2672_v24  ;;  %v1160_v58 = vrot.slane %v447_v18, %v9066_v26 }
 0x20b   :  { %v2323_v57 = vmax.f32 %v2321_v19, %v2322_v43  ;;  %v1761_v61 = vmax.f32 %v1759_v28, %v1760_v45  ;;  %v2335_v36 = vsel %vm1536_vm1, %v1755_v25, -inf  ;;  %v2342_v9 = vsel %vm1536_vm1, %v1758_v5, -inf }
 0x20c   :  { %v2330_v29 = vmax.f32 %v2328_v39, %v2329_v17  ;;  %v2336_v56 = vrot.slane %v2335_v36, 4  ;;  %v2343_v62 = vrot.slane %v2342_v9, 4  ;;  %v2674_v49 = vsel %vm2625_vm7, %v2271_v1, %v2673_v48  ;;  %v10311_v48 = vpop.permute.xlu1 %8647 }
 0x20d   :  { %v2324_v10 = vrot.slane %v2323_v57, 2  ;;  %v2298_v11 = vrot.slane %v10239_v34, 1  ;;  %v1134_v54 = vcombine.high %v10245_v23, %v10245_v23  ;;  %v10285_v12 = vmax.f32 %v10218_v2, %v2310_v16  ;;  %12924 = vst [vmem:[#allocation30_spill] sm:$0xff] %v10311_v48 }
 0x20e   :  { %v2331_v7 = vrot.slane %v2330_v29, 2  ;;  %v10288_v6 = vsel %vm2719_vm8, 0.0, %v2674_v49  ;;  %v1168_v60 = vcombine.high %v1160_v58, %v1160_v58  ;;  %v2337_v1 = vmax.f32 %v2335_v36, %v2336_v56 }
 0x20f   :  { %v2325_v33 = vmax.f32 %v2323_v57, %v2324_v10  ;;  %12922 = vst [vmem:[#allocation28_spill] sm:$0xff] %v10288_v6  ;;  %v2349_v19 = vsel %vm1536_vm1, %v1761_v61, -inf  ;;  %2985 = vrot.lane.b32.xlu0 %v10288_v6, %s8701_s29  ;;  %v1153_v15 = vcombine.high %v447_v18, %v447_v18  ;;  %v2344_v21 = vmax.f32 %v2342_v9, %v2343_v62 }
 0x210   :  { %v2332_v8 = vmax.f32 %v2330_v29, %v2331_v7  ;;  %v1763_v23 = vsel %vm1536_vm1, %v1160_v58, -inf  ;;  %v1766_v2 = vsel %vm1536_vm1, %v1168_v60, -inf  ;;  %v2305_v16 = vrot.slane %v2304_v44, 1  ;;  %v10370_v27 = vpop.permute.xlu1 %3022 }
 0x211   :  { %v2326_v30 = vrot.slane %v2325_v33, 1  ;;  %v1765_v43 = vsel %vm1536_vm1, %v10237_v50, -inf  ;;  %v1762_v5 = vsel %vm1536_vm1, %v1134_v54, -inf  ;;  %v2350_v28 = vrot.slane %v2349_v19, 4  ;;  %v2761_v50 = vpop.permute.xlu0 %2760  ;;  %12927 = vst [vmem:[#allocation33_spill] sm:$0xff] %v10370_v27 }
 0x212   :  { %v2333_v25 = vrot.slane %v2332_v8, 1  ;;  %v1764_v45 = vmax.f32 %v1762_v5, %v1763_v23  ;;  %v1767_v17 = vmax.f32 %v1765_v43, %v1766_v2  ;;  %v10299_v24 = vmax.f32 %v10239_v34, %v2298_v11 }
 0x213   :  { %v2327_v39 = vmax.f32 %v2325_v33, %v2326_v30  ;;  %v1167_v57 = vrot.slane %v1153_v15, %v9066_v26  ;;  %2883 = vrot.lane.b32.xlu0 %v10288_v6, %s8702_s9  ;;  %v2338_v61 = vrot.slane %v2337_v1, 2  ;;  %v2345_v36 = vrot.slane %v2344_v21, 2 }
 0x214   :  { %v2334_v18 = vmax.f32 %v2332_v8, %v2333_v25  ;;  %v2356_v9 = vsel %vm1536_vm1, %v1764_v45, -inf  ;;  %v10306_v29 = vrot.slane %v10288_v6, 1  ;;  %v10308_v56 = vmax.f32 %v2304_v44, %v2305_v16 }
 0x215   :  { %v2363_v62 = vsel %vm1536_vm1, %v1767_v17, -inf  ;;  %v8649_v49 = vunpack.i.l.bf16 %v10311_v48  ;;  %v10318_v58 = vmax.f32 %v2349_v19, %v2350_v28  ;;  %v2357_v11 = vrot.slane %v2356_v9, 4 }
 0x216   :  { %12923 = vst [vmem:[#allocation29_spill] sm:$0xff] %v10306_v29  ;;  %v10314_v10 = vsel %vm2615_vm2, %v2334_v18, %v2327_v39  ;;  %2776 = vrot.lane.b32.xlu1 %v10306_v29, %s8703_s1  ;;  %v3050_v44 = vsel %vm3049_vm10, 0.0, %v2761_v50  ;;  %v361_v54 = vadd.f32 %v10093_v46, %v9752_v32  ;;  %v2816_v7 = vrot.slane %v10288_v6, 2 }
 0x217   :  { %3024 = vrot.lane.b32.xlu0 %v10306_v29, %s8702_s9  ;;  %v366_v33 = vadd.f32 %v10093_v46, %v9794_v22  ;;  %v10330_v60 = vmax.f32 %v2337_v1, %v2338_v61  ;;  %v10332_v8 = vmax.f32 %v2344_v21, %v2345_v36  ;;  %v1169_v19 = vcombine.high %v1167_v57, %v1167_v57  ;;  %v2868_v29 = vpop.permute.xlu1 %2867 }
 0x218   :  { %v2364_v15 = vrot.slane %v2363_v62, 4  ;;  %v448_v30 = vmax.f32 %v361_v54, 0.0  ;;  %v10336_v23 = vsel %vm2799_vm9, %v2816_v7, %v8969_v59  ;;  %v371_v2 = vadd.f32 %v10093_v46, %v9819_v40 }
 0x219   :  { %12925 = vst [vmem:[#allocation31_spill] sm:$0xff] %v10336_v23  ;;  %v449_v32 = vmax.f32 %v366_v33, 0.0  ;;  %v10342_v43 = vsel %vm3063_vm11, %v3050_v44, %v8649_v49  ;;  %v1768_v22 = vsel %vm1536_vm1, %v1167_v57, -inf  ;;  %v10345_v1 = vmax.f32 %v2356_v9, %v2357_v11  ;;  %v2763_v44 = vpop.permute.xlu0 %2762 }
 0x21a   :  { %12926 = vst [vmem:[#allocation32_spill] sm:$0xff] %v10342_v43  ;;  %2842 = vrot.lane.b32.xlu1 %v10336_v23, %s8701_s29  ;;  %v1170_v21 = vcombine.high %v448_v30, %v448_v30  ;;  %v1177_v25 = vrot.slane %v448_v30, %v9066_v26  ;;  %v2340_v40 = vrot.slane %v10330_v60, 1  ;;  %v10355_v45 = vmax.f32 %v2363_v62, %v2364_v15 }
 0x21b   :  { %v1187_v5 = vcombine.high %v449_v32, %v449_v32  ;;  %v1194_v39 = vrot.slane %v449_v32, %v9066_v26  ;;  %2945 = vrot.lane.b32.xlu0 %v10336_v23, %s8703_s1  ;;  %v450_v17 = vmax.f32 %v371_v2, 0.0  ;;  %v1771_v36 = vsel %vm1536_vm1, %v1169_v19, -inf }
 0x21c   :  { %v1184_v18 = vrot.slane %v1170_v21, %v9066_v26  ;;  %v1185_v57 = vcombine.high %v1177_v25, %v1177_v25  ;;  %v2359_v50 = vrot.slane %v10345_v1, 2  ;;  %v1774_v9 = vsel %vm1536_vm1, %v1177_v25, -inf }
 0x21d   :  { %v1201_v61 = vrot.slane %v1187_v5, %v9066_v26  ;;  %v1202_v49 = vcombine.high %v1194_v39, %v1194_v39  ;;  %v1204_v11 = vcombine.high %v450_v17, %v450_v17  ;;  %v1786_v33 = vsel %vm1536_vm1, %v1194_v39, -inf }
 0x21e   :  { %v1186_v54 = vcombine.high %v1184_v18, %v1184_v18  ;;  %v1780_v15 = vsel %vm1536_vm1, %v1184_v18, -inf  ;;  %v1211_v19 = vrot.slane %v450_v17, %v9066_v26  ;;  %v1777_v5 = vsel %vm1536_vm1, %v1185_v57, -inf }
 0x21f   :  { %v1203_v7 = vcombine.high %v1201_v61, %v1201_v61  ;;  %v1772_v62 = vsel %vm1536_vm1, %v1201_v61, -inf  ;;  %v1769_v30 = vsel %vm1536_vm1, %v1202_v49, -inf  ;;  %v1218_v25 = vrot.slane %v1204_v11, %v9066_v26 }
 0x220   :  { %v1773_v32 = vmax.f32 %v1771_v36, %v1772_v62  ;;  %v1770_v2 = vmax.f32 %v1768_v22, %v1769_v30  ;;  %v1219_v39 = vcombine.high %v1211_v19, %v1211_v19  ;;  %v1778_v18 = vsel %vm1536_vm1, %v1211_v19, -inf  ;;  %v2930_v30 = vpop.permute.xlu0 %2929 }
 0x221   :  { %v1775_v21 = vsel %vm1536_vm1, %v1203_v7, -inf  ;;  %v1220_v62 = vcombine.high %v1218_v25, %v1218_v25  ;;  %v1779_v17 = vmax.f32 %v1777_v5, %v1778_v18  ;;  %v1783_v57 = vsel %vm1536_vm1, %v1186_v54, -inf }
 0x222   :  { %v1776_v34 = vmax.f32 %v1774_v9, %v1775_v21  ;;  %v2377_v61 = vsel %vm1536_vm1, %v1773_v32, -inf  ;;  %v2370_v49 = vsel %vm1536_vm1, %v1770_v2, -inf  ;;  %v1781_v11 = vsel %vm1536_vm1, %v1219_v39, -inf }
 0x223   :  { %v2378_v36 = vrot.slane %v2377_v61, 4  ;;  %v2371_v22 = vrot.slane %v2370_v49, 4  ;;  %v1782_v21 = vmax.f32 %v1780_v15, %v1781_v11  ;;  %v1784_v32 = vsel %vm1536_vm1, %v1218_v25, -inf }
 0x224   :  { %v2384_v7 = vsel %vm1536_vm1, %v1776_v34, -inf  ;;  %v1785_v19 = vmax.f32 %v1783_v57, %v1784_v32  ;;  %v1787_v2 = vsel %vm1536_vm1, %v1220_v62, -inf  ;;  %v2391_v20 = vsel %vm1536_vm1, %v1779_v17, -inf }
 0x225   :  { %v2379_v28 = vmax.f32 %v2377_v61, %v2378_v36  ;;  %v2385_v9 = vrot.slane %v2384_v7, 4  ;;  %v2372_v16 = vmax.f32 %v2370_v49, %v2371_v22  ;;  %v1788_v6 = vmax.f32 %v1786_v33, %v1787_v2 }
 0x226   :  { %v2392_v34 = vrot.slane %v2391_v20, 4  ;;  %v2398_v54 = vsel %vm1536_vm1, %v1782_v21, -inf  ;;  %v2405_v61 = vsel %vm1536_vm1, %v1785_v19, -inf  ;;  %v12928_v15 = vrot.slane %v10234_v38, 2 }
 0x227   :  { %v2380_v5 = vrot.slane %v2379_v28, 2  ;;  %v2386_v18 = vmax.f32 %v2384_v7, %v2385_v9  ;;  %v2373_v39 = vrot.slane %v2372_v16, 2  ;;  %v2360_v49 = vmax.f32 %v10345_v1, %v2359_v50  ;;  %v2829_v9 = vpop.permute.xlu0 %2828 }
 0x228   :  { %v2318_v25 = vmax.f32 %v10234_v38, %v12928_v15  ;;  %v2399_v62 = vrot.slane %v2398_v54, 4  ;;  %v10388_v17 = vmax.f32 %v10330_v60, %v2340_v40  ;;  %v12929_v33 = vrot.slane %v10318_v58, 2 }
 0x229   :  { %v2387_v36 = vrot.slane %v2386_v18, 2  ;;  %v2381_v7 = vmax.f32 %v2379_v28, %v2380_v5  ;;  %v2393_v11 = vmax.f32 %v2391_v20, %v2392_v34  ;;  %v2374_v57 = vmax.f32 %v2372_v16, %v2373_v39  ;;  %v2972_v20 = vpop.permute.xlu1 %2971 }
 0x22a   :  { %v10393_v22 = vmax.f32 %v10318_v58, %v12929_v33  ;;  %v2400_v21 = vmax.f32 %v2398_v54, %v2399_v62  ;;  %v2406_v32 = vrot.slane %v2405_v61, 4  ;;  %v2319_v38 = vrot.slane %v2318_v25, 1 }
 0x22b   :  { %v12930_v1 = vrot.slane %v10332_v8, 1  ;;  %v2366_v60 = vrot.slane %v10355_v45, 2  ;;  %v10403_v40 = vsel %vm3077_vm12, %v10342_v43, %v2868_v29  ;;  %v3051_v58 = vsel %vm3049_vm10, %v9273_v37, %v2763_v44 }
 0x22c   :  { %v2361_v16 = vrot.slane %v2360_v49, 1  ;;  %v2388_v28 = vmax.f32 %v2386_v18, %v2387_v36  ;;  %v2412_v19 = vsel %vm1536_vm1, %v1788_v6, -inf  ;;  %v12931_v2 = vrot.slane %v10285_v12, 1 }
 0x22d   :  { %v10398_v50 = vmax.f32 %v10332_v8, %v12930_v1  ;;  %v2382_v8 = vrot.slane %v2381_v7, 1  ;;  %v2394_v34 = vrot.slane %v2393_v11, 2  ;;  %v2401_v39 = vrot.slane %v2400_v21, 2 }
 0x22e   :  { %v2313_v5 = vmax.f32 %v10285_v12, %v12931_v2  ;;  %v2675_v29 = vsel %vm2615_vm2, %v10227_v42, %v10225_v52  ;;  %v2375_v54 = vrot.slane %v2374_v57, 1  ;;  %v2407_v15 = vmax.f32 %v2405_v61, %v2406_v32  ;;  %v3011_v32 = vpop.permute.xlu1 %3010 }
 0x22f   :  { %v2320_v62 = vmax.f32 %v2318_v25, %v2319_v38  ;;  %v2676_v44 = vsel %vm2617_vm3, %v10231_v3, %v2675_v29  ;;  %v12932_v18 = vrot.slane %v9273_v37, 1  ;;  %v3065_v36 = vsel %vm3063_vm11, %v3051_v58, %v2829_v9  ;;  %v2870_v3 = vpop.permute.xlu0 %2869 }
 0x230   :  { %v2413_v12 = vrot.slane %v2412_v19, 4  ;;  %v2677_v33 = vsel %vm2619_vm4, %v10299_v24, %v2676_v44  ;;  %v10422_v1 = vmax.f32 %v2360_v49, %v2361_v16  ;;  %v10425_v52 = vmax.f32 %v10355_v45, %v2366_v60 }
 0x231   :  { %v3092_v6 = vsel %vm3049_vm10, %v12932_v18, %v2930_v30  ;;  %v2389_v42 = vrot.slane %v2388_v28, 1  ;;  %v2678_v61 = vsel %vm2621_vm5, %v10308_v56, %v2677_v33  ;;  %v2395_v25 = vmax.f32 %v2393_v11, %v2394_v34 }
 0x232   :  { %v2402_v37 = vmax.f32 %v2400_v21, %v2401_v39  ;;  %v2679_v30 = vsel %vm2623_vm6, %v2313_v5, %v2678_v61  ;;  %v376_v9 = vadd.f32 %v10093_v46, %v9899_v41  ;;  %v10432_v38 = vmax.f32 %v2374_v57, %v2375_v54  ;;  %v4087_v41 = vld [vmem:[%s12824_s3 + $0x80] sm:$0xff] }
 0x233   :  { %v10434_v24 = vmax.f32 %v2381_v7, %v2382_v8  ;;  %v2408_v49 = vrot.slane %v2407_v15, 2  ;;  %v2680_v45 = vsel %vm2625_vm7, %v2320_v62, %v2679_v30  ;;  %v10437_v60 = vmax.f32 %v2412_v19, %v2413_v12  ;;  %v4088_v7 = vld [vmem:[%s12824_s3 + $0x88] sm:$0xff] }
 0x234   :  { %v10440_v56 = vsel %vm2719_vm8, 0.0, %v2680_v45  ;;  %v3106_v11 = vsel %vm3063_vm11, %v3092_v6, %v2972_v20  ;;  %v451_v21 = vmax.f32 %v376_v9, 0.0  ;;  %v2354_v57 = vrot.slane %v10393_v22, 1  ;;  %v12935_v61 = vld [vmem:[#allocation5_spill] sm:$0xff] }
 0x235   :  { %12933 = vst [vmem:[#allocation34_spill] sm:$0xff] %v10440_v56  ;;  %v10450_v58 = vmax.f32 %v2388_v28, %v2389_v42  ;;  %2885 = vrot.lane.b32.xlu1 %v10440_v56, %s8702_s9  ;;  %2987 = vrot.lane.b32.xlu0 %v10440_v56, %s8701_s29  ;;  %v3120_v20 = vsel %vm3077_vm12, %v3106_v11, %v3011_v32  ;;  %v2396_v19 = vrot.slane %v2395_v25, 1  ;;  %v2403_v2 = vrot.slane %v2402_v37, 1  ;;  %v2765_v28 = vpop.permute.xlu0 %2764 }
 0x236   :  { %v381_v16 = vadd.f32 %v10093_v46, %v9919_v55  ;;  %v1221_v5 = vcombine.high %v451_v21, %v451_v21  ;;  %v1228_v8 = vrot.slane %v451_v21, %v9066_v26  ;;  %v10461_v34 = vrot.slane %v10440_v56, 1  ;;  %v4072_v21 = vld [vmem:[%s12824_s3 + $0x8] sm:$0xff] }
 0x237   :  { %v386_v29 = vadd.f32 %v10093_v46, %v10031_v63  ;;  %v8471_v54 = vpack.c.bf16 %v4088_v7, %v4087_v41  ;;  %v10465_v62 = vmax.f32 %v2407_v15, %v2408_v49  ;;  %v3162_v55 = vcombine.low %v10403_v40, %v3120_v20 }
 0x238   :  { %12934 = vst [vmem:[#allocation35_spill] sm:$0xff] %v10461_v34  ;;  %v452_v39 = vmax.f32 %v381_v16, 0.0  ;;  %v1235_v44 = vrot.slane %v1221_v5, %v9066_v26  ;;  %v2818_v18 = vrot.slane %v10440_v56, 2  ;;  %v10472_v12 = vsel %vm3077_vm12, %v3065_v36, %v2870_v3 }
 0x239   :  { %2778 = vrot.lane.b32.xlu1 %v10461_v34, %s8703_s1  ;;  %v3163_v33 = vcombine.high %v10403_v40, %v3120_v20  ;;  %3026 = vrot.lane.b32.xlu0 %v10461_v34, %s8702_s9  ;;  %v453_v63 = vmax.f32 %v386_v29, 0.0  ;;  %v10479_v15 = vmax.f32 %v2395_v25, %v2396_v19  ;;  %v1236_v42 = vcombine.high %v1228_v8, %v1228_v8 }
 0x23a   :  { %v10483_v30 = vsel %vm3049_vm10, %v12935_v61, %v2765_v28  ;;  %v1238_v9 = vcombine.high %v452_v39, %v452_v39  ;;  %8472 = vmatprep.subr.bf16.mxu1 %v8471_v54  ;;  %v10485_v36 = vmax.f32 %v2402_v37, %v2403_v2  ;;  %v1237_v3 = vcombine.high %v1235_v44, %v1235_v44  ;;  %v10526_v28 = vpop.permute.xlu1 %2973 }
 0x23b   :  { %v12936_v40 = vcombine.high %v9463_v13, %v9463_v13  ;;  %v10494_v49 = vrot.slane %v452_v39, %v9066_v26  ;;  %v10497_v25 = vrot.slane %v3162_v55, %v9110_v0  ;;  %v10504_v37 = vsel %vm2799_vm9, %v2818_v18, %v8969_v59  ;;  %v4071_v13 = vld [vmem:[%s12824_s3] sm:$0xff] }
 0x23c   :  { %v10500_v45 = vrot.slane %v1238_v9, %v9066_v26  ;;  %12937 = vst [vmem:[#allocation5_spill] sm:$0xff] %v10504_v37  ;;  %v1255_v11 = vcombine.high %v453_v63, %v453_v63  ;;  %v1789_v41 = vsel %vm1536_vm1, %v1228_v8, -inf  ;;  %v1795_v7 = vsel %vm1536_vm1, %v1235_v44, -inf }
 0x23d   :  { %v10491_v32 = vrot.slane %v12936_v40, %v9110_v0  ;;  %v10515_v20 = vrot.slane %v3163_v33, %v9110_v0  ;;  %2947 = vrot.lane.b32.xlu1 %v10504_v37, %s8703_s1  ;;  %v1262_v16 = vrot.slane %v453_v63, %v9066_v26  ;;  %v1801_v2 = vsel %vm1536_vm1, %v10494_v49, -inf }
 0x23e   :  { %v1254_v19 = vcombine.high %v10500_v45, %v10500_v45  ;;  %v1269_v5 = vrot.slane %v1255_v11, %v9066_v26  ;;  %v1792_v8 = vsel %vm1536_vm1, %v1236_v42, -inf  ;;  %v1798_v54 = vsel %vm1536_vm1, %v1237_v3, -inf }
 0x23f   :  { %v1270_v39 = vcombine.high %v1262_v16, %v1262_v16  ;;  %v1793_v29 = vsel %vm1536_vm1, %v1262_v16, -inf  ;;  %v8473_v44 = vpack.c.bf16 %v4072_v21, %v4071_v13  ;;  %v2355_v42 = vmax.f32 %v10393_v22, %v2354_v57  ;;  %v10545_v57 = vpop.permute.xlu1 %2871 }
 0x240   :  { %v1790_v55 = vsel %vm1536_vm1, %v1254_v19, -inf  ;;  %v1271_v18 = vcombine.high %v1269_v5, %v1269_v5  ;;  %v1794_v33 = vmax.f32 %v1792_v8, %v1793_v29  ;;  %v1799_v63 = vsel %vm1536_vm1, %v1269_v5, -inf }
 0x241   :  { %v1791_v61 = vmax.f32 %v1789_v41, %v1790_v55  ;;  %v1796_v9 = vsel %vm1536_vm1, %v1270_v39, -inf  ;;  %v1800_v40 = vmax.f32 %v1798_v54, %v1799_v63  ;;  %2844 = vrot.lane.b32.xlu1 %v10504_v37, %s8701_s29  ;;  %8474 = vmatpush3.bf16.msra.mxu1 %v8473_v44  ;;  %v2368_v21 = vrot.slane %v10425_v52, 1  ;;  %v2932_v39 = vpop.permute.xlu0 %2931 }
 0x242   :  { %v1797_v3 = vmax.f32 %v1795_v7, %v1796_v9  ;;  %v1802_v11 = vsel %vm1536_vm1, %v1271_v18, -inf  ;;  %v2426_v13 = vsel %vm1536_vm1, %v1794_v33, -inf  ;;  %v3193_v9 = vcombine.low %v10497_v25, %v9649_v4 }
 0x243   :  { %v2419_v41 = vsel %vm1536_vm1, %v1791_v61, -inf  ;;  %v1803_v16 = vmax.f32 %v1801_v2, %v1802_v11  ;;  %v2427_v19 = vrot.slane %v2426_v13, 4  ;;  %v2440_v5 = vsel %vm1536_vm1, %v1800_v40, -inf }
 0x244   :  { %v2420_v8 = vrot.slane %v2419_v41, 4  ;;  %v2433_v29 = vsel %vm1536_vm1, %v1797_v3, -inf  ;;  %v2441_v54 = vrot.slane %v2440_v5, 4  ;;  %v2369_v22 = vmax.f32 %v10425_v52, %v2368_v21 }
 0x245   :  { %v2428_v7 = vmax.f32 %v2426_v13, %v2427_v19  ;;  %v2434_v44 = vrot.slane %v2433_v29, 4  ;;  %v2447_v55 = vsel %vm1536_vm1, %v1803_v16, -inf  ;;  %v2682_v2 = vsel %vm2617_vm3, %v10388_v17, %v10314_v10 }
 0x246   :  { %v2421_v18 = vmax.f32 %v2419_v41, %v2420_v8  ;;  %v2442_v33 = vmax.f32 %v2440_v5, %v2441_v54  ;;  %v2448_v63 = vrot.slane %v2447_v55, 4  ;;  %v2683_v61 = vsel %vm2619_vm4, %v10398_v50, %v2682_v2  ;;  %v12938_v8 = vld [vmem:[#allocation6_spill] sm:$0xff] }
 0x247   :  { %v2429_v52 = vrot.slane %v2428_v7, 2  ;;  %v2684_v40 = vsel %vm2621_vm5, %v2355_v42, %v2683_v61  ;;  %v391_v3 = vadd.f32 %v10093_v46, %v10048_v35  ;;  %v2435_v13 = vmax.f32 %v2433_v29, %v2434_v44  ;;  %v10567_v35 = vpop.permute.xlu0 %2830  ;;  %v10572_v29 = vpop.permute.xlu1 %3012 }
 0x248   :  { %v2422_v11 = vrot.slane %v2421_v18, 2  ;;  %v2443_v21 = vrot.slane %v2442_v33, 2  ;;  %v2685_v10 = vsel %vm2623_vm6, %v10422_v1, %v2684_v40  ;;  %v2449_v41 = vmax.f32 %v2447_v55, %v2448_v63  ;;  %v4089_v63 = vld [vmem:[%s12824_s3 + $0x90] sm:$0xff] }
 0x249   :  { %v2430_v17 = vmax.f32 %v2428_v7, %v2429_v52  ;;  %v2686_v16 = vsel %vm2625_vm7, %v2369_v22, %v2685_v10  ;;  %v454_v50 = vmax.f32 %v391_v3, 0.0  ;;  %v1253_v19 = vcombine.high %v10494_v49, %v10494_v49 }
 0x24a   :  { %v2423_v5 = vmax.f32 %v2421_v18, %v2422_v11  ;;  %v10565_v42 = vsel %vm3049_vm10, %v12938_v8, %v2932_v39  ;;  %v10570_v46 = vsel %vm2719_vm8, 0.0, %v2686_v16  ;;  %v3194_v1 = vcombine.high %v10497_v25, %v9649_v4  ;;  %v4091_v8 = vld [vmem:[%s12824_s3 + $0xa0] sm:$0xff] }
 0x24b   :  { %12939 = vst [vmem:[#allocation6_spill] sm:$0xff] %v10570_v46  ;;  %v3195_v54 = vcombine.low %v10515_v20, %v10491_v32  ;;  %v2431_v22 = vrot.slane %v2430_v17, 1  ;;  %2989 = vrot.lane.b32.xlu0 %v10570_v46, %s8701_s29  ;;  %v1279_v49 = vrot.slane %v454_v50, %v9066_v26  ;;  %v3196_v39 = vcombine.high %v10515_v20, %v10491_v32  ;;  %v4090_v32 = vld [vmem:[%s12824_s3 + $0x98] sm:$0xff]  ;;  %v4073_v20 = vld [vmem:[%s12824_s3 + $0x10] sm:$0xff] }
 0x24c   :  { %v2424_v7 = vrot.slane %v2423_v5, 1  ;;  %v2436_v44 = vrot.slane %v2435_v13, 2  ;;  %v2444_v55 = vmax.f32 %v2442_v33, %v2443_v21  ;;  %v10584_v2 = vrot.slane %v3193_v9, %v9110_v0  ;;  %v4074_v33 = vld [vmem:[%s12824_s3 + $0x18] sm:$0xff] }
 0x24d   :  { %v2432_v18 = vmax.f32 %v2430_v17, %v2431_v22  ;;  %v2450_v4 = vrot.slane %v2449_v41, 2  ;;  %v1287_v25 = vcombine.high %v1279_v49, %v1279_v49  ;;  %v1272_v52 = vcombine.high %v454_v50, %v454_v50 }
 0x24e   :  { %v2425_v61 = vmax.f32 %v2423_v5, %v2424_v7  ;;  %v1804_v40 = vsel %vm1536_vm1, %v1253_v19, -inf  ;;  %v1805_v3 = vsel %vm1536_vm1, %v1279_v49, -inf  ;;  %v10601_v9 = vrot.slane %v3195_v54, %v9110_v0  ;;  %v2767_v5 = vpop.permute.xlu0 %2766  ;;  %v10617_v54 = vpop.permute.xlu1 %2933 }
 0x24f   :  { %v1807_v11 = vsel %vm1536_vm1, %v10500_v45, -inf  ;;  %v1806_v21 = vmax.f32 %v1804_v40, %v1805_v3  ;;  %v1808_v10 = vsel %vm1536_vm1, %v1287_v25, -inf  ;;  %2887 = vrot.lane.b32.xlu0 %v10570_v46, %s8702_s9  ;;  %v2437_v17 = vmax.f32 %v2435_v13, %v2436_v44  ;;  %v4092_v45 = vld [vmem:[%s12824_s3 + $0xa8] sm:$0xff]  ;;  %v4075_v44 = vld [vmem:[%s12824_s3 + $0x20] sm:$0xff] }
 0x250   :  { %v2445_v16 = vrot.slane %v2444_v55, 1  ;;  %v10609_v50 = vsel %vm2615_vm2, %v2432_v18, %v2425_v61  ;;  %v1809_v19 = vmax.f32 %v1807_v11, %v1808_v10  ;;  %v10621_v13 = vrot.slane %v10570_v46, 1  ;;  %v4076_v18 = vld [vmem:[%s12824_s3 + $0x28] sm:$0xff]  ;;  %v4093_v10 = vld [vmem:[%s12824_s3 + $0xb0] sm:$0xff] }
 0x251   :  { %v2454_v22 = vsel %vm1536_vm1, %v1806_v21, -inf  ;;  %v8475_v49 = vpack.c.bf16 %v4090_v32, %v4089_v63  ;;  %v8477_v7 = vpack.c.bf16 %v4074_v33, %v4073_v20  ;;  %v10629_v25 = vmax.f32 %v2449_v41, %v2450_v4  ;;  %v8673_v32 = vld [vmem:[%s12823_s2] ss:$0 sm:$0xff] }
 0x252   :  { %12940 = vst [vmem:[#allocation36_spill] sm:$0xff] %v10621_v13  ;;  %v1286_v61 = vrot.slane %v1272_v52, %v9066_v26  ;;  %v2455_v40 = vrot.slane %v2454_v22, 4  ;;  %v2461_v3 = vsel %vm1536_vm1, %v1809_v19, -inf  ;;  %2780 = vrot.lane.b32.xlu1 %v10621_v13, %s8703_s1  ;;  %v2820_v63 = vrot.slane %v10570_v46, 2 }
 0x253   :  { %v2462_v11 = vrot.slane %v2461_v3, 4  ;;  %8476 = vmatprep.subr.bf16.mxu1 %v8475_v49  ;;  %v396_v20 = vadd.f32 %v8673_v32, %v10085_v14  ;;  %v8479_v41 = vpack.c.bf16 %v4092_v45, %v4091_v8  ;;  %v10642_v52 = vrot.slane %v3194_v1, %v9110_v0  ;;  %3028 = vrot.lane.b32.xlu0 %v10621_v13, %s8702_s9  ;;  %v12941_v8 = vld [vmem:[#allocation23_spill] sm:$0xff] }
 0x254   :  { %v10645_v33 = vrot.slane %v3196_v39, %v9110_v0  ;;  %8478 = vmatpush3.bf16.msra.mxu1 %v8477_v7  ;;  %v8481_v21 = vpack.c.bf16 %v4076_v18, %v4075_v44  ;;  %v2438_v19 = vrot.slane %v2437_v17, 1  ;;  %v10652_v14 = vmax.f32 %v2444_v55, %v2445_v16  ;;  %v4094_v45 = vld [vmem:[%s12824_s3 + $0xb8] sm:$0xff]  ;;  %v4077_v49 = vld [vmem:[%s12824_s3 + $0x30] sm:$0xff]  ;;  %v2833_v44 = vpop.permute.xlu0 %2832  ;;  %v10672_v18 = vpop.permute.xlu1 %2975 }
 0x255   :  { %v3066_v1 = vsel %vm3063_vm11, %v10483_v30, %v10567_v35  ;;  %8480 = vmatprep.subr.bf16.mxu1 %v8479_v41  ;;  %v401_v39 = vadd.f32 %v8673_v32, %v12941_v8  ;;  %v4078_v55 = vld [vmem:[%s12824_s3 + $0x38] sm:$0xff]  ;;  %v1288_v7 = vcombine.high %v1286_v61, %v1286_v61  ;;  %v10670_v30 = vsel %vm2799_vm9, %v2820_v63, %v8969_v59 }
 0x256   :  { %12942 = vst [vmem:[#allocation23_spill] sm:$0xff] %v10670_v30  ;;  %v455_v35 = vmax.f32 %v396_v20, 0.0  ;;  %v2456_v41 = vmax.f32 %v2454_v22, %v2455_v40  ;;  %v2463_v8 = vmax.f32 %v2461_v3, %v2462_v11  ;;  %v3107_v4 = vsel %vm3063_vm11, %v10565_v42, %v10526_v28  ;;  %2846 = vrot.lane.b32.xlu1 %v10670_v30, %s8701_s29  ;;  %v12943_v16 = vld [vmem:[#allocation7_spill] sm:$0xff] }
 0x257   :  { %v456_v6 = vmax.f32 %v401_v39, 0.0  ;;  %v3053_v46 = vsel %vm3049_vm10, %v12943_v16, %v2767_v5  ;;  %v3121_v63 = vsel %vm3077_vm12, %v3107_v4, %v10572_v29  ;;  %v8483_v20 = vpack.c.bf16 %v4094_v45, %v4093_v10  ;;  %2949 = vrot.lane.b32.xlu0 %v10670_v30, %s8703_s1 }
 0x258   :  { %8482 = vmatpush3.bf16.msra.mxu1 %v8481_v21  ;;  %v8485_v13 = vpack.c.bf16 %v4078_v55, %v4077_v49  ;;  %v10683_v56 = vmax.f32 %v2437_v17, %v2438_v19  ;;  %v1810_v22 = vsel %vm1536_vm1, %v1286_v61, -inf  ;;  %v10688_v28 = vsel %vm3077_vm12, %v3066_v1, %v10545_v57  ;;  %v10708_v19 = vpop.permute.xlu1 %3014  ;;  %v12944_v1 = vld [vmem:[#allocation9_spill] sm:$0xff] }
 0x259   :  { %v10691_v42 = vsel %vm3063_vm11, %v3053_v46, %v2833_v44  ;;  %v1289_v5 = vcombine.high %v455_v35, %v455_v35  ;;  %v1306_v40 = vcombine.high %v456_v6, %v456_v6  ;;  %v10696_v29 = vrot.slane %v456_v6, %v9066_v26  ;;  %8484 = vmatprep.subr.bf16.mxu1 %v8483_v20  ;;  %v10706_v6 = vpop.permute.xlu0 %2873 }
 0x25a   :  { %v3228_v17 = vcombine.low %v10472_v12, %v3121_v63  ;;  %v2457_v3 = vrot.slane %v2456_v41, 2  ;;  %v2464_v61 = vrot.slane %v2463_v8, 2  ;;  %v3229_v11 = vcombine.high %v10472_v12, %v3121_v63 }
 0x25b   :  { %v406_v57 = vadd.f32 %v8673_v32, %v10168_v31  ;;  %v1296_v46 = vrot.slane %v455_v35, %v9066_v26  ;;  %v1320_v4 = vrot.slane %v1306_v40, %v9066_v26  ;;  %v1321_v21 = vcombine.high %v10696_v29, %v10696_v29 }
 0x25c   :  { %v1813_v10 = vsel %vm1536_vm1, %v1288_v7, -inf  ;;  %8486 = vmatpush3.bf16.msra.mxu1 %v8485_v13  ;;  %v12945_v12 = vcombine.high %v12944_v1, %v12944_v1  ;;  %v3237_v31 = vrot.slane %v3228_v17, %v9110_v0  ;;  %v3244_v32 = vrot.slane %v3229_v11, %v9110_v0  ;;  %v12946_v17 = vld [vmem:[#allocation10_spill] sm:$0xff] }
 0x25d   :  { %v457_v45 = vmax.f32 %v406_v57, 0.0  ;;  %v1303_v49 = vrot.slane %v1289_v5, %v9066_v26  ;;  %v1322_v55 = vcombine.high %v1320_v4, %v1320_v4  ;;  %v1811_v16 = vsel %vm1536_vm1, %v1321_v21, -inf  ;;  %v10724_v57 = vpop.permute.xlu1 %2977 }
 0x25e   :  { %v3258_v39 = vrot.slane %v12945_v12, %v9110_v0  ;;  %v1814_v13 = vsel %vm1536_vm1, %v1320_v4, -inf  ;;  %v2458_v7 = vmax.f32 %v2456_v41, %v2457_v3  ;;  %v10719_v35 = vmax.f32 %v2463_v8, %v2464_v61  ;;  %v10728_v61 = vpop.permute.xlu0 %2768 }
 0x25f   :  { %v1812_v44 = vmax.f32 %v1810_v22, %v1811_v16  ;;  %v1815_v63 = vmax.f32 %v1813_v10, %v1814_v13  ;;  %v1816_v20 = vsel %vm1536_vm1, %v1296_v46, -inf  ;;  %v1817_v40 = vsel %vm1536_vm1, %v1322_v55, -inf }
 0x260   :  { %v3259_v1 = vcombine.low %v3237_v31, %v12946_v17  ;;  %v3261_v11 = vcombine.low %v3244_v32, %v3258_v39  ;;  %v1818_v5 = vmax.f32 %v1816_v20, %v1817_v40  ;;  %v1323_v4 = vcombine.high %v457_v45, %v457_v45 }
 0x261   :  { %v2468_v12 = vsel %vm1536_vm1, %v1812_v44, -inf  ;;  %v2475_v21 = vsel %vm1536_vm1, %v1815_v63, -inf  ;;  %v1304_v41 = vcombine.high %v1296_v46, %v1296_v46  ;;  %v1305_v8 = vcombine.high %v1303_v49, %v1303_v49 }
 0x262   :  { %v2469_v3 = vrot.slane %v2468_v12, 4  ;;  %v2476_v22 = vrot.slane %v2475_v21, 4  ;;  %v2459_v10 = vrot.slane %v2458_v7, 1  ;;  %v2482_v55 = vsel %vm1536_vm1, %v1818_v5, -inf }
 0x263   :  { %v3260_v16 = vcombine.high %v3237_v31, %v12946_v17  ;;  %v1330_v13 = vrot.slane %v457_v45, %v9066_v26  ;;  %v10734_v44 = vrot.slane %v3259_v1, %v9110_v0  ;;  %v3276_v63 = vrot.slane %v3261_v11, %v9110_v0  ;;  %v10741_v45 = vpop.permute.xlu1 %2875 }
 0x264   :  { %v2470_v30 = vmax.f32 %v2468_v12, %v2469_v3  ;;  %v2477_v20 = vmax.f32 %v2475_v21, %v2476_v22  ;;  %v1822_v46 = vsel %vm1536_vm1, %v1303_v49, -inf  ;;  %v2483_v40 = vrot.slane %v2482_v55, 4 }
 0x265   :  { %v1337_v34 = vrot.slane %v1323_v4, %v9066_v26  ;;  %v1338_v37 = vcombine.high %v1330_v13, %v1330_v13  ;;  %v3262_v47 = vcombine.high %v3244_v32, %v3258_v39  ;;  %v1819_v5 = vsel %vm1536_vm1, %v1304_v41, -inf  ;;  %v10748_v39 = vpop.permute.xlu0 %2935 }
 0x266   :  { %v2471_v43 = vrot.slane %v2470_v30, 2  ;;  %v1825_v31 = vsel %vm1536_vm1, %v1305_v8, -inf  ;;  %v3283_v17 = vrot.slane %v3260_v16, %v9110_v0  ;;  %v1820_v12 = vsel %vm1536_vm1, %v1330_v13, -inf }
 0x267   :  { %v1339_v1 = vcombine.high %v1337_v34, %v1337_v34  ;;  %v1823_v11 = vsel %vm1536_vm1, %v1338_v37, -inf  ;;  %v2478_v49 = vrot.slane %v2477_v20, 2  ;;  %v3291_v26 = vcombine.high %v10734_v44, %v10734_v44 }
 0x268   :  { %v3292_v21 = vcombine.high %v3276_v63, %v3276_v63  ;;  %v1821_v4 = vmax.f32 %v1819_v5, %v1820_v12  ;;  %v2484_v32 = vmax.f32 %v2482_v55, %v2483_v40  ;;  %v1824_v41 = vmax.f32 %v1822_v46, %v1823_v11  ;;  %v4079_v12 = vld [vmem:[%s12824_s3 + $0x40] sm:$0xff]  ;;  %v4080_v11 = vld [vmem:[%s12824_s3 + $0x48] sm:$0xff] }
 0x269   :  { %v1826_v8 = vsel %vm1536_vm1, %v1337_v34, -inf  ;;  %v10752_v3 = vsel %vm1536_vm1, %v1339_v1, -inf  ;;  %v10754_v22 = vmax.f32 %v2458_v7, %v2459_v10  ;;  %v10758_v37 = vsel %vm1536_vm1, %v10696_v29, -inf  ;;  %v4095_v29 = vld [vmem:[%s12824_s3 + $0xc0] sm:$0xff] }
 0x26a   :  { %v2472_v16 = vmax.f32 %v2470_v30, %v2471_v43  ;;  %v1827_v13 = vmax.f32 %v1825_v31, %v1826_v8  ;;  %v3290_v23 = vrot.slane %v3262_v47, %v9110_v0  ;;  %v1830_v5 = vmax.f32 %v10758_v37, %v10752_v3  ;;  %v4096_v47 = vld [vmem:[%s12824_s3 + $0xc8] sm:$0xff]  ;;  %v10773_v43 = vpop.permute.xlu1 %3016 }
 0x26b   :  { %v2489_v55 = vsel %vm1536_vm1, %v1821_v4, -inf  ;;  %v2496_v34 = vsel %vm1536_vm1, %v1824_v41, -inf  ;;  %v2479_v46 = vmax.f32 %v2477_v20, %v2478_v49  ;;  %v3293_v40 = vcombine.high %v3283_v17, %v3283_v17 }
 0x26c   :  { %v10765_v1 = vcombine.low %v3283_v17, %v3291_v26  ;;  %v2490_v7 = vrot.slane %v2489_v55, 4  ;;  %v2485_v30 = vrot.slane %v2484_v32, 2  ;;  %v10775_v10 = vcombine.low %v3290_v23, %v3292_v21  ;;  %v10787_v23 = vpop.permute.xlu0 %2834 }
 0x26d   :  { %v2503_v31 = vsel %vm1536_vm1, %v1827_v13, -inf  ;;  %v12947_v20 = vrot.slane %v10437_v60, 2  ;;  %v2473_v49 = vrot.slane %v2472_v16, 1  ;;  %v2497_v4 = vrot.slane %v2496_v34, 4  ;;  %v4097_v13 = vld [vmem:[%s12824_s3 + $0xd0] sm:$0xff] }
 0x26e   :  { %v2491_v26 = vmax.f32 %v2489_v55, %v2490_v7  ;;  %v2504_v41 = vrot.slane %v2503_v31, 4  ;;  %v12948_v21 = vrot.slane %v10465_v62, 1  ;;  %v8487_v37 = vpack.c.bf16 %v4096_v47, %v4095_v29  ;;  %v10818_v48 = vpop.permute.xlu1 %2937 }
 0x26f   :  { %v2416_v17 = vmax.f32 %v10437_v60, %v12947_v20  ;;  %v2687_v60 = vsel %vm2615_vm2, %v10434_v24, %v10432_v38  ;;  %v2480_v20 = vrot.slane %v2479_v46, 1  ;;  %v8489_v27 = vpack.c.bf16 %v4080_v11, %v4079_v12  ;;  %v4082_v38 = vld [vmem:[%s12824_s3 + $0x58] sm:$0xff] }
 0x270   :  { %v2411_v8 = vmax.f32 %v10465_v62, %v12948_v21  ;;  %v2492_v55 = vrot.slane %v2491_v26, 2  ;;  %v2688_v7 = vsel %vm2617_vm3, %v10450_v58, %v2687_v60  ;;  %v4098_v62 = vld [vmem:[%s12824_s3 + $0xd8] sm:$0xff]  ;;  %v4081_v21 = vld [vmem:[%s12824_s3 + $0x50] sm:$0xff]  ;;  %v2486_v24 = vmax.f32 %v2484_v32, %v2485_v30  ;;  %8488 = vmatprep.subr.bf16.mxu1 %v8487_v37 }
 0x271   :  { %v2417_v3 = vrot.slane %v2416_v17, 1  ;;  %v10809_v29 = vcombine.low %v3293_v40, %v3276_v63  ;;  %v2689_v58 = vsel %vm2619_vm4, %v10479_v15, %v2688_v7  ;;  %v2498_v12 = vmax.f32 %v2496_v34, %v2497_v4  ;;  %v12949_v60 = vld [vmem:[#allocation8_spill] sm:$0xff]  ;;  %8490 = vmatpush3.bf16.msra.mxu1 %v8489_v27 }
 0x272   :  { %v2505_v11 = vmax.f32 %v2503_v31, %v2504_v41  ;;  %v3094_v51 = vsel %vm3049_vm10, %v12949_v60, %v10617_v54  ;;  %v2690_v53 = vsel %vm2621_vm5, %v10485_v36, %v2689_v58  ;;  %v2493_v32 = vmax.f32 %v2491_v26, %v2492_v55  ;;  %v4099_v15 = vld [vmem:[%s12824_s3 + $0xe0] sm:$0xff]  ;;  %v4100_v36 = vld [vmem:[%s12824_s3 + $0xe8] sm:$0xff]  ;;  %v4101_v26 = vld [vmem:[%s12824_s3 + $0xf0] sm:$0xff] }
 0x273   :  { %v2418_v47 = vmax.f32 %v2416_v17, %v2417_v3  ;;  %v2691_v63 = vsel %vm2623_vm6, %v2411_v8, %v2690_v53  ;;  %v8491_v40 = vpack.c.bf16 %v4098_v62, %v4097_v13  ;;  %v8493_v30 = vpack.c.bf16 %v4082_v38, %v4081_v21  ;;  %v4083_v53 = vld [vmem:[%s12824_s3 + $0x60] sm:$0xff]  ;;  %v10840_v17 = vpop.permute.xlu0 %2770  ;;  %v4102_v4 = vld [vmem:[%s12824_s3 + $0xf8] sm:$0xff]  ;;  %v4085_v38 = vld [vmem:[%s12824_s3 + $0x70] sm:$0xff] }
 0x274   :  { %v10824_v34 = vmax.f32 %v2472_v16, %v2473_v49  ;;  %v10826_v31 = vmax.f32 %v2479_v46, %v2480_v20  ;;  %v3108_v27 = vsel %vm3063_vm11, %v3094_v51, %v10672_v18  ;;  %v4084_v16 = vld [vmem:[%s12824_s3 + $0x68] sm:$0xff]  ;;  %v2487_v46 = vrot.slane %v2486_v24, 1 }
 0x275   :  { %v2692_v54 = vsel %vm2625_vm7, %v2418_v47, %v2691_v63  ;;  %v10843_v49 = vsel %vm1536_vm1, %v1830_v5, -inf  ;;  %8492 = vmatprep.subr.bf16.mxu1 %v8491_v40  ;;  %v3122_v18 = vsel %vm3077_vm12, %v3108_v27, %v10708_v19  ;;  %v2499_v41 = vrot.slane %v2498_v12, 2  ;;  %v10874_v47 = vpop.permute.xlu1 %2979  ;;  %v12950_v63 = vld [vmem:[#allocation13_spill] sm:$0xff] }
 0x276   :  { %v10846_v51 = vsel %vm2719_vm8, 0.0, %v2692_v54  ;;  %v2506_v8 = vrot.slane %v2505_v11, 2  ;;  %v3294_v5 = vcombine.low %v10688_v28, %v3122_v18  ;;  %v3295_v19 = vcombine.high %v10688_v28, %v3122_v18  ;;  %8494 = vmatpush3.bf16.msra.mxu1 %v8493_v30  ;;  %v4086_v28 = vld [vmem:[%s12824_s3 + $0x78] sm:$0xff] }
 0x277   :  { %2889 = vrot.lane.b32.xlu1 %v10846_v51, %s8702_s9  ;;  %2991 = vrot.lane.b32.xlu0 %v10846_v51, %s8701_s29  ;;  %v2494_v3 = vrot.slane %v2493_v32, 1  ;;  %v10863_v37 = vrot.slane %v10846_v51, 1  ;;  %v8495_v13 = vpack.c.bf16 %v4100_v36, %v4099_v15  ;;  %v8497_v20 = vpack.c.bf16 %v4084_v16, %v4083_v53  ;;  %v10900_v36 = vpop.permute.xlu0 %2836  ;;  %v12954_v18 = vld [vmem:[#allocation16_spill] sm:$0xff] }
 0x278   :  { %v3303_v55 = vrot.slane %v3294_v5, %v9110_v0  ;;  %v3310_v7 = vrot.slane %v3295_v19, %v9110_v0  ;;  %v2822_v62 = vrot.slane %v10846_v51, 2  ;;  %v8499_v21 = vpack.c.bf16 %v4102_v4, %v4101_v26  ;;  %v12955_v19 = vld [vmem:[#allocation12_spill] sm:$0xff] }
 0x279   :  { %v10876_v58 = vmax.f32 %v2486_v24, %v2487_v46  ;;  %v10881_v60 = vsel %vm3077_vm12, %v10691_v42, %v10706_v6  ;;  %v12951_v40 = vcombine.high %v12950_v63, %v12950_v63  ;;  %8496 = vmatprep.subr.bf16.mxu1 %v8495_v13  ;;  %v2466_v15 = vrot.slane %v10719_v35, 1  ;;  %v10935_v13 = vpop.permute.xlu1 %3018 }
 0x27a   :  { %v10888_v54 = vmax.f32 %v2498_v12, %v2499_v41  ;;  %v10890_v27 = vmax.f32 %v2505_v11, %v2506_v8  ;;  %v2511_v24 = vrot.slane %v10843_v49, 4  ;;  %v12952_v42 = vrot.slane %v10629_v25, 1  ;;  %v12953_v12 = vld [vmem:[#allocation11_spill] sm:$0xff]  ;;  %8498 = vmatpush3.bf16.msra.mxu1 %v8497_v20 }
 0x27b   :  { %v3324_v30 = vrot.slane %v12951_v40, %v9110_v0  ;;  %2782 = vrot.lane.b32.xlu1 %v10863_v37, %s8703_s1  ;;  %3030 = vrot.lane.b32.xlu0 %v10863_v37, %s8702_s9  ;;  %v10902_v53 = vmax.f32 %v2493_v32, %v2494_v3  ;;  %v3054_v11 = vsel %vm3049_vm10, %v12953_v12, %v10728_v61 }
 0x27c   :  { %v2453_v6 = vmax.f32 %v10629_v25, %v12952_v42  ;;  %v8501_v46 = vpack.c.bf16 %v4086_v28, %v4085_v38  ;;  %v3325_v26 = vcombine.low %v3303_v55, %v12954_v18  ;;  %v10910_v4 = vsel %vm2799_vm9, %v2822_v62, %v8969_v59  ;;  %8500 = vmatprep.subr.bf16.mxu1 %v8499_v21 }
 0x27d   :  { %v3327_v16 = vcombine.low %v3310_v7, %v3324_v30  ;;  %v2467_v25 = vmax.f32 %v10719_v35, %v2466_v15  ;;  %v2694_v32 = vsel %vm2617_vm3, %v10683_v56, %v10609_v50  ;;  %v3326_v41 = vcombine.high %v3303_v55, %v12954_v18 }
 0x27e   :  { %v3328_v8 = vcombine.high %v3310_v7, %v3324_v30  ;;  %v2695_v61 = vsel %vm2619_vm4, %v10652_v14, %v2694_v32  ;;  %v4114_v5 = vcombine.low %v10584_v2, %v10642_v52  ;;  %v3095_v35 = vsel %vm3049_vm10, %v12955_v19, %v10748_v39  ;;  %v10933_v14 = vpop.permute.xlu0 %2877  ;;  %8502 = vmatpush3.bf16.msra.mxu1 %v8501_v46  ;;  %v10974_v30 = vpop.permute.xlu1 %2981 }
 0x27f   :  { %2951 = vrot.lane.b32.xlu1 %v10910_v4, %s8703_s1  ;;  %v10928_v3 = vsel %vm3063_vm11, %v3054_v11, %v10787_v23  ;;  %v2696_v56 = vsel %vm2621_vm5, %v2453_v6, %v2695_v61  ;;  %v3226_v50 = vcombine.high %v10601_v9, %v10601_v9  ;;  %v10938_v20 = vrot.slane %v3327_v16, %v9110_v0 }
 0x280   :  { %v2697_v39 = vsel %vm2623_vm6, %v10754_v22, %v2696_v56  ;;  %v7894_v23 = vcombine.high %v10584_v2, %v10642_v52  ;;  %v4116_v55 = vcombine.low %v10601_v9, %v10645_v33  ;;  %v10947_v7 = vrot.slane %v3325_v26, %v9110_v0 }
 0x281   :  { %v2698_v62 = vsel %vm2625_vm7, %v2467_v25, %v2697_v39  ;;  %v4117_v21 = vcombine.low %v3226_v50, %v10734_v44  ;;  %v4124_v38 = vrot.slane %v4114_v5, %v9110_v0  ;;  %v12956_v28 = vmov 0.0|0.0   ;;  %v12957_v5 = vld [vmem:[#allocation17_spill] sm:$0xff] }
 0x282   :  { %8503 = vmatprep.subr.bf16.mxu1 %v12956_v28  ;;  %v10954_v63 = vrot.slane %v3326_v41, %v9110_v0  ;;  %v10957_v22 = vrot.slane %v3328_v8, %v9110_v0  ;;  %v10960_v2 = vsel %vm2719_vm8, 0.0, %v2698_v62  ;;  %v4131_v9 = vrot.slane %v7894_v23, %v9110_v0 }
 0x283   :  { %2848 = vrot.lane.b32.xlu1 %v10910_v4, %s8701_s29  ;;  %2993 = vrot.lane.b32.xlu0 %v10960_v2, %s8701_s29  ;;  %v4138_v52 = vrot.slane %v4116_v55, %v9110_v0  ;;  %v4145_v33 = vrot.slane %v4117_v21, %v9110_v0  ;;  %v3109_v44 = vsel %vm3063_vm11, %v3095_v35, %v10724_v57  ;;  %v10972_v40 = vrot.slane %v10960_v2, 1  ;;  %v10982_v57 = vpop.permute.xlu0 %2772  ;;  %v12959_v21 = vld [vmem:[#allocation18_spill] sm:$0xff] }
 0x284   :  { %v3358_v15 = vcombine.high %v10938_v20, %v10938_v20  ;;  %v4147_v42 = vcombine.high %v4124_v38, %v4131_v9  ;;  %v4146_v6 = vcombine.low %v4124_v38, %v4131_v9  ;;  %v3123_v12 = vsel %vm3077_vm12, %v3109_v44, %v10773_v43  ;;  %v11016_v9 = vpop.permute.xlu1 %2879 }
 0x285   :  { %v4149_v11 = vcombine.high %v4138_v52, %v4145_v33  ;;  %v4148_v16 = vcombine.low %v4138_v52, %v4145_v33  ;;  %v3360_v46 = vcombine.low %v10881_v60, %v3123_v12  ;;  %v3361_v18 = vcombine.high %v10881_v60, %v3123_v12 }
 0x286   :  { %v4184_v26 = vcombine.low %v10947_v7, %v10954_v63  ;;  %v7895_v25 = vcombine.high %v10947_v7, %v10954_v63  ;;  %v4163_v32 = vrot.slane %v4147_v42, %v9110_v0  ;;  %v10990_v41 = vrot.slane %v4146_v6, %v9110_v0 }
 0x287   :  { %v2501_v43 = vrot.slane %v10888_v54, 1  ;;  %v4177_v8 = vrot.slane %v4149_v11, %v9110_v0  ;;  %2784 = vrot.lane.b32.xlu1 %v10972_v40, %s8703_s1  ;;  %v10997_v60 = vrot.slane %v4148_v16, %v9110_v0  ;;  %2891 = vrot.lane.b32.xlu0 %v10960_v2, %s8702_s9  ;;  %v3369_v61 = vrot.slane %v3360_v46, %v9110_v0  ;;  %v11027_v11 = vpop.permute.xlu0 %2939 }
 0x288   :  { %v12958_v19 = vcombine.high %v12957_v5, %v12957_v5  ;;  %v3376_v56 = vrot.slane %v3361_v18, %v9110_v0  ;;  %v4191_v50 = vrot.slane %v10765_v1, %v9110_v0  ;;  %v4198_v39 = vrot.slane %v10809_v29, %v9110_v0 }
 0x289   :  { %v4180_v23 = vcombine.low %v4163_v32, %v4177_v8  ;;  %v4178_v55 = vcombine.low %v10990_v41, %v10997_v60  ;;  %v4179_v62 = vcombine.high %v10990_v41, %v10997_v60  ;;  %v3391_v38 = vcombine.low %v3369_v61, %v12959_v21  ;;  %v12960_v32 = vld [vmem:[#allocation14_spill] sm:$0xff] }
 0x28a   :  { %v3390_v35 = vrot.slane %v12958_v19, %v9110_v0  ;;  %v3392_v52 = vcombine.high %v3369_v61, %v12959_v21  ;;  %v2824_v44 = vrot.slane %v10960_v2, 2  ;;  %v4205_v1 = vrot.slane %v10775_v10, %v9110_v0 }
 0x28b   :  { %5058 = vmatprep.mubr.f32.mxu1 %v4180_v23  ;;  %3032 = vrot.lane.b32.xlu0 %v10972_v40, %s8702_s9  ;;  %v3401_v42 = vrot.slane %v3391_v38, %v9110_v0  ;;  %v4212_v6 = vrot.slane %v4184_v26, %v9110_v0  ;;  %v2508_v12 = vrot.slane %v10890_v27, 1  ;;  %v4249_v16 = vcombine.low %v10938_v20, %v10957_v22 }
 0x28c   :  { %v3393_v33 = vcombine.low %v3376_v56, %v3390_v35  ;;  %v3394_v29 = vcombine.high %v3376_v56, %v3390_v35  ;;  %5059 = vmatmul.mubr.f32.vlgmr.msra.gmra.mrb[0].mxu1 %v4178_v55  ;;  %v3415_v10 = vrot.slane %v3392_v52, %v9110_v0  ;;  %v4214_v18 = vcombine.high %v4191_v50, %v4198_v39  ;;  %v12961_v55 = vld [vmem:[#allocation15_spill] sm:$0xff] }
 0x28d   :  { %v3055_v8 = vsel %vm3049_vm10, %v12960_v32, %v10840_v17  ;;  %v3082_v26 = vsel %vm3077_vm12, %v10928_v3, %v10741_v45  ;;  %v4250_v61 = vcombine.low %v3358_v15, %v3401_v42  ;;  %v4216_v5 = vcombine.high %v4205_v1, %v4212_v6  ;;  %v11050_v15 = vpop.permute.xlu1 %3020 }
 0x28e   :  { %v3408_v46 = vrot.slane %v3393_v33, %v9110_v0  ;;  %v3069_v19 = vsel %vm3063_vm11, %v3055_v8, %v10900_v36  ;;  %v3423_v20 = vcombine.high %v3401_v42, %v3401_v42  ;;  %v11043_v22 = vsel %vm2799_vm9, %v2824_v44, %v8969_v59  ;;  %v11065_v44 = vpop.permute.xlu0 %2838 }
 0x28f   :  { %v4213_v35 = vcombine.low %v4191_v50, %v4198_v39  ;;  %v3422_v56 = vrot.slane %v3394_v29, %v9110_v0  ;;  %2953 = vrot.lane.b32.xlu0 %v11043_v22, %s8703_s1  ;;  %v4230_v17 = vrot.slane %v4214_v18, %v9110_v0  ;;  %v4244_v45 = vrot.slane %v4216_v5, %v9110_v0  ;;  %v12962_v18 = vld [vmem:[#allocation21_spill] sm:$0xff] }
 0x290   :  { %v4215_v3 = vcombine.low %v4205_v1, %v4212_v6  ;;  %v3424_v23 = vcombine.high %v3408_v46, %v3408_v46  ;;  %v3425_v36 = vcombine.high %v3415_v10, %v3415_v10  ;;  %v3096_v21 = vsel %vm3049_vm10, %v12961_v55, %v10818_v48 }
 0x291   :  { %v11056_v50 = vrot.slane %v4213_v35, %v9110_v0  ;;  %v4247_v39 = vcombine.low %v4230_v17, %v4244_v45  ;;  %v2502_v52 = vmax.f32 %v10888_v54, %v2501_v43  ;;  %v2512_v33 = vmax.f32 %v10843_v49, %v2511_v24  ;;  %v12964_v17 = vld [vmem:[#allocation24_spill] sm:$0xff] }
 0x292   :  { %v11059_v38 = vrot.slane %v4215_v3, %v9110_v0  ;;  %v4251_v1 = vcombine.low %v3415_v10, %v3423_v20  ;;  %v2509_v29 = vmax.f32 %v10890_v27, %v2508_v12  ;;  %v2699_v48 = vsel %vm2615_vm2, %v10826_v31, %v10824_v34  ;;  %v11092_v8 = vpop.permute.xlu0 %2943 }
 0x293   :  { %v3110_v42 = vsel %vm3063_vm11, %v3096_v21, %v10874_v47  ;;  %5063 = vmatprep.mubr.f32.mxu1 %v4247_v39  ;;  %v2513_v43 = vrot.slane %v2512_v33, 2  ;;  %v2700_v49 = vsel %vm2617_vm3, %v10876_v58, %v2699_v48  ;;  %v11081_v27 = vsel %vm3077_vm12, %v3069_v19, %v10933_v14 }
 0x294   :  { %v4245_v54 = vcombine.low %v11056_v50, %v11059_v38  ;;  %v3124_v24 = vsel %vm3077_vm12, %v3110_v42, %v10935_v13  ;;  %v2701_v34 = vsel %vm2619_vm4, %v10902_v53, %v2700_v49  ;;  %v4315_v6 = vcombine.low %v3425_v36, %v3408_v46  ;;  %v11090_v13 = vpop.permute.xlu1 %2941 }
 0x295   :  { %v3426_v31 = vcombine.low %v3082_v26, %v3124_v24  ;;  %v3427_v47 = vcombine.high %v3082_v26, %v3124_v24  ;;  %v2514_v12 = vmax.f32 %v2512_v33, %v2513_v43  ;;  %v2702_v10 = vsel %vm2621_vm5, %v2502_v52, %v2701_v34 }
 0x296   :  { %5064 = vmatmul.mubr.f32.gmra.mrb[2].mxu1 %v4245_v54  ;;  %v12963_v58 = vcombine.high %v12962_v18, %v12962_v18  ;;  %v2703_v14 = vsel %vm2623_vm6, %v2509_v29, %v2702_v10  ;;  %v4258_v46 = vrot.slane %v7895_v25, %v9110_v0  ;;  %v4265_v19 = vrot.slane %v4249_v16, %v9110_v0  ;;  %v11106_v29 = vpop.permute.xlu0 %2985  ;;  %v12965_v25 = vld [vmem:[#allocation20_spill] sm:$0xff] }
 0x297   :  { %v3435_v53 = vrot.slane %v3426_v31, %v9110_v0  ;;  %v3442_v26 = vrot.slane %v3427_v47, %v9110_v0  ;;  %v2515_v5 = vrot.slane %v2514_v12, 1  ;;  %v4272_v20 = vrot.slane %v4250_v61, %v9110_v0 }
 0x298   :  { %v3456_v32 = vrot.slane %v12963_v58, %v9110_v0  ;;  %v4279_v35 = vrot.slane %v4251_v1, %v9110_v0  ;;  %v4316_v21 = vcombine.low %v3422_v56, %v3424_v23  ;;  %v4281_v52 = vcombine.high %v4258_v46, %v4265_v19  ;;  %v11116_v42 = vpop.permute.xlu1 %2881 }
 0x299   :  { %v3457_v45 = vcombine.low %v3435_v53, %v12964_v17  ;;  %v3458_v3 = vcombine.high %v3435_v53, %v12964_v17  ;;  %v2516_v39 = vmax.f32 %v2514_v12, %v2515_v5  ;;  %v3097_v16 = vsel %vm3049_vm10, %v12965_v25, %v11027_v11 }
 0x29a   :  { %v3459_v36 = vcombine.low %v3442_v26, %v3456_v32  ;;  %v3460_v55 = vcombine.high %v3442_v26, %v3456_v32  ;;  %v4283_v33 = vcombine.high %v4272_v20, %v4279_v35  ;;  %v4280_v61 = vcombine.low %v4258_v46, %v4265_v19  ;;  %v11148_v26 = vpop.permute.xlu0 %2883  ;;  %v12966_v46 = vld [vmem:[#allocation30_spill] sm:$0xff] }
 0x29b   :  { %v3467_v7 = vrot.slane %v3457_v45, %v9110_v0  ;;  %v3481_v63 = vrot.slane %v3458_v3, %v9110_v0  ;;  %v2704_v1 = vsel %vm2625_vm7, %v2516_v39, %v2703_v14  ;;  %v4297_v48 = vrot.slane %v4281_v52, %v9110_v0  ;;  %v12968_v52 = vld [vmem:[#allocation25_spill] sm:$0xff] }
 0x29c   :  { %v4311_v56 = vrot.slane %v4283_v33, %v9110_v0  ;;  %v4282_v23 = vcombine.low %v4272_v20, %v4279_v35  ;;  %v11119_v54 = vsel %vm2719_vm8, 0.0, %v2704_v1  ;;  %v11122_v43 = vrot.slane %v3459_v36, %v9110_v0  ;;  %v11166_v3 = vpop.permute.xlu1 %2774  ;;  %v12970_v1 = vld [vmem:[#allocation22_spill] sm:$0xff] }
 0x29d   :  { %v11125_v49 = vrot.slane %v3460_v55, %v9110_v0  ;;  %v3111_v11 = vsel %vm3063_vm11, %v3097_v16, %v10974_v30  ;;  %2995 = vrot.lane.b32.xlu0 %v11119_v54, %s8701_s29  ;;  %v2927_v24 = vrot.slane %v11119_v54, 2  ;;  %v4317_v34 = vcombine.low %v3467_v7, %v3481_v63 }
 0x29e   :  { %v7896_v31 = vcombine.high %v3467_v7, %v3481_v63  ;;  %v4314_v47 = vcombine.low %v4297_v48, %v4311_v56  ;;  %v2910_v12 = vrot.slane %v11119_v54, 1  ;;  %v11134_v10 = vrot.slane %v4280_v61, %v9110_v0  ;;  %v12969_v63 = vld [vmem:[#allocation27_spill] sm:$0xff] }
 0x29f   :  { %v11137_v18 = vrot.slane %v4282_v23, %v9110_v0  ;;  %v3125_v58 = vsel %vm3077_vm12, %v3111_v11, %v11050_v15  ;;  %v11143_v30 = vsel %vm2799_vm9, %v2927_v24, %v8969_v59  ;;  %v4325_v53 = vrot.slane %v4315_v6, %v9110_v0  ;;  %v12967_v15 = vld [vmem:[#allocation19_spill] sm:$0xff]  ;;  %v11197_v11 = vpop.permute.xlu0 %3024 }
 0x2a0   :  { %5068 = vmatprep.mubr.f32.mxu1 %v4314_v47  ;;  %v3492_v32 = vcombine.low %v11081_v27, %v3125_v58  ;;  %v3493_v14 = vcombine.high %v11081_v27, %v3125_v58  ;;  %v8650_v5 = vunpack.i.h.bf16 %v12966_v46  ;;  %2955 = vrot.lane.b32.xlu1 %v11143_v30, %s8703_s1  ;;  %v3056_v19 = vsel %vm3049_vm10, %v12967_v15, %v10982_v57 }
 0x2a1   :  { %v4312_v20 = vcombine.low %v11134_v10, %v11137_v18  ;;  %v4332_v35 = vrot.slane %v4316_v21, %v9110_v0  ;;  %3034 = vrot.lane.b32.xlu0 %v2910_v12, %s8702_s9  ;;  %v4339_v17 = vrot.slane %v4317_v34, %v9110_v0  ;;  %v4346_v45 = vrot.slane %v7896_v31, %v9110_v0 }
 0x2a2   :  { %v3501_v27 = vrot.slane %v3492_v32, %v9110_v0  ;;  %v3508_v6 = vrot.slane %v3493_v14, %v9110_v0  ;;  %v3490_v57 = vcombine.high %v11122_v43, %v11122_v43  ;;  %v4382_v36 = vcombine.low %v11122_v43, %v11125_v49  ;;  %v11204_v14 = vpop.permute.xlu1 %2840 }
 0x2a3   :  { %v3070_v55 = vsel %vm3063_vm11, %v3056_v19, %v11065_v44  ;;  %5069 = vmatmul.mubr.f32.gmra.mrb[4].mxu1 %v4312_v20  ;;  %v4348_v21 = vcombine.high %v4325_v53, %v4332_v35  ;;  %v4350_v16 = vcombine.high %v4339_v17, %v4346_v45  ;;  %v3560_v61 = vcombine.high %v8969_v59, %v8969_v59  ;;  %v12972_v19 = vld [vmem:[#allocation33_spill] sm:$0xff] }
 0x2a4   :  { %v3084_v39 = vsel %vm3077_vm12, %v3070_v55, %v11016_v9  ;;  %v3523_v33 = vcombine.low %v3501_v27, %v12968_v52  ;;  %v3524_v7 = vcombine.high %v3501_v27, %v12968_v52  ;;  %v3525_v25 = vcombine.low %v3508_v6, %v12969_v63  ;;  %2850 = vrot.lane.b32.xlu1 %v11043_v22, %s8701_s29  ;;  %v12973_v52 = vld [vmem:[#allocation31_spill] sm:$0xff] }
 0x2a5   :  { %v11185_v44 = vrot.slane %v8969_v59, %v9110_v0  ;;  %v12971_v9 = vrot.slane %v12970_v1, 1  ;;  %2893 = vrot.lane.b32.xlu0 %v11119_v54, %s8702_s9  ;;  %v4364_v49 = vrot.slane %v4348_v21, %v9110_v0  ;;  %v4378_v59 = vrot.slane %v4350_v16, %v9110_v0  ;;  %v2946_v1 = vpop.permute.xlu0 %2945 }
 0x2a6   :  { %v3533_v56 = vrot.slane %v3523_v33, %v9110_v0  ;;  %v3540_v23 = vrot.slane %v3525_v25, %v9110_v0  ;;  %v3547_v43 = vrot.slane %v3524_v7, %v9110_v0  ;;  %v4349_v34 = vcombine.low %v4339_v17, %v4346_v45  ;;  %v11227_v16 = vpop.permute.xlu1 %2776 }
 0x2a7   :  { %v3098_v48 = vsel %vm3049_vm10, %v12971_v9, %v11090_v13  ;;  %v4347_v13 = vcombine.low %v4325_v53, %v4332_v35  ;;  %v3526_v31 = vcombine.high %v3508_v6, %v12969_v63  ;;  %v4381_v15 = vcombine.low %v4364_v49, %v4378_v59 }
 0x2a8   :  { %v3112_v24 = vsel %vm3063_vm11, %v3098_v48, %v8650_v5  ;;  %v3555_v47 = vcombine.high %v3533_v56, %v3533_v56  ;;  %v3557_v58 = vcombine.high %v3547_v43, %v3547_v43  ;;  %v4383_v32 = vcombine.low %v3490_v57, %v3533_v56 }
 0x2a9   :  { %v3126_v20 = vsel %vm3077_vm12, %v3112_v24, %v12972_v19  ;;  %v11209_v27 = vrot.slane %v4347_v13, %v9110_v0  ;;  %v11212_v55 = vrot.slane %v4349_v34, %v9110_v0  ;;  %v3556_v21 = vcombine.high %v3540_v23, %v3540_v23  ;;  %5073 = vmatprep.mubr.f32.mxu1 %v4381_v15 }
 0x2aa   :  { %v4384_v53 = vcombine.low %v3547_v43, %v3555_v47  ;;  %v4385_v35 = vcombine.low %v3557_v58, %v3540_v23  ;;  %v3558_v17 = vcombine.low %v3084_v39, %v3126_v20  ;;  %v11215_v6 = vrot.slane %v3560_v61, %v9110_v0 }
 0x2ab   :  { %v3559_v45 = vcombine.high %v3084_v39, %v3126_v20  ;;  %v4379_v57 = vcombine.low %v11209_v27, %v11212_v55  ;;  %v3626_v33 = vcombine.high %v12973_v52, %v12973_v52  ;;  %v11223_v7 = vrot.slane %v12973_v52, %v9110_v0  ;;  %v12974_v20 = vld [vmem:[#allocation26_spill] sm:$0xff] }
 0x2ac   :  { %v3554_v63 = vrot.slane %v3526_v31, %v9110_v0  ;;  %v3567_v25 = vrot.slane %v3558_v17, %v9110_v0  ;;  %v4392_v39 = vrot.slane %v4382_v36, %v9110_v0  ;;  %v4399_v9 = vrot.slane %v4383_v32, %v9110_v0 }
 0x2ad   :  { %v3574_v61 = vrot.slane %v3559_v45, %v9110_v0  ;;  %5074 = vmatmul.mubr.f32.gmra.mrb[6].mxu1 %v4379_v57  ;;  %v4406_v48 = vrot.slane %v4384_v53, %v9110_v0  ;;  %v4413_v49 = vrot.slane %v4385_v35, %v9110_v0  ;;  %v3977_v54 = vrot.slane %v11143_v30, %v9110_v0 }
 0x2ae   :  { %v4449_v56 = vcombine.low %v3554_v63, %v3556_v21  ;;  %v3589_v23 = vcombine.low %v3567_v25, %v11185_v44  ;;  %v3590_v43 = vcombine.high %v3567_v25, %v11185_v44  ;;  %v4415_v13 = vcombine.high %v4392_v39, %v4399_v9  ;;  %v11256_v63 = vpop.permute.xlu1 %2842  ;;  %v2988_v25 = vpop.permute.xlu0 %2987 }
 0x2af   :  { %v3591_v59 = vcombine.low %v3574_v61, %v11215_v6  ;;  %v3592_v24 = vcombine.high %v3574_v61, %v11215_v6  ;;  %v4414_v34 = vcombine.low %v4392_v39, %v4399_v9  ;;  %v4417_v47 = vcombine.high %v4406_v48, %v4413_v49  ;;  %v12976_v61 = vld [vmem:[#allocation32_spill] sm:$0xff] }
 0x2b0   :  { %v3599_v31 = vrot.slane %v3589_v23, %v9110_v0  ;;  %v3613_v36 = vrot.slane %v3590_v43, %v9110_v0  ;;  %v4416_v58 = vcombine.low %v4406_v48, %v4413_v49  ;;  %v12975_v21 = vrot.slane %v12974_v20, 1 }
 0x2b1   :  { %v11241_v32 = vrot.slane %v3591_v59, %v9110_v0  ;;  %v3620_v15 = vrot.slane %v3592_v24, %v9110_v0  ;;  %v4431_v35 = vrot.slane %v4415_v13, %v9110_v0  ;;  %v4445_v17 = vrot.slane %v4417_v47, %v9110_v0 }
 0x2b2   :  { %v3099_v53 = vsel %vm3049_vm10, %v12975_v21, %v11092_v8  ;;  %v11251_v45 = vrot.slane %v4414_v34, %v9110_v0  ;;  %v11254_v57 = vrot.slane %v4416_v58, %v9110_v0  ;;  %v4450_v52 = vcombine.low %v3599_v31, %v3613_v36  ;;  %v11275_v58 = vpop.permute.xlu1 %2885 }
 0x2b3   :  { %v3085_v39 = vsel %vm3077_vm12, %v12976_v61, %v11116_v42  ;;  %v3113_v8 = vsel %vm3063_vm11, %v3099_v53, %v11106_v29  ;;  %v7897_v9 = vcombine.high %v3599_v31, %v3613_v36  ;;  %v4452_v48 = vcombine.low %v11241_v32, %v3620_v15 }
 0x2b4   :  { %v4448_v23 = vcombine.low %v4431_v35, %v4445_v17  ;;  %v4446_v43 = vcombine.low %v11251_v45, %v11254_v57  ;;  %v4459_v49 = vrot.slane %v4449_v56, %v9110_v0  ;;  %v4466_v59 = vrot.slane %v4450_v52, %v9110_v0  ;;  %v3027_v52 = vpop.permute.xlu0 %3026 }
 0x2b5   :  { %v3057_v24 = vsel %vm3049_vm10, %v12974_v20, %v11166_v3  ;;  %v4473_v42 = vrot.slane %v7897_v9, %v9110_v0  ;;  %v4480_v13 = vrot.slane %v4452_v48, %v9110_v0  ;;  %v3127_v29 = vsel %vm3077_vm12, %v3113_v8, %v11197_v11  ;;  %v12977_v3 = vld [vmem:[#allocation29_spill] sm:$0xff] }
 0x2b6   :  { %5078 = vmatprep.mubr.f32.mxu1 %v4448_v23  ;;  %v4482_v34 = vcombine.high %v4459_v49, %v4466_v59  ;;  %v4481_v31 = vcombine.low %v4459_v49, %v4466_v59  ;;  %v3624_v36 = vcombine.low %v3085_v39, %v3127_v29  ;;  %v3625_v47 = vcombine.high %v3085_v39, %v3127_v29 }
 0x2b7   :  { %5079 = vmatmul.mubr.f32.gmra.mrb[8].mxu1 %v4446_v43  ;;  %v4484_v56 = vcombine.high %v4473_v42, %v4480_v13  ;;  %v4483_v15 = vcombine.low %v4473_v42, %v4480_v13  ;;  %v3654_v21 = vrot.slane %v3626_v33, %v9110_v0  ;;  %v3100_v20 = vsel %vm3049_vm10, %v12977_v3, %v2946_v1  ;;  %v11305_v13 = vpop.permute.xlu1 %2778 }
 0x2b8   :  { %v4498_v53 = vrot.slane %v4482_v34, %v9110_v0  ;;  %v11282_v35 = vrot.slane %v4481_v31, %v9110_v0  ;;  %v3633_v11 = vrot.slane %v3624_v36, %v9110_v0  ;;  %v3640_v17 = vrot.slane %v3625_v47, %v9110_v0 }
 0x2b9   :  { %v3071_v61 = vsel %vm3063_vm11, %v3057_v24, %v11204_v14  ;;  %v4512_v39 = vrot.slane %v4484_v56, %v9110_v0  ;;  %v11290_v33 = vrot.slane %v4483_v15, %v9110_v0  ;;  %v3114_v1 = vsel %vm3063_vm11, %v3100_v20, %v2988_v25 }
 0x2ba   :  { %v3655_v8 = vcombine.low %v3633_v11, %v11223_v7  ;;  %v3656_v9 = vcombine.high %v3633_v11, %v11223_v7  ;;  %v3657_v48 = vcombine.low %v3640_v17, %v3654_v21  ;;  %v3658_v23 = vcombine.high %v3640_v17, %v3654_v21 }
 0x2bb   :  { %v3086_v43 = vsel %vm3077_vm12, %v3071_v61, %v11148_v26  ;;  %v4515_v49 = vcombine.low %v4498_v53, %v4512_v39  ;;  %v4513_v14 = vcombine.low %v11282_v35, %v11290_v33  ;;  %v3128_v59 = vsel %vm3077_vm12, %v3114_v1, %v3027_v52  ;;  %v12978_v53 = vld [vmem:[#allocation5_spill] sm:$0xff]  ;;  %v2948_v52 = vpop.permute.xlu1 %2947 }
 0x2bc   :  { %v3622_v24 = vcombine.high %v11241_v32, %v11241_v32  ;;  %v3665_v25 = vrot.slane %v3655_v8, %v9110_v0  ;;  %v3672_v42 = vrot.slane %v3657_v48, %v9110_v0  ;;  %v3679_v7 = vrot.slane %v3656_v9, %v9110_v0  ;;  %v12979_v9 = vld [vmem:[#allocation28_spill] sm:$0xff] }
 0x2bd   :  { %5083 = vmatprep.mubr.f32.mxu1 %v4515_v49  ;;  %v3686_v26 = vrot.slane %v3658_v23, %v9110_v0  ;;  %v3690_v29 = vcombine.low %v3086_v43, %v3128_v59  ;;  %v3691_v56 = vcombine.high %v3086_v43, %v3128_v59  ;;  %v2990_v15 = vpop.permute.xlu0 %2989  ;;  %v3692_v11 = vcombine.high %v12978_v53, %v12978_v53 }
 0x2be   :  { %5084 = vmatmul.mubr.f32.gmra.mrb[10].mxu1 %v4513_v14  ;;  %v3687_v34 = vcombine.high %v3665_v25, %v3665_v25  ;;  %v3688_v31 = vcombine.high %v3672_v42, %v3672_v42  ;;  %v3689_v36 = vcombine.high %v3679_v7, %v3679_v7  ;;  %v4516_v47 = vcombine.low %v3622_v24, %v3665_v25 }
 0x2bf   :  { %v3699_v32 = vrot.slane %v3690_v29, %v9110_v0  ;;  %v3713_v17 = vrot.slane %v12978_v53, %v9110_v0  ;;  %v3058_v48 = vsel %vm3049_vm10, %v12979_v9, %v11227_v16  ;;  %v3706_v23 = vrot.slane %v3691_v56, %v9110_v0  ;;  %v12980_v29 = vld [vmem:[#allocation35_spill] sm:$0xff]  ;;  %v4103_v16 = vld [vmem:[%s12824_s3 + $0x100] sm:$0xff] }
 0x2c0   :  { %v4517_v21 = vcombine.low %v3679_v7, %v3687_v34  ;;  %v4518_v3 = vcombine.low %v3689_v36, %v3672_v42  ;;  %v4519_v20 = vcombine.low %v3686_v26, %v3688_v31  ;;  %v4526_v61 = vrot.slane %v4516_v47, %v9110_v0  ;;  %v4104_v31 = vld [vmem:[%s12824_s3 + $0x108] sm:$0xff]  ;;  %v4105_v53 = vld [vmem:[%s12824_s3 + $0x110] sm:$0xff] }
 0x2c1   :  { %v3721_v43 = vcombine.low %v3699_v32, %v3713_v17  ;;  %v3722_v49 = vcombine.high %v3699_v32, %v3713_v17  ;;  %v11321_v14 = vpop.permute.xlu0 %2887  ;;  %v3072_v7 = vsel %vm3063_vm11, %v3058_v48, %v11256_v63  ;;  %v3720_v26 = vrot.slane %v3692_v11, %v9110_v0  ;;  %v4106_v11 = vld [vmem:[%s12824_s3 + $0x118] sm:$0xff] }
 0x2c2   :  { %v4533_v39 = vrot.slane %v4517_v21, %v9110_v0  ;;  %v4540_v1 = vrot.slane %v4518_v3, %v9110_v0  ;;  %v4547_v8 = vrot.slane %v4519_v20, %v9110_v0  ;;  %v3101_v34 = vsel %vm3049_vm10, %v12980_v29, %v2948_v52  ;;  %v12981_v9 = vld [vmem:[#allocation23_spill] sm:$0xff] }
 0x2c3   :  { %v3723_v32 = vcombine.low %v3706_v23, %v3720_v26  ;;  %v3724_v21 = vcombine.high %v3706_v23, %v3720_v26  ;;  %v3731_v3 = vrot.slane %v3721_v43, %v9110_v0  ;;  %v3115_v20 = vsel %vm3063_vm11, %v3101_v34, %v2990_v15 }
 0x2c4   :  { %v4549_v59 = vcombine.high %v4526_v61, %v4533_v39  ;;  %v4551_v24 = vcombine.high %v4540_v1, %v4547_v8  ;;  %v4548_v25 = vcombine.low %v4526_v61, %v4533_v39  ;;  %v4550_v42 = vcombine.low %v4540_v1, %v4547_v8 }
 0x2c5   :  { %v3745_v17 = vrot.slane %v3722_v49, %v9110_v0  ;;  %v3029_v39 = vpop.permute.xlu0 %3028  ;;  %v8504_v1 = vpack.c.bf16 %v4104_v31, %v4103_v16  ;;  %v3087_v8 = vsel %vm3077_vm12, %v3072_v7, %v11275_v58  ;;  %v3779_v48 = vrot.slane %v12981_v9, %v9110_v0 }
 0x2c6   :  { %v4565_v36 = vrot.slane %v4549_v59, %v9110_v0  ;;  %v4579_v47 = vrot.slane %v4551_v24, %v9110_v0  ;;  %v11337_v56 = vrot.slane %v4548_v25, %v9110_v0  ;;  %v11340_v63 = vrot.slane %v4550_v42, %v9110_v0 }
 0x2c7   :  { %v3129_v15 = vsel %vm3077_vm12, %v3115_v20, %v3029_v39  ;;  %8505 = vmatpush3.bf16.msra.mxu1 %v8504_v1  ;;  %v8507_v43 = vpack.c.bf16 %v4106_v11, %v4105_v53  ;;  %v3738_v49 = vrot.slane %v3723_v32, %v9110_v0  ;;  %v3752_v59 = vrot.slane %v3724_v21, %v9110_v0 }
 0x2c8   :  { %v4582_v52 = vcombine.low %v4565_v36, %v4579_v47  ;;  %v4580_v61 = vcombine.low %v11337_v56, %v11340_v63  ;;  %v3756_v23 = vcombine.low %v3087_v8, %v3129_v15  ;;  %8506 = vmatprep.subr.bf16.mxu1 %v12956_v28  ;;  %v4246_v24 = vcombine.high %v11056_v50, %v11059_v38 }
 0x2c9   :  { %v4583_v58 = vcombine.low %v3731_v3, %v3745_v17  ;;  %v7898_v25 = vcombine.high %v3731_v3, %v3745_v17  ;;  %v4313_v7 = vcombine.high %v11134_v10, %v11137_v18  ;;  %v4380_v26 = vcombine.high %v11209_v27, %v11212_v55 }
 0x2ca   :  { %5088 = vmatprep.mubr.f32.mxu1 %v4582_v52  ;;  %v3765_v42 = vrot.slane %v3756_v23, %v9110_v0  ;;  %v4447_v29 = vcombine.high %v11251_v45, %v11254_v57  ;;  %v3754_v31 = vcombine.high %v3738_v49, %v3738_v49  ;;  %v4585_v36 = vcombine.low %v3738_v49, %v3752_v59 }
 0x2cb   :  { %5089 = vmatmul.mubr.f32.gmra.mrb[12].mxu1 %v4580_v61  ;;  %v4593_v32 = vrot.slane %v4583_v58, %v9110_v0  ;;  %v4600_v21 = vrot.slane %v7898_v25, %v9110_v0  ;;  %v2845_v25 = vpop.permute.xlu1 %2844  ;;  %v12986_v41 = vcombine.high %v11282_v35, %v11290_v33  ;;  %v12987_v60 = vcombine.high %v11337_v56, %v11340_v63 }
 0x2cc   :  { %v3787_v16 = vcombine.low %v3765_v42, %v3779_v48  ;;  %8508 = vmatpush3.bf16.msra.mxu1 %v8507_v43  ;;  %v4607_v20 = vrot.slane %v4585_v36, %v9110_v0 }
 0x2cd   :  { %v4616_v11 = vcombine.high %v4593_v32, %v4600_v21  ;;  %v4615_v17 = vcombine.low %v4593_v32, %v4600_v21  ;;  %v2950_v32 = vpop.permute.xlu0 %2949  ;;  %v3788_v21 = vcombine.high %v3765_v42, %v3779_v48 }
 0x2ce   :  { %v3797_v47 = vrot.slane %v3787_v16, %v9110_v0  ;;  %v3757_v16 = vcombine.high %v3087_v8, %v3129_v15 }
 0x2cf   :  { %v4632_v39 = vrot.slane %v4616_v11, %v9110_v0  ;;  %v11382_v23 = vrot.slane %v4615_v17, %v9110_v0  ;;  %v2781_v36 = vpop.permute.xlu1 %2780 }
 0x2d0   :  { %v4586_v3 = vcombine.low %v3754_v31, %v3797_v47  ;;  %v3758_v31 = vcombine.high %v12981_v9, %v12981_v9  ;;  %v3819_v8 = vcombine.high %v3797_v47, %v3797_v47 }
 0x2d2   :  { %v4614_v53 = vrot.slane %v4586_v3, %v9110_v0  ;;  %v3772_v3 = vrot.slane %v3757_v16, %v9110_v0 }
 0x2d3   :  { %v2847_v11 = vpop.permute.xlu1 %2846 }
 0x2d4   :  { %v4618_v52 = vcombine.high %v4607_v20, %v4614_v53  ;;  %v4617_v61 = vcombine.low %v4607_v20, %v4614_v53  ;;  %v3786_v20 = vrot.slane %v3758_v31, %v9110_v0  ;;  %v3811_v53 = vrot.slane %v3788_v21, %v9110_v0 }
 0x2d6   :  { %v4646_v1 = vrot.slane %v4618_v52, %v9110_v0  ;;  %v11385_v43 = vrot.slane %v4617_v61, %v9110_v0  ;;  %v3789_v17 = vcombine.low %v3772_v3, %v3786_v20  ;;  %v12982_v61 = vld [vmem:[#allocation34_spill] sm:$0xff]  ;;  %v3821_v15 = vcombine.high %v3811_v53, %v3811_v53 }
 0x2d7   :  { %v3790_v58 = vcombine.high %v3772_v3, %v3786_v20  ;;  %v4650_v47 = vcombine.low %v3811_v53, %v3819_v8 }
 0x2d8   :  { %v4649_v49 = vcombine.low %v4632_v39, %v4646_v1  ;;  %v4647_v59 = vcombine.low %v11382_v23, %v11385_v43  ;;  %v3059_v39 = vsel %vm3049_vm10, %v12982_v61, %v11305_v13  ;;  %v12983_v1 = vld [vmem:[#allocation36_spill] sm:$0xff]  ;;  %v3804_v42 = vrot.slane %v3789_v17, %v9110_v0 }
 0x2d9   :  { %v3102_v9 = vsel %vm3049_vm10, %v12983_v1, %v2950_v32  ;;  %v3073_v48 = vsel %vm3063_vm11, %v3059_v39, %v2845_v25  ;;  %v3845_v32 = vrot.slane %v10910_v4, %v9110_v0  ;;  %v3818_v39 = vrot.slane %v3790_v58, %v9110_v0 }
 0x2da   :  { %5093 = vmatprep.mubr.f32.mxu1 %v4649_v49  ;;  %v3088_v31 = vsel %vm3077_vm12, %v3073_v48, %v11321_v14  ;;  %v4651_v61 = vcombine.low %v3821_v15, %v3804_v42  ;;  %v3820_v1 = vcombine.high %v3804_v42, %v3804_v42  ;;  %v3824_v14 = vcombine.high %v10910_v4, %v10910_v4 }
 0x2db   :  { %5094 = vmatmul.mubr.f32.gmra.mrb[14].mxu1 %v4647_v59  ;;  %v4660_v3 = vrot.slane %v4650_v47, %v9110_v0 }
 0x2dc   :  { %v4667_v20 = vrot.slane %v4651_v61, %v9110_v0  ;;  %v4652_v53 = vcombine.low %v3818_v39, %v3820_v1 }
 0x2de   :  { %v4674_v4 = vrot.slane %v4652_v53, %v9110_v0  ;;  %v4682_v47 = vcombine.low %v4660_v3, %v4667_v20 }
 0x2e9   :  { %v2992_v52 = vpop.permute.xlu0 %2991  ;;  %v2890_v49 = vpop.permute.xlu1 %2889 }
 0x2ea   :  { %v3116_v59 = vsel %vm3063_vm11, %v3102_v9, %v2992_v52 }
 0x2ed   :  { %v3031_v16 = vpop.permute.xlu0 %3030  ;;  %v11411_v52 = vpop.permute.xlu1 %2782 }
 0x2ee   :  { %v3130_v21 = vsel %vm3077_vm12, %v3116_v59, %v3031_v16  ;;  %v3852_v59 = vrot.slane %v3824_v14, %v9110_v0  ;;  %v4683_v16 = vcombine.high %v4660_v3, %v4667_v20  ;;  %v11434_v3 = vrot.slane %v4682_v47, %v9110_v0 }
 0x2ef   :  { %v3822_v13 = vcombine.low %v3088_v31, %v3130_v21  ;;  %v3823_v17 = vcombine.high %v3088_v31, %v3130_v21 }
 0x2f0   :  { %v4699_v14 = vrot.slane %v4683_v16, %v9110_v0 }
 0x2f1   :  { %v3831_v25 = vrot.slane %v3822_v13, %v9110_v0  ;;  %v3838_v42 = vrot.slane %v3823_v17, %v9110_v0  ;;  %v2952_v31 = vpop.permute.xlu1 %2951 }
 0x2f3   :  { %v3853_v9 = vcombine.low %v3831_v25, %v3845_v32  ;;  %v3854_v28 = vcombine.high %v3831_v25, %v3845_v32  ;;  %v3855_v61 = vcombine.low %v3838_v42, %v3852_v59  ;;  %v12984_v32 = vld [vmem:[#allocation6_spill] sm:$0xff] }
 0x2f4   :  { %v3060_v1 = vsel %vm3049_vm10, %v12984_v32, %v2781_v36 }
 0x2f5   :  { %v3863_v8 = vrot.slane %v3853_v9, %v9110_v0  ;;  %v3877_v15 = vrot.slane %v3854_v28, %v9110_v0  ;;  %v2994_v48 = vpop.permute.xlu0 %2993  ;;  %v3856_v28 = vcombine.high %v3838_v42, %v3852_v59  ;;  %v3074_v17 = vsel %vm3063_vm11, %v3060_v1, %v2847_v11 }
 0x2f6   :  { %v3103_v9 = vsel %vm3049_vm10, %v10863_v37, %v2952_v31  ;;  %v3089_v20 = vsel %vm3077_vm12, %v3074_v17, %v2890_v49  ;;  %v3870_v11 = vrot.slane %v3855_v61, %v9110_v0 }
 0x2f7   :  { %v4653_v58 = vcombine.low %v3863_v8, %v3877_v15  ;;  %v3117_v34 = vsel %vm3063_vm11, %v3103_v9, %v2994_v48  ;;  %v3884_v37 = vrot.slane %v3856_v28, %v9110_v0  ;;  %v7899_v47 = vcombine.high %v3863_v8, %v3877_v15  ;;  %v2849_v8 = vpop.permute.xlu1 %2848 }
 0x2f9   :  { %v11421_v21 = vpop.permute.xlu0 %2891  ;;  %v4681_v13 = vrot.slane %v4653_v58, %v9110_v0  ;;  %v4718_v61 = vcombine.low %v3870_v11, %v3884_v37  ;;  %v4727_v9 = vrot.slane %v7899_v47, %v9110_v0 }
 0x2fb   :  { %v4685_v25 = vcombine.high %v4674_v4, %v4681_v13  ;;  %v4684_v39 = vcombine.low %v4674_v4, %v4681_v13  ;;  %v3911_v13 = vrot.slane %v11043_v22, %v9110_v0 }
 0x2fd   :  { %v3033_v53 = vpop.permute.xlu0 %3032  ;;  %v4713_v58 = vrot.slane %v4685_v25, %v9110_v0  ;;  %v11437_v36 = vrot.slane %v4684_v39, %v9110_v0  ;;  %v3886_v25 = vcombine.high %v3870_v11, %v3870_v11 }
 0x2fe   :  { %v3131_v42 = vsel %vm3077_vm12, %v3117_v34, %v3033_v53  ;;  %v3890_v34 = vcombine.high %v11043_v22, %v11043_v22  ;;  %v4734_v22 = vrot.slane %v4718_v61, %v9110_v0 }
 0x2ff   :  { %v3888_v59 = vcombine.low %v3089_v20, %v3131_v42  ;;  %v4716_v16 = vcombine.low %v4699_v14, %v4713_v58  ;;  %v4714_v48 = vcombine.low %v11434_v3, %v11437_v36  ;;  %v3889_v31 = vcombine.high %v3089_v20, %v3131_v42 }
 0x300   :  { %v4715_v4 = vcombine.high %v11434_v3, %v11437_v36  ;;  %v3918_v17 = vrot.slane %v3890_v34, %v9110_v0 }
 0x301   :  { %v3897_v49 = vrot.slane %v3888_v59, %v9110_v0  ;;  %5098 = vmatprep.mubr.f32.mxu1 %v4716_v16  ;;  %v3904_v28 = vrot.slane %v3889_v31, %v9110_v0  ;;  %v2954_v42 = vpop.permute.xlu0 %2953  ;;  %v4750_v59 = vcombine.high %v4727_v9, %v4734_v22  ;;  %v4749_v16 = vcombine.low %v4727_v9, %v4734_v22 }
 0x302   :  { %5099 = vmatmul.mubr.f32.gmra.mrb[16].mxu1 %v4714_v48 }
 0x303   :  { %v3919_v32 = vcombine.low %v3897_v49, %v3911_v13  ;;  %v3920_v1 = vcombine.high %v3897_v49, %v3911_v13  ;;  %v3921_v15 = vcombine.low %v3904_v28, %v3918_v17  ;;  %v2785_v49 = vpop.permute.xlu1 %2784  ;;  %v3922_v34 = vcombine.high %v3904_v28, %v3918_v17 }
 0x304   :  { %v3061_v17 = vsel %vm3049_vm10, %v10846_v51, %v11411_v52 }
 0x305   :  { %v3929_v39 = vrot.slane %v3919_v32, %v9110_v0  ;;  %v3943_v14 = vrot.slane %v3920_v1, %v9110_v0  ;;  %v3936_v48 = vrot.slane %v3921_v15, %v9110_v0  ;;  %v4766_v32 = vrot.slane %v4750_v59, %v9110_v0 }
 0x306   :  { %v11464_v1 = vrot.slane %v4749_v16, %v9110_v0  ;;  %v3950_v22 = vrot.slane %v3922_v34, %v9110_v0  ;;  %v3104_v15 = vsel %vm3049_vm10, %v10972_v40, %v2954_v42 }
 0x307   :  { %v3951_v53 = vcombine.high %v3929_v39, %v3929_v39  ;;  %v4719_v58 = vcombine.low %v3886_v25, %v3929_v39  ;;  %v3952_v39 = vcombine.high %v3936_v48, %v3936_v48 }
 0x309   :  { %v4720_v20 = vcombine.low %v3943_v14, %v3951_v53  ;;  %v4741_v37 = vrot.slane %v4719_v58, %v9110_v0  ;;  %v3953_v53 = vcombine.high %v3943_v14, %v3943_v14  ;;  %v3956_v14 = vcombine.high %v11143_v30, %v11143_v30 }
 0x30b   :  { %v4748_v11 = vrot.slane %v4720_v20, %v9110_v0  ;;  %v4784_v52 = vcombine.low %v3953_v53, %v3936_v48 }
 0x30d   :  { %v4752_v31 = vcombine.high %v4741_v37, %v4748_v11  ;;  %v4751_v13 = vcombine.low %v4741_v37, %v4748_v11  ;;  %v3075_v37 = vsel %vm3063_vm11, %v3061_v17, %v2849_v8  ;;  %v4794_v30 = vrot.slane %v4784_v52, %v9110_v0 }
 0x30e   :  { %v3090_v51 = vsel %vm3077_vm12, %v3075_v37, %v11421_v21  ;;  %v3984_v21 = vrot.slane %v3956_v14, %v9110_v0 }
 0x30f   :  { %v2996_v47 = vpop.permute.xlu0 %2995  ;;  %v4780_v61 = vrot.slane %v4752_v31, %v9110_v0  ;;  %v11467_v25 = vrot.slane %v4751_v13, %v9110_v0  ;;  %v4785_v31 = vcombine.low %v3950_v22, %v3952_v39 }
 0x310   :  { %v3118_v11 = vsel %vm3063_vm11, %v3104_v15, %v2996_v47 }
 0x311   :  { %v4783_v9 = vcombine.low %v4766_v32, %v4780_v61  ;;  %v4781_v58 = vcombine.low %v11464_v1, %v11467_v25  ;;  %v4782_v28 = vcombine.high %v11464_v1, %v11467_v25  ;;  %v4801_v39 = vrot.slane %v4785_v31, %v9110_v0 }
 0x312   :  { %v2956_v20 = vpop.permute.xlu1 %2955 }
 0x313   :  { %v3105_v59 = vsel %vm3049_vm10, %v2910_v12, %v2956_v20  ;;  %v3035_v16 = vpop.permute.xlu0 %3034  ;;  %5103 = vmatprep.mubr.f32.mxu1 %v4783_v9  ;;  %v3062_v12 = vsel %vm3049_vm10, %v10960_v2, %v2785_v49 }
 0x314   :  { %v3132_v40 = vsel %vm3077_vm12, %v3118_v11, %v3035_v16  ;;  %5104 = vmatmul.mubr.f32.gmra.mrb[18].mxu1 %v4781_v58  ;;  %v3119_v8 = vsel %vm3063_vm11, %v3105_v59, %v8650_v5  ;;  %v4817_v16 = vcombine.high %v4794_v30, %v4801_v39 }
 0x315   :  { %v3954_v42 = vcombine.low %v3090_v51, %v3132_v40  ;;  %v3955_v13 = vcombine.high %v3090_v51, %v3132_v40  ;;  %v3133_v61 = vsel %vm3077_vm12, %v3119_v8, %v12972_v19 }
 0x316   :  { %v2851_v34 = vpop.permute.xlu1 %2850 }
 0x317   :  { %v3963_v48 = vrot.slane %v3954_v42, %v9110_v0  ;;  %v3970_v47 = vrot.slane %v3955_v13, %v9110_v0  ;;  %v3076_v32 = vsel %vm3063_vm11, %v3062_v12, %v2851_v34  ;;  %v2894_v46 = vpop.permute.xlu0 %2893 }
 0x318   :  { %v3091_v5 = vsel %vm3077_vm12, %v3076_v32, %v2894_v46  ;;  %v4833_v32 = vrot.slane %v4817_v16, %v9110_v0 }
 0x319   :  { %v3985_v2 = vcombine.low %v3963_v48, %v3977_v54  ;;  %v3986_v49 = vcombine.high %v3963_v48, %v3977_v54  ;;  %v3987_v53 = vcombine.low %v3970_v47, %v3984_v21  ;;  %v3988_v9 = vcombine.high %v3970_v47, %v3984_v21 }
 0x31a   :  { %v4020_v58 = vcombine.low %v3091_v5, %v3133_v61  ;;  %v4021_v17 = vcombine.high %v3091_v5, %v3133_v61  ;;  %v4816_v54 = vcombine.low %v4794_v30, %v4801_v39 }
 0x31b   :  { %v3995_v22 = vrot.slane %v3985_v2, %v9110_v0  ;;  %v4002_v15 = vrot.slane %v3987_v53, %v9110_v0  ;;  %v4009_v20 = vrot.slane %v3986_v49, %v9110_v0  ;;  %v4016_v14 = vrot.slane %v3988_v9, %v9110_v0 }
 0x31c   :  { %v4028_v19 = vrot.slane %v4020_v58, %v9110_v0  ;;  %v4035_v37 = vrot.slane %v4021_v17, %v9110_v0  ;;  %v4826_v30 = vrot.slane %v4816_v54, %v9110_v0 }
 0x31d   :  { %v4786_v11 = vcombine.low %v3995_v22, %v4009_v20  ;;  %v7900_v59 = vcombine.high %v3995_v22, %v4009_v20  ;;  %v4851_v8 = vcombine.low %v4002_v15, %v4016_v14  ;;  %v4018_v12 = vcombine.high %v4002_v15, %v4002_v15 }
 0x31e   :  { %v4036_v51 = vcombine.low %v4028_v19, %v11185_v44  ;;  %v4037_v52 = vcombine.high %v4028_v19, %v11185_v44  ;;  %v4038_v31 = vcombine.low %v4035_v37, %v11215_v6  ;;  %v4039_v40 = vcombine.high %v4035_v37, %v11215_v6 }
 0x31f   :  { %v4808_v42 = vrot.slane %v4786_v11, %v9110_v0  ;;  %v4815_v13 = vrot.slane %v7900_v59, %v9110_v0  ;;  %v4861_v53 = vrot.slane %v4851_v8, %v9110_v0 }
 0x320   :  { %v4046_v34 = vrot.slane %v4036_v51, %v9110_v0  ;;  %v4053_v21 = vrot.slane %v4038_v31, %v9110_v0  ;;  %v4060_v48 = vrot.slane %v4037_v52, %v9110_v0  ;;  %v4067_v47 = vrot.slane %v4039_v40, %v9110_v0 }
 0x321   :  { %v4819_v44 = vcombine.high %v4808_v42, %v4815_v13  ;;  %v4818_v46 = vcombine.low %v4808_v42, %v4815_v13 }
 0x322   :  { %v4068_v6 = vcombine.high %v4046_v34, %v4046_v34  ;;  %v4069_v5 = vcombine.high %v4053_v21, %v4053_v21  ;;  %v4070_v61 = vcombine.high %v4060_v48, %v4060_v48  ;;  %v4852_v2 = vcombine.low %v4018_v12, %v4046_v34 }
 0x323   :  { %v4847_v49 = vrot.slane %v4819_v44, %v9110_v0  ;;  %v4840_v39 = vrot.slane %v4818_v46, %v9110_v0 }
 0x324   :  { %v4853_v9 = vcombine.low %v4060_v48, %v4068_v6  ;;  %v4854_v58 = vcombine.low %v4070_v61, %v4053_v21  ;;  %v4868_v17 = vrot.slane %v4852_v2, %v9110_v0  ;;  %v4918_v22 = vcombine.low %v4067_v47, %v4069_v5 }
 0x325   :  { %v4850_v15 = vcombine.low %v4833_v32, %v4847_v49  ;;  %v4848_v20 = vcombine.low %v4826_v30, %v4840_v39  ;;  %v4849_v14 = vcombine.high %v4826_v30, %v4840_v39  ;;  %v12985_v48 = vmov 0.0  }
 0x326   :  { %v4875_v19 = vrot.slane %v4853_v9, %v9110_v0  ;;  %v4882_v37 = vrot.slane %v4854_v58, %v9110_v0  ;;  %v4884_v11 = vcombine.high %v4861_v53, %v4868_v17  ;;  %v4883_v59 = vcombine.low %v4861_v53, %v4868_v17 }
 0x327   :  { %5108 = vmatprep.mubr.f32.mxu1 %v4850_v15  ;;  %v4925_v16 = vrot.slane %v4918_v22, %v9110_v0  ;;  %v11626_v22 = vld [vmem:[%s12825_s4] ss:$0 sm:$0xff] }
 0x328   :  { %5109 = vmatmul.mubr.f32.gmra.mrb[20].mxu1 %v4848_v20  ;;  %v4886_v51 = vcombine.high %v4875_v19, %v4882_v37  ;;  %v4885_v52 = vcombine.low %v4875_v19, %v4882_v37  ;;  %v4900_v31 = vrot.slane %v4884_v11, %v9110_v0  ;;  %v4893_v8 = vrot.slane %v4883_v59, %v9110_v0  ;;  %v7573_v37 = vld [vmem:[%s12826_s5 + $0x380] sm:$0xff]  ;;  %v7574_v11 = vld [vmem:[%s12826_s5 + $0x388] sm:$0xff] }
 0x329   :  { %v4926_v13 = vcombine.high %v4925_v16, %v4925_v16  ;;  %v4933_v21 = vrot.slane %v4925_v16, %v9110_v0  ;;  %v7557_v59 = vld [vmem:[%s12826_s5 + $0x300] sm:$0xff] }
 0x32a   :  { %v4914_v40 = vrot.slane %v4886_v51, %v9110_v0  ;;  %v4907_v42 = vrot.slane %v4885_v52, %v9110_v0  ;;  %v8605_v52 = vpack.c.bf16 %v7574_v11, %v7573_v37 }
 0x32b   :  { %v4940_v34 = vrot.slane %v4926_v13, %v9110_v0  ;;  %v4941_v27 = vcombine.high %v4933_v21, %v4933_v21 }
 0x32c   :  { %v4917_v54 = vcombine.low %v4900_v31, %v4914_v40  ;;  %v4915_v12 = vcombine.low %v4893_v8, %v4907_v42  ;;  %v4916_v10 = vcombine.high %v4893_v8, %v4907_v42  ;;  %v7558_v31 = vld [vmem:[%s12826_s5 + $0x308] sm:$0xff]  ;;  %8606 = vmatprep.subr.bf16.mxu0 %v8605_v52 }
 0x32d   :  { %v8607_v40 = vpack.c.bf16 %v7558_v31, %v7557_v59 }
 0x32e   :  { %5113 = vmatprep.mubr.f32.mxu1 %v4917_v54 }
 0x32f   :  { %5114 = vmatmul.mubr.f32.gmra.mrb[22].mxu1 %v4915_v12  ;;  %8608 = vmatpush3.bf16.msra.mxu0 %v8607_v40 }
 0x330   :  { %5118 = vmatprep.mubr.f32.mxu1 %v4940_v34 }
 0x333   :  { %5119 = vmatmul.mubr.f32.gmra.mrb[24].mxu1 %v4933_v21 }
 0x334   :  { %8408 = vmatprep.mubr.msk.f32.mxu1 %vm8699_vm0, %v12985_v48 }
 0x337   :  { %8409 = vmatmul.mubr.msk.f32.vlgmr.msra.gmra.mrb[26].mxu1 %vm3049_vm10, %v4179_v62  ;;  %v12988_v62 = vcombine.high %v11382_v23, %v11385_v43 }
 0x338   :  { %8411 = vmatprep.mubr.msk.f32.mxu1 %vm8699_vm0, %v12985_v48 }
 0x33b   :  { %8412 = vmatmul.mubr.msk.f32.gmra.mrb[28].mxu1 %vm3049_vm10, %v4246_v24 }
 0x33c   :  { %8414 = vmatprep.mubr.msk.f32.mxu1 %vm8699_vm0, %v12985_v48 }
 0x33f   :  { %8415 = vmatmul.mubr.msk.f32.gmra.mrb[30].mxu1 %vm3049_vm10, %v4313_v7 }
 0x340   :  { %8417 = vmatprep.mubr.msk.f32.mxu1 %vm8699_vm0, %v12985_v48 }
 0x343   :  { %8418 = vmatmul.mubr.msk.f32.gmra.mrb[32].mxu1 %vm3049_vm10, %v4380_v26 }
 0x344   :  { %8420 = vmatprep.mubr.msk.f32.mxu1 %vm8699_vm0, %v12985_v48 }
 0x347   :  { %8421 = vmatmul.mubr.msk.f32.gmra.mrb[34].mxu1 %vm3049_vm10, %v4447_v29 }
 0x348   :  { %8423 = vmatprep.mubr.msk.f32.mxu1 %vm8699_vm0, %v12985_v48 }
 0x34b   :  { %8424 = vmatmul.mubr.msk.f32.gmra.mrb[36].mxu1 %vm3049_vm10, %v12986_v41 }
 0x34c   :  { %8426 = vmatprep.mubr.msk.f32.mxu1 %vm8699_vm0, %v12985_v48 }
 0x34f   :  { %8427 = vmatmul.mubr.msk.f32.gmra.mrb[38].mxu1 %vm3049_vm10, %v12987_v60 }
 0x350   :  { %8429 = vmatprep.mubr.msk.f32.mxu1 %vm8699_vm0, %v12985_v48 }
 0x353   :  { %8430 = vmatmul.mubr.msk.f32.gmra.mrb[40].mxu1 %vm3049_vm10, %v12988_v62 }
 0x354   :  { %8432 = vmatprep.mubr.msk.f32.mxu1 %vm8699_vm0, %v12985_v48 }
 0x357   :  { %8433 = vmatmul.mubr.msk.f32.gmra.mrb[42].mxu1 %vm3049_vm10, %v4715_v4 }
 0x358   :  { %8435 = vmatprep.mubr.msk.f32.mxu1 %vm8699_vm0, %v12985_v48 }
 0x35b   :  { %8436 = vmatmul.mubr.msk.f32.gmra.mrb[44].mxu1 %vm3049_vm10, %v4782_v28 }
 0x35c   :  { %8438 = vmatprep.mubr.msk.f32.mxu1 %vm8699_vm0, %v12985_v48 }
 0x35f   :  { %8439 = vmatmul.mubr.msk.f32.gmra.mrb[46].mxu1 %vm3049_vm10, %v4849_v14  ;;  %v8025_v50 = vpop.f32.mrb[0].mxu1 }
 0x360   :  { %8441 = vmatprep.mubr.msk.f32.mxu1 %vm8699_vm0, %v12985_v48  ;;  %v8026_v38 = vpop.f32.mrb[1].mxu1 }
 0x361   :  { %v8027_v18 = vadd.f32 %v8026_v38, %v8025_v50 }
 0x363   :  { %8442 = vmatmul.mubr.msk.f32.gmra.mrb[48].mxu1 %vm3049_vm10, %v4916_v10  ;;  %v5061_v14 = vadd.f32 %v8027_v18, %v11626_v22 }
 0x364   :  { %8444 = vmatprep.mubr.msk.f32.mxu1 %vm8699_vm0, %v12985_v48  ;;  %vm7876_vm0 = vcmask 74752  }
 0x367   :  { %8445 = vmatmul.mubr.msk.f32.gmra.mrb[50].mxu1 %vm3049_vm10, %v4941_v27 }
 0x369   :  { %v8028_v55 = vpop.f32.mrb[2].mxu1 }
 0x36a   :  { %v8029_v45 = vpop.f32.mrb[3].mxu1 }
 0x36b   :  { %v8030_v57 = vadd.f32 %v8029_v45, %v8028_v55 }
 0x36d   :  { %v5066_v42 = vadd.f32 %v8030_v57, %v11626_v22 }
 0x376   :  { %v8031_v35 = vpop.f32.mrb[4].mxu1 }
 0x377   :  { %v8032_v33 = vpop.f32.mrb[5].mxu1 }
 0x378   :  { %v8033_v56 = vadd.f32 %v8032_v33, %v8031_v35 }
 0x37a   :  { %v5071_v62 = vadd.f32 %v8033_v56, %v11626_v22 }
 0x380   :  { %v8034_v63 = vpop.f32.mrb[6].mxu1 }
 0x381   :  { %v8035_v24 = vpop.f32.mrb[7].mxu1 }
 0x382   :  { %v11605_v7 = vadd.f32 %v8035_v24, %v8034_v63 }
 0x38a   :  { %v8037_v26 = vpop.f32.mrb[8].mxu1 }
 0x38b   :  { %v8038_v29 = vpop.f32.mrb[9].mxu1 }
 0x38c   :  { %v11607_v23 = vadd.f32 %v8038_v29, %v8037_v26 }
 0x391   :  { %v8040_v43 = vpop.f32.mrb[10].mxu1 }
 0x392   :  { %v8041_v3 = vpop.f32.mrb[11].mxu1 }
 0x393   :  { %v11609_v36 = vadd.f32 %v8041_v3, %v8040_v43  ;;  %v5076_v43 = vadd.f32 %v11605_v7, %v11626_v22 }
 0x39e   :  { %v8043_v4 = vpop.f32.mrb[12].mxu1 }
 0x39f   :  { %v8044_v1 = vpop.f32.mrb[13].mxu1 }
 0x3a0   :  { %v11611_v25 = vadd.f32 %v8044_v1, %v8043_v4 }
 0x3ae   :  { %v8046_v28 = vpop.f32.mrb[14].mxu1 }
 0x3af   :  { %v8047_v47 = vpop.f32.mrb[15].mxu1 }
 0x3b0   :  { %v11613_v44 = vadd.f32 %v8047_v47, %v8046_v28  ;;  %v5081_v47 = vadd.f32 %v11607_v23, %v11626_v22 }
 0x3b2   :  { %v11671_v7 = vadd.f32 %v11613_v44, %v11626_v22 }
 0x3d5   :  { %v8049_v32 = vpop.f32.mrb[16].mxu1 }
 0x3d6   :  { %v8050_v46 = vpop.f32.mrb[17].mxu1 }
 0x3d7   :  { %v11615_v6 = vadd.f32 %v8050_v46, %v8049_v32  ;;  %v11663_v32 = vadd.f32 %v11609_v36, %v11626_v22 }
 0x3d9   :  { %v11678_v36 = vadd.f32 %v11615_v6, %v11626_v22 }
 0x3e7   :  { %v8052_v5 = vpop.f32.mrb[18].mxu1 }
 0x3e8   :  { %v8053_v61 = vpop.f32.mrb[19].mxu1 }
 0x3e9   :  { %v11617_v2 = vadd.f32 %v8053_v61, %v8052_v5  ;;  %v11667_v61 = vadd.f32 %v11611_v25, %v11626_v22 }
 0x3eb   :  { %v11684_v44 = vadd.f32 %v11617_v2, %v11626_v22 }
 0x3fb   :  { %v8055_v49 = vpop.f32.mrb[20].mxu1 }
 0x3fc   :  { %v8056_v30 = vpop.f32.mrb[21].mxu1 }
 0x3fd   :  { %v11619_v39 = vadd.f32 %v8056_v30, %v8055_v49 }
 0x3ff   :  { %v11690_v6 = vadd.f32 %v11619_v39, %v11626_v22 }
 0x402   :  { %v8058_v53 = vpop.f32.mrb[22].mxu1 }
 0x403   :  { %v8059_v9 = vpop.f32.mrb[23].mxu1 }
 0x404   :  { %v11621_v58 = vadd.f32 %v8059_v9, %v8058_v53 }
 0x406   :  { %v8061_v17 = vpop.f32.mrb[24].mxu1 }
 0x407   :  { %v8062_v15 = vpop.f32.mrb[25].mxu1 }
 0x408   :  { %v11628_v20 = vadd.f32 %v8062_v15, %v8061_v17 }
 0x40a   :  { %v5190_v19 = vpop.f32.mrb[26].mxu1  ;;  %v11700_v2 = vadd.f32 %v11628_v20, %v11626_v22 }
 0x40b   :  { %v5191_v16 = vadd.f32 %v5190_v19, %v5061_v14  ;;  %v8410_v51 = vpop.f32.mrb[27].mxu1 }
 0x40d   :  { %v5254_v8 = vmax.f32 %v5191_v16, 0.0  ;;  %v11696_v16 = vadd.f32 %v11621_v58, %v11626_v22 }
 0x40e   :  { %v5195_v13 = vpop.f32.mrb[28].mxu1 }
 0x40f   :  { %v5280_v54 = vcombine.high %v5254_v8, %v5254_v8  ;;  %v5287_v12 = vrot.slane %v5254_v8, %v9110_v0  ;;  %v5196_v34 = vadd.f32 %v5195_v13, %v5066_v42  ;;  %v8413_v21 = vpop.f32.mrb[29].mxu1 }
 0x411   :  { %v5294_v48 = vrot.slane %v5280_v54, %v9110_v0  ;;  %v5295_v41 = vcombine.high %v5287_v12, %v5287_v12  ;;  %v5255_v60 = vmax.f32 %v5196_v34, 0.0  ;;  %v5303_v10 = vrot.slane %v5287_v12, %v9110_v0 }
 0x412   :  { %v5200_v50 = vpop.f32.mrb[30].mxu1 }
 0x413   :  { %v5296_v38 = vcombine.high %v5294_v48, %v5294_v48  ;;  %v5317_v18 = vrot.slane %v5295_v41, %v9110_v0  ;;  %v8416_v27 = vpop.f32.mrb[31].mxu1  ;;  %v5329_v55 = vcombine.high %v5255_v60, %v5255_v60  ;;  %v5336_v45 = vrot.slane %v5255_v60, %v9110_v0 }
 0x414   :  { %v5201_v57 = vadd.f32 %v5200_v50, %v5071_v62  ;;  %v5310_v35 = vrot.slane %v5294_v48, %v9110_v0  ;;  %v5325_v46 = vcombine.high %v5303_v10, %v5303_v10 }
 0x415   :  { %v5324_v33 = vrot.slane %v5296_v38, %v9110_v0  ;;  %v11652_v63 = vcombine.high %v5317_v18, %v5317_v18  ;;  %v5890_v24 = vcombine.low %v5303_v10, %v5317_v18  ;;  %v5343_v56 = vrot.slane %v5329_v55, %v9110_v0 }
 0x416   :  { %v5344_v26 = vcombine.high %v5336_v45, %v5336_v45  ;;  %v5352_v29 = vrot.slane %v5336_v45, %v9110_v0  ;;  %v5205_v3 = vpop.f32.mrb[32].mxu1  ;;  %v11692_v11 = vcombine.low %v5317_v18, %v5325_v46  ;;  %v5326_v51 = vcombine.high %v5310_v35, %v5310_v35 }
 0x417   :  { %v5328_v4 = vcombine.high %v5324_v33, %v5324_v33  ;;  %v6096_v1 = vcombine.low %v11652_v63, %v5310_v35  ;;  %v8419_v28 = vpop.f32.mrb[33].mxu1  ;;  %v5345_v5 = vcombine.high %v5343_v56, %v5343_v56  ;;  %v6110_v30 = vrot.slane %v5324_v33, %v9110_v0 }
 0x418   :  { %v5366_v23 = vrot.slane %v5344_v26, %v9110_v0  ;;  %v5359_v53 = vrot.slane %v5343_v56, %v9110_v0  ;;  %v5374_v9 = vcombine.high %v5352_v29, %v5352_v29  ;;  %v11703_v52 = vrot.slane %v5890_v24, %v9110_v0 }
 0x419   :  { %v6103_v49 = vrot.slane %v6096_v1, %v9110_v0  ;;  %v5373_v25 = vrot.slane %v5345_v5, %v9110_v0  ;;  %v5905_v14 = vcombine.low %v5328_v4, %v5352_v29  ;;  %v5991_v22 = vrot.slane %v11652_v63, %v9110_v0 }
 0x41a   :  { %v5210_v17 = vpop.f32.mrb[34].mxu1  ;;  %v6000_v19 = vcombine.low %v5352_v29, %v5366_v23  ;;  %v7915_v59 = vcombine.high %v5352_v29, %v5366_v23  ;;  %v6014_v40 = vrot.slane %v5374_v9, %v9110_v0  ;;  %v6133_v42 = vrot.slane %v5359_v53, %v9110_v0 }
 0x41b   :  { %v11686_v15 = vcombine.low %v6103_v49, %v6110_v30  ;;  %v8422_v37 = vpop.f32.mrb[35].mxu1  ;;  %v5912_v31 = vrot.slane %v5905_v14, %v9110_v0  ;;  %v6229_v58 = vcombine.low %v5359_v53, %v5373_v25  ;;  %v7917_v54 = vcombine.high %v5359_v53, %v5373_v25 }
 0x41c   :  { %v6007_v39 = vrot.slane %v6000_v19, %v9110_v0  ;;  %v6126_v8 = vrot.slane %v7915_v59, %v9110_v0  ;;  %v5256_v12 = vmax.f32 %v5201_v57, 0.0  ;;  %v5984_v21 = vrot.slane %v11692_v11, %v9110_v0 }
 0x41d   :  { %v5919_v20 = vrot.slane %v5912_v31, %v9110_v0  ;;  %v5206_v60 = vadd.f32 %v5205_v3, %v5076_v43  ;;  %v5904_v62 = vrot.slane %v11703_v52, %v9110_v0  ;;  %v11721_v50 = vcombine.low %v5324_v33, %v5326_v51 }
 0x41e   :  { %v11710_v13 = vpop.f32.mrb[36].mxu1  ;;  %v6015_v48 = vcombine.low %v6007_v39, %v6014_v40  ;;  %v11717_v41 = vcombine.low %v6126_v8, %v6133_v42  ;;  %v6307_v38 = vrot.slane %v7917_v54, %v9110_v0  ;;  %v5378_v10 = vcombine.high %v5256_v12, %v5256_v12 }
 0x41f   :  { %v8425_v34 = vpop.f32.mrb[37].mxu1  ;;  %v6236_v18 = vrot.slane %v6229_v58, %v9110_v0  ;;  %v5377_v27 = vcombine.high %v5373_v25, %v5373_v25  ;;  %v5385_v55 = vrot.slane %v5256_v12, %v9110_v0  ;;  %v5257_v45 = vmax.f32 %v5206_v60, 0.0 }
 0x420   :  { %v11729_v35 = vsel %vm5954_vm13, %v5919_v20, 0.0  ;;  %v6314_v63 = vrot.slane %v6307_v38, %v9110_v0  ;;  %v5392_v24 = vrot.slane %v5378_v10, %v9110_v0  ;;  %v11733_v33 = vadd.f32 %v5210_v17, %v5081_v47 }
 0x421   :  { %v6022_v26 = vrot.slane %v6015_v48, %v9110_v0  ;;  %v5393_v29 = vcombine.high %v5385_v55, %v5385_v55  ;;  %v5401_v43 = vrot.slane %v5385_v55, %v9110_v0  ;;  %v5427_v3 = vcombine.high %v5257_v45, %v5257_v45 }
 0x422   :  { %v11726_v57 = vpop.f32.mrb[38].mxu1  ;;  %v6364_v4 = vsel %vm5954_vm13, %v6314_v63, 0.0  ;;  %v5394_v1 = vcombine.high %v5392_v24, %v5392_v24  ;;  %v5408_v28 = vrot.slane %v5392_v24, %v9110_v0  ;;  %v5434_v46 = vrot.slane %v5257_v45, %v9110_v0 }
 0x423   :  { %v8428_v56 = vpop.f32.mrb[39].mxu1  ;;  %v11741_v5 = vadd.f32 %v6364_v4, %v11729_v35  ;;  %v5415_v47 = vrot.slane %v5393_v29, %v9110_v0  ;;  %v5423_v49 = vcombine.high %v5401_v43, %v5401_v43  ;;  %v6388_v30 = vcombine.low %v5377_v27, %v5401_v43 }
 0x424   :  { %v5422_v53 = vrot.slane %v5394_v1, %v9110_v0  ;;  %v5424_v25 = vcombine.high %v5408_v28, %v5408_v28  ;;  %v5441_v9 = vrot.slane %v5427_v3, %v9110_v0  ;;  %v5442_v17 = vcombine.high %v5434_v46, %v5434_v46 }
 0x425   :  { %12989 = vst [vmem:[#allocation7_spill] sm:$0xff] %v11741_v5  ;;  %v5425_v19 = vcombine.high %v5415_v47, %v5415_v47  ;;  %v6395_v37 = vrot.slane %v6388_v30, %v9110_v0  ;;  %v6402_v11 = vrot.slane %v5415_v47, %v9110_v0  ;;  %v6508_v59 = vcombine.low %v5415_v47, %v5423_v49 }
 0x426   :  { %v11744_v23 = vpop.f32.mrb[40].mxu1  ;;  %v6315_v51 = vcombine.low %v5422_v53, %v5424_v25  ;;  %v7919_v31 = vcombine.high %v5408_v28, %v5422_v53  ;;  %v5443_v39 = vcombine.high %v5441_v9, %v5441_v9  ;;  %v5450_v40 = vrot.slane %v5434_v46, %v9110_v0 }
 0x427   :  { %v8431_v14 = vpop.f32.mrb[41].mxu1  ;;  %v6403_v8 = vcombine.low %v6395_v37, %v6402_v11  ;;  %v6515_v42 = vrot.slane %v6508_v59, %v9110_v0  ;;  %v6522_v58 = vrot.slane %v5425_v19, %v9110_v0  ;;  %v6628_v20 = vcombine.low %v5425_v19, %v5408_v28 }
 0x428   :  { %v6243_v12 = vrot.slane %v6236_v18, %v9110_v0  ;;  %v6418_v34 = vrot.slane %v7919_v31, %v9110_v0  ;;  %v5457_v48 = vrot.slane %v5441_v9, %v9110_v0  ;;  %v5464_v60 = vrot.slane %v5442_v17, %v9110_v0 }
 0x429   :  { %v11759_v10 = vcombine.low %v5984_v21, %v5991_v22  ;;  %v6410_v27 = vrot.slane %v6403_v8, %v9110_v0  ;;  %v11762_v55 = vcombine.low %v6515_v42, %v6522_v58  ;;  %v6635_v45 = vrot.slane %v6628_v20, %v9110_v0 }
 0x42a   :  { %v11753_v54 = vpop.f32.mrb[42].mxu1  ;;  %v5471_v63 = vrot.slane %v5443_v39, %v9110_v0  ;;  %v5472_v24 = vcombine.high %v5450_v40, %v5450_v40  ;;  %v5473_v56 = vcombine.high %v5457_v48, %v5457_v48  ;;  %v6425_v18 = vrot.slane %v5450_v40, %v9110_v0 }
 0x42b   :  { %v8434_v38 = vpop.f32.mrb[43].mxu1  ;;  %v11768_v29 = vsel %vm6073_vm14, %v6022_v26, 0.0  ;;  %v6484_v43 = vsel %vm6073_vm14, %v6410_v27, 0.0  ;;  %v6642_v22 = vrot.slane %v6635_v45, %v9110_v0  ;;  %v6531_v21 = vcombine.low %v5450_v40, %v5464_v60 }
 0x42c   :  { %v11775_v4 = vsel %vm5954_vm13, %v6243_v12, 0.0  ;;  %v6322_v1 = vrot.slane %v6315_v51, %v9110_v0  ;;  %v11779_v28 = vadd.f32 %v6484_v43, %v11768_v29  ;;  %v6426_v46 = vcombine.low %v6418_v34, %v6425_v18 }
 0x42d   :  { %v6692_v26 = vsel %vm5954_vm13, %v6642_v22, 0.0  ;;  %v6538_v49 = vrot.slane %v6531_v21, %v9110_v0  ;;  %v6545_v30 = vrot.slane %v5472_v24, %v9110_v0  ;;  %v7921_v53 = vcombine.high %v5450_v40, %v5464_v60 }
 0x42e   :  { %v11772_v3 = vpop.f32.mrb[44].mxu1  ;;  %v6221_v25 = vrot.slane %v11721_v50, %v9110_v0  ;;  %v6693_v9 = vadd.f32 %v6692_v26, %v11775_v4  ;;  %v6716_v17 = vcombine.low %v5457_v48, %v5471_v63  ;;  %v6804_v14 = vcombine.low %v5471_v63, %v5473_v56 }
 0x42f   :  { %v8437_v47 = vpop.f32.mrb[45].mxu1  ;;  %v6546_v19 = vcombine.low %v6538_v49, %v6545_v30  ;;  %v6650_v37 = vrot.slane %v7921_v53, %v9110_v0  ;;  %v5258_v11 = vmax.f32 %v11733_v33, 0.0  ;;  %v5475_v59 = vcombine.high %v5471_v63, %v5471_v63 }
 0x430   :  { %v6329_v31 = vrot.slane %v6322_v1, %v9110_v0  ;;  %v6723_v39 = vrot.slane %v6716_v17, %v9110_v0  ;;  %v6811_v40 = vrot.slane %v6804_v14, %v9110_v0  ;;  %v5216_v8 = vadd.f32 %v11710_v13, %v11663_v32 }
 0x431   :  { %v6433_v58 = vrot.slane %v6426_v46, %v9110_v0  ;;  %v6657_v20 = vrot.slane %v6650_v37, %v9110_v0  ;;  %v5476_v12 = vcombine.high %v5258_v11, %v5258_v11  ;;  %v5483_v33 = vrot.slane %v5258_v11, %v9110_v0 }
 0x432   :  { %v11789_v51 = vpop.f32.mrb[46].mxu1  ;;  %v6730_v34 = vrot.slane %v6723_v39, %v9110_v0  ;;  %v6818_v48 = vrot.slane %v5475_v59, %v9110_v0  ;;  %v5259_v60 = vmax.f32 %v5216_v8, 0.0  ;;  %v11803_v38 = vadd.f32 %v11726_v57, %v11667_v61 }
 0x433   :  { %v8440_v42 = vpop.f32.mrb[47].mxu1  ;;  %v6694_v27 = vsel %vm5954_vm13, %v6657_v20, 0.0  ;;  %v5490_v32 = vrot.slane %v5476_v12, %v9110_v0  ;;  %v5491_v13 = vcombine.high %v5483_v33, %v5483_v33  ;;  %v5499_v45 = vrot.slane %v5483_v33, %v9110_v0 }
 0x434   :  { %v11811_v24 = vsel %vm5954_vm13, %v6329_v31, 0.0  ;;  %v11813_v56 = vadd.f32 %v6694_v27, %v6693_v9  ;;  %v6780_v18 = vsel %vm5954_vm13, %v6730_v34, 0.0  ;;  %v6819_v43 = vcombine.low %v6811_v40, %v6818_v48 }
 0x435   :  { %12990 = vst [vmem:[#allocation9_spill] sm:$0xff] %v11811_v24  ;;  %v11817_v61 = vadd.f32 %v6780_v18, %v11811_v24  ;;  %v5492_v57 = vcombine.high %v5490_v32, %v5490_v32  ;;  %v5513_v21 = vrot.slane %v5491_v13, %v9110_v0  ;;  %v11821_v1 = vsel %vm6073_vm14, %v6433_v58, 0.0 }
 0x436   :  { %v11808_v63 = vpop.f32.mrb[48].mxu1  ;;  %v5521_v46 = vcombine.high %v5499_v45, %v5499_v45  ;;  %v6826_v47 = vrot.slane %v6819_v43, %v9110_v0  ;;  %v6924_v26 = vcombine.low %v5475_v59, %v5499_v45  ;;  %v5525_v49 = vcombine.high %v5259_v60, %v5259_v60 }
 0x437   :  { %v8443_v22 = vpop.f32.mrb[49].mxu1  ;;  %12991 = vst [vmem:[#allocation10_spill] sm:$0xff] %v11817_v61  ;;  %v11825_v30 = vrot.slane %v5490_v32, %v9110_v0  ;;  %v11828_v53 = vrot.slane %v5492_v57, %v9110_v0  ;;  %v5523_v9 = vcombine.high %v5513_v21, %v5513_v21  ;;  %v6938_v17 = vrot.slane %v5513_v21, %v9110_v0 }
 0x438   :  { %v6900_v37 = vsel %vm6073_vm14, %v6826_v47, 0.0  ;;  %v6931_v11 = vrot.slane %v6924_v26, %v9110_v0  ;;  %v7044_v31 = vcombine.low %v5513_v21, %v5521_v46  ;;  %v5532_v39 = vrot.slane %v5259_v60, %v9110_v0 }
 0x439   :  { %v11840_v40 = vsel %vm5954_vm13, %v5904_v62, 0.0  ;;  %v6553_v8 = vrot.slane %v6546_v19, %v9110_v0  ;;  %v6731_v42 = vcombine.low %v5523_v9, %v11825_v30  ;;  %v11845_v58 = vadd.f32 %v6900_v37, %v11821_v1 }
 0x43a   :  { %v11831_v14 = vpop.f32.mrb[50].mxu1  ;;  %v6939_v20 = vcombine.low %v6931_v11, %v6938_v17  ;;  %v7923_v12 = vcombine.high %v11825_v30, %v11828_v53  ;;  %v7051_v33 = vrot.slane %v7044_v31, %v9110_v0  ;;  %v5539_v34 = vrot.slane %v5525_v49, %v9110_v0 }
 0x43b   :  { %v8446_v59 = vpop.f32.mrb[51].mxu1  ;;  %v5999_v52 = vrot.slane %v11759_v10, %v9110_v0  ;;  %v6738_v62 = vrot.slane %v6731_v42, %v9110_v0  ;;  %v5540_v48 = vcombine.high %v5532_v39, %v5532_v39  ;;  %v5548_v19 = vrot.slane %v5532_v39, %v9110_v0 }
 0x43c   :  { %v6946_v60 = vrot.slane %v6939_v20, %v9110_v0  ;;  %v6954_v32 = vrot.slane %v7923_v12, %v9110_v0  ;;  %v7058_v13 = vrot.slane %v7051_v33, %v9110_v0  ;;  %v5541_v45 = vcombine.high %v5539_v34, %v5539_v34 }
 0x43d   :  { %v6228_v18 = vrot.slane %v6221_v25, %v9110_v0  ;;  %v11863_v43 = vsel %vm6073_vm14, %v6553_v8, 0.0  ;;  %v5555_v10 = vrot.slane %v5539_v34, %v9110_v0  ;;  %v5562_v22 = vrot.slane %v5540_v48, %v9110_v0 }
 0x43e   :  { %v7020_v57 = vsel %vm6073_vm14, %v6946_v60, 0.0  ;;  %v7108_v21 = vsel %vm5954_vm13, %v7058_v13, 0.0  ;;  %v5569_v46 = vrot.slane %v5541_v45, %v9110_v0  ;;  %v6961_v47 = vrot.slane %v5548_v19, %v9110_v0 }
 0x43f   :  { %v11874_v50 = vadd.f32 %v7020_v57, %v11863_v43  ;;  %v7109_v25 = vadd.f32 %v7108_v21, %v6694_v27  ;;  %v5571_v49 = vcombine.high %v5555_v10, %v5555_v10  ;;  %v6745_v9 = vrot.slane %v6738_v62, %v9110_v0 }
 0x440   :  { %v5572_v17 = vcombine.high %v5562_v22, %v5562_v22  ;;  %v11877_v37 = vcombine.low %v6954_v32, %v6961_v47  ;;  %v7059_v11 = vcombine.low %v5548_v19, %v5562_v22  ;;  %v11880_v31 = vsel %vm6073_vm14, %v5999_v52, 0.0 }
 0x441   :  { %12992 = vst [vmem:[#allocation8_spill] sm:$0xff] %v11874_v50  ;;  %v7925_v39 = vcombine.high %v5548_v19, %v5562_v22  ;;  %v7252_v59 = vcombine.low %v5569_v46, %v5571_v49  ;;  %v5260_v8 = vmax.f32 %v11803_v38, 0.0  ;;  %v5522_v42 = vcombine.high %v11825_v30, %v11825_v30 }
 0x442   :  { %v7066_v20 = vrot.slane %v7059_v11, %v9110_v0  ;;  %v7184_v27 = vcombine.low %v5572_v17, %v5555_v10  ;;  %v5573_v12 = vcombine.high %v5569_v46, %v5569_v46  ;;  %v6827_v52 = vcombine.low %v11825_v30, %v11828_v53 }
 0x443   :  { %v7139_v33 = vrot.slane %v7925_v39, %v9110_v0  ;;  %v7259_v34 = vrot.slane %v7252_v59, %v9110_v0  ;;  %v5574_v62 = vcombine.high %v5260_v8, %v5260_v8  ;;  %v5581_v48 = vrot.slane %v5260_v8, %v9110_v0 }
 0x444   :  { %v11892_v19 = vsel %vm5954_vm13, %v6745_v9, 0.0  ;;  %v7073_v38 = vrot.slane %v7066_v20, %v9110_v0  ;;  %v7266_v60 = vrot.slane %v5573_v12, %v9110_v0  ;;  %v7191_v57 = vrot.slane %v7184_v27, %v9110_v0 }
 0x445   :  { %12993 = vst [vmem:[#allocation13_spill] sm:$0xff] %v11892_v19  ;;  %v7146_v32 = vrot.slane %v7139_v33, %v9110_v0  ;;  %v5588_v13 = vrot.slane %v5574_v62, %v9110_v0  ;;  %v5589_v45 = vcombine.high %v5581_v48, %v5581_v48  ;;  %v5597_v10 = vrot.slane %v5581_v48, %v9110_v0 }
 0x446   :  { %v7110_v22 = vsel %vm5954_vm13, %v7073_v38, 0.0  ;;  %v11901_v21 = vcombine.low %v7259_v34, %v7266_v60  ;;  %v5226_v30 = vadd.f32 %v11744_v23, %v11671_v7  ;;  %v11910_v17 = vsel %vm5954_vm13, %v6228_v18, 0.0 }
 0x447   :  { %v11905_v53 = vadd.f32 %v7110_v22, %v7109_v25  ;;  %v7164_v47 = vsel %vm5954_vm13, %v7146_v32, 0.0  ;;  %v5590_v49 = vcombine.high %v5588_v13, %v5588_v13  ;;  %v5604_v9 = vrot.slane %v5588_v13, %v9110_v0 }
 0x448   :  { %v11913_v11 = vadd.f32 %v7164_v47, %v11892_v19  ;;  %v5611_v39 = vrot.slane %v5589_v45, %v9110_v0  ;;  %v5619_v59 = vcombine.high %v5597_v10, %v5597_v10  ;;  %v6530_v8 = vrot.slane %v11762_v55, %v9110_v0 }
 0x449   :  { %v7198_v7 = vrot.slane %v5569_v46, %v9110_v0  ;;  %v5618_v23 = vrot.slane %v5590_v49, %v9110_v0  ;;  %v5620_v25 = vcombine.high %v5604_v9, %v5604_v9  ;;  %v11921_v20 = vrot.slane %v6827_v52, %v9110_v0 }
 0x44a   :  { %v5920_v27 = vcombine.low %v5611_v39, %v5619_v59  ;;  %v7914_v18 = vcombine.high %v5597_v10, %v5611_v39  ;;  %v7320_v33 = vcombine.low %v5573_v12, %v5597_v10  ;;  %v11924_v34 = vrot.slane %v5522_v42, %v9110_v0 }
 0x44b   :  { %v11926_v62 = vcombine.low %v7191_v57, %v7198_v7  ;;  %v6142_v48 = vcombine.low %v5604_v9, %v5618_v23  ;;  %v5261_v38 = vmax.f32 %v5226_v30, 0.0  ;;  %v11929_v60 = vrot.slane %v5620_v25, %v9110_v0 }
 0x44c   :  { %v7916_v46 = vcombine.high %v5604_v9, %v5618_v23  ;;  %v7327_v32 = vrot.slane %v7320_v33, %v9110_v0  ;;  %v5231_v52 = vadd.f32 %v11753_v54, %v11678_v36  ;;  %v5927_v13 = vrot.slane %v5920_v27, %v9110_v0 }
 0x44d   :  { %v11936_v12 = vrot.slane %v6142_v48, %v9110_v0  ;;  %v5623_v42 = vcombine.high %v5261_v38, %v5261_v38  ;;  %v5630_v45 = vrot.slane %v5261_v38, %v9110_v0  ;;  %v6842_v10 = vcombine.low %v11921_v20, %v11924_v34 }
 0x44e   :  { %v6969_v57 = vrot.slane %v11877_v37, %v9110_v0  ;;  %v6030_v30 = vrot.slane %v7914_v18, %v9110_v0  ;;  %v7334_v47 = vrot.slane %v7327_v32, %v9110_v0  ;;  %v5262_v39 = vmax.f32 %v5231_v52, 0.0 }
 0x44f   :  { %v5637_v54 = vrot.slane %v5623_v42, %v9110_v0  ;;  %v5638_v49 = vcombine.high %v5630_v45, %v5630_v45  ;;  %v7206_v59 = vrot.slane %v11926_v62, %v9110_v0  ;;  %v6037_v7 = vrot.slane %v5604_v9, %v9110_v0 }
 0x450   :  { %v7352_v23 = vsel %vm5954_vm13, %v7334_v47, 0.0  ;;  %v5646_v37 = vrot.slane %v5630_v45, %v9110_v0  ;;  %v5934_v25 = vrot.slane %v5927_v13, %v9110_v0  ;;  %v6251_v20 = vrot.slane %v7916_v46, %v9110_v0 }
 0x451   :  { %v11955_v27 = vadd.f32 %v7352_v23, %v7110_v22  ;;  %v5639_v18 = vcombine.high %v5637_v54, %v5637_v54  ;;  %v11957_v33 = vcombine.low %v6030_v30, %v6037_v7  ;;  %v5653_v34 = vrot.slane %v5637_v54, %v9110_v0 }
 0x452   :  { %v5660_v48 = vrot.slane %v5638_v49, %v9110_v0  ;;  %v5668_v62 = vcombine.high %v5646_v37, %v5646_v37  ;;  %v5672_v38 = vcombine.high %v5262_v39, %v5262_v39  ;;  %v5679_v32 = vrot.slane %v5262_v39, %v9110_v0 }
 0x453   :  { %v5667_v9 = vrot.slane %v5639_v18, %v9110_v0  ;;  %v5236_v52 = vadd.f32 %v11772_v3, %v11684_v44  ;;  %v5669_v13 = vcombine.high %v5653_v34, %v5653_v34  ;;  %v6258_v45 = vrot.slane %v6251_v20, %v9110_v0 }
 0x454   :  { %v5670_v46 = vcombine.high %v5660_v48, %v5660_v48  ;;  %v5935_v22 = vcombine.low %v5646_v37, %v5660_v48  ;;  %v6046_v42 = vcombine.low %v5660_v48, %v5668_v62  ;;  %v5686_v47 = vrot.slane %v5672_v38, %v9110_v0 }
 0x455   :  { %v5671_v30 = vcombine.high %v5667_v9, %v5667_v9  ;;  %v5687_v54 = vcombine.high %v5679_v32, %v5679_v32  ;;  %v6179_v18 = vrot.slane %v5667_v9, %v9110_v0  ;;  %v6259_v44 = vcombine.low %v5667_v9, %v5669_v13 }
 0x456   :  { %v5942_v49 = vrot.slane %v5935_v22, %v9110_v0  ;;  %v6053_v7 = vrot.slane %v6046_v42, %v9110_v0  ;;  %v6060_v23 = vrot.slane %v5670_v46, %v9110_v0  ;;  %v6165_v39 = vcombine.low %v5670_v46, %v5653_v34 }
 0x457   :  { %v5688_v3 = vcombine.high %v5686_v47, %v5686_v47  ;;  %v5695_v37 = vrot.slane %v5679_v32, %v9110_v0  ;;  %v5709_v38 = vrot.slane %v5687_v54, %v9110_v0  ;;  %v5702_v22 = vrot.slane %v5686_v47, %v9110_v0 }
 0x458   :  { %v5949_v48 = vrot.slane %v5942_v49, %v9110_v0  ;;  %v6061_v20 = vcombine.low %v6053_v7, %v6060_v23  ;;  %v6172_v62 = vrot.slane %v6165_v39, %v9110_v0  ;;  %v5958_v34 = vsel %vm5954_vm13, %v5934_v25, 0.0 }
 0x459   :  { %v5716_v42 = vrot.slane %v5688_v3, %v9110_v0  ;;  %v5717_v26 = vcombine.high %v5695_v37, %v5695_v37  ;;  %v11977_v36 = vcombine.low %v5671_v30, %v5695_v37  ;;  %v6434_v13 = vcombine.low %v5695_v37, %v5709_v38 }
 0x45a   :  { %v11981_v9 = vsel %vm5954_vm13, %v5949_v48, 0.0  ;;  %v11983_v32 = vcombine.low %v6172_v62, %v6179_v18  ;;  %v6068_v54 = vrot.slane %v6061_v20, %v9110_v0  ;;  %v6266_v47 = vrot.slane %v6259_v44, %v9110_v0 }
 0x45b   :  { %12994 = vst [vmem:[#allocation11_spill] sm:$0xff] %v11981_v9  ;;  %v11986_v46 = vadd.f32 %v11981_v9, %v5958_v34  ;;  %v7918_v49 = vcombine.high %v5702_v22, %v5716_v42  ;;  %v11996_v25 = vsel %vm6073_vm14, %v6530_v8, 0.0  ;;  %v6441_v7 = vrot.slane %v6434_v13, %v9110_v0 }
 0x45c   :  { %v6448_v23 = vrot.slane %v5717_v26, %v9110_v0  ;;  %v12001_v39 = vrot.slane %v6842_v10, %v9110_v0  ;;  %v12004_v18 = vsel %vm6073_vm14, %v6969_v57, 0.0  ;;  %v12007_v44 = vsel %vm6073_vm14, %v7206_v59, 0.0 }
 0x45d   :  { %v6045_v55 = vrot.slane %v11957_v33, %v9110_v0  ;;  %v12014_v8 = vsel %vm5954_vm13, %v6258_v45, 0.0  ;;  %v7920_v26 = vcombine.high %v5695_v37, %v5709_v38  ;;  %v12017_v10 = vsel %vm6073_vm14, %v6068_v54, 0.0 }
 0x45e   :  { %v6449_v48 = vcombine.low %v6441_v7, %v6448_v23  ;;  %v6273_v57 = vrot.slane %v6266_v47, %v9110_v0  ;;  %v6658_v20 = vcombine.low %v5702_v22, %v5716_v42  ;;  %v5263_v62 = vmax.f32 %v5236_v52, 0.0 }
 0x45f   :  { %v6561_v34 = vrot.slane %v7920_v26, %v9110_v0  ;;  %v6568_v13 = vrot.slane %v5702_v22, %v9110_v0  ;;  %v5241_v33 = vadd.f32 %v11789_v51, %v11690_v6  ;;  %v5720_v7 = vcombine.high %v5716_v42, %v5716_v42 }
 0x460   :  { %v6456_v59 = vrot.slane %v6449_v48, %v9110_v0  ;;  %v6665_v45 = vrot.slane %v6658_v20, %v9110_v0  ;;  %v5721_v37 = vcombine.high %v5263_v62, %v5263_v62  ;;  %v5728_v38 = vrot.slane %v5263_v62, %v9110_v0 }
 0x461   :  { %v12028_v47 = vcombine.low %v6561_v34, %v6568_v13  ;;  %v5264_v52 = vmax.f32 %v5241_v33, 0.0  ;;  %v5246_v23 = vadd.f32 %v11808_v63, %v11696_v16  ;;  %v12036_v51 = vsel %vm5954_vm13, %v6273_v57, 0.0 }
 0x462   :  { %v6488_v54 = vsel %vm6073_vm14, %v6456_v59, 0.0  ;;  %v6672_v48 = vrot.slane %v6665_v45, %v9110_v0  ;;  %v5735_v22 = vrot.slane %v5721_v37, %v9110_v0  ;;  %v5736_v26 = vcombine.high %v5728_v38, %v5728_v38 }
 0x463   :  { %v5744_v6 = vrot.slane %v5728_v38, %v9110_v0  ;;  %v6489_v42 = vadd.f32 %v6488_v54, %v12017_v10  ;;  %v5770_v20 = vcombine.high %v5264_v52, %v5264_v52  ;;  %v5777_v62 = vrot.slane %v5264_v52, %v9110_v0 }
 0x464   :  { %v6696_v59 = vsel %vm5954_vm13, %v6672_v48, 0.0  ;;  %v5737_v34 = vcombine.high %v5735_v22, %v5735_v22  ;;  %v5751_v16 = vrot.slane %v5735_v22, %v9110_v0  ;;  %v5758_v63 = vrot.slane %v5736_v26, %v9110_v0 }
 0x465   :  { %v6352_v13 = vrot.slane %v7918_v49, %v9110_v0  ;;  %v12045_v33 = vadd.f32 %v6696_v59, %v12036_v51  ;;  %v5766_v45 = vcombine.high %v5744_v6, %v5744_v6  ;;  %v6457_v57 = vcombine.low %v5720_v7, %v5744_v6 }
 0x466   :  { %v5765_v37 = vrot.slane %v5737_v34, %v9110_v0  ;;  %v5767_v38 = vcombine.high %v5751_v16, %v5751_v16  ;;  %v5768_v54 = vcombine.high %v5758_v63, %v5758_v63  ;;  %v6471_v52 = vrot.slane %v5758_v63, %v9110_v0 }
 0x467   :  { %v6464_v48 = vrot.slane %v6457_v57, %v9110_v0  ;;  %v6577_v3 = vcombine.low %v5758_v63, %v5766_v45  ;;  %v5784_v22 = vrot.slane %v5770_v20, %v9110_v0  ;;  %v5785_v30 = vcombine.high %v5777_v62, %v5777_v62 }
 0x468   :  { %v6591_v26 = vrot.slane %v5768_v54, %v9110_v0  ;;  %v6673_v49 = vcombine.low %v5768_v54, %v5751_v16  ;;  %v6746_v19 = vcombine.low %v5765_v37, %v5767_v38  ;;  %v7922_v59 = vcombine.high %v5751_v16, %v5765_v37 }
 0x469   :  { %v6472_v61 = vcombine.low %v6464_v48, %v6471_v52  ;;  %v6584_v7 = vrot.slane %v6577_v3, %v9110_v0  ;;  %v5786_v6 = vcombine.high %v5784_v22, %v5784_v22  ;;  %v5793_v34 = vrot.slane %v5777_v62, %v9110_v0 }
 0x46a   :  { %v6359_v50 = vrot.slane %v6352_v13, %v9110_v0  ;;  %v6753_v9 = vrot.slane %v6746_v19, %v9110_v0  ;;  %v6857_v63 = vrot.slane %v7922_v59, %v9110_v0  ;;  %v5800_v20 = vrot.slane %v5784_v22, %v9110_v0 }
 0x46b   :  { %v6479_v45 = vrot.slane %v6472_v61, %v9110_v0  ;;  %v12059_v57 = vcombine.low %v6584_v7, %v6591_v26  ;;  %v5807_v16 = vrot.slane %v5785_v30, %v9110_v0  ;;  %v5814_v37 = vrot.slane %v5786_v6, %v9110_v0 }
 0x46c   :  { %v12064_v3 = vsel %vm6073_vm14, %v6045_v55, 0.0  ;;  %v6680_v62 = vrot.slane %v6673_v49, %v9110_v0  ;;  %v6760_v13 = vrot.slane %v6753_v9, %v9110_v0  ;;  %v5816_v19 = vcombine.high %v5800_v20, %v5800_v20 }
 0x46d   :  { %v12069_v38 = vsel %vm6073_vm14, %v6479_v45, 0.0  ;;  %v5815_v54 = vcombine.high %v5793_v34, %v5793_v34  ;;  %v6761_v52 = vcombine.low %v5800_v20, %v5814_v37  ;;  %v6864_v61 = vrot.slane %v5793_v34, %v9110_v0 }
 0x46e   :  { %v12073_v48 = vsel %vm5954_vm13, %v6359_v50, 0.0  ;;  %v12076_v30 = vadd.f32 %v12069_v38, %v6489_v42  ;;  %v6784_v55 = vsel %vm5954_vm13, %v6760_v13, 0.0  ;;  %v6873_v22 = vcombine.low %v5814_v37, %v5816_v19 }
 0x46f   :  { %12995 = vst [vmem:[#allocation16_spill] sm:$0xff] %v12073_v48  ;;  %v6768_v26 = vrot.slane %v6761_v52, %v9110_v0  ;;  %v6785_v9 = vadd.f32 %v6784_v55, %v12073_v48  ;;  %v6865_v49 = vcombine.low %v6857_v63, %v6864_v61  ;;  %v6970_v59 = vcombine.low %v5793_v34, %v5807_v16 }
 0x470   :  { %v6687_v7 = vrot.slane %v6680_v62, %v9110_v0  ;;  %v6880_v6 = vrot.slane %v6873_v22, %v9110_v0  ;;  %v7924_v20 = vcombine.high %v5793_v34, %v5807_v16  ;;  %v5265_v45 = vmax.f32 %v5246_v23, 0.0 }
 0x471   :  { %v6775_v50 = vrot.slane %v6768_v26, %v9110_v0  ;;  %v12085_v42 = vrot.slane %v6970_v59, %v9110_v0  ;;  %v12088_v13 = vrot.slane %v5815_v54, %v9110_v0  ;;  %v5818_v19 = vcombine.high %v5814_v37, %v5814_v37 }
 0x472   :  { %v7081_v52 = vrot.slane %v7924_v20, %v9110_v0  ;;  %v5819_v55 = vcombine.high %v5265_v45, %v5265_v45  ;;  %v5826_v63 = vrot.slane %v5265_v45, %v9110_v0  ;;  %v5251_v62 = vadd.f32 %v11831_v14, %v11700_v2 }
 0x473   :  { %v12097_v34 = vsel %vm5954_vm13, %v6775_v50, 0.0  ;;  %v6887_v54 = vrot.slane %v5818_v19, %v9110_v0  ;;  %v12108_v2 = vsel %vm5954_vm13, %v6687_v7, 0.0 }
 0x474   :  { %v12103_v37 = vadd.f32 %v12097_v34, %v6785_v9  ;;  %v7088_v61 = vrot.slane %v7081_v52, %v9110_v0  ;;  %v5833_v22 = vrot.slane %v5819_v55, %v9110_v0  ;;  %v5834_v26 = vcombine.high %v5826_v63, %v5826_v63 }
 0x475   :  { %v5842_v14 = vrot.slane %v5826_v63, %v9110_v0  ;;  %v6888_v59 = vcombine.low %v6880_v6, %v6887_v54  ;;  %v5266_v20 = vmax.f32 %v5251_v62, 0.0  ;;  %v12116_v52 = vsel %vm5954_vm13, %v11986_v46, 0.0 }
 0x476   :  { %12996 = vst [vmem:[#allocation12_spill] sm:$0xff] %v12103_v37  ;;  %v7112_v45 = vsel %vm5954_vm13, %v7088_v61, 0.0  ;;  %v5835_v50 = vcombine.high %v5833_v22, %v5833_v22  ;;  %v5849_v16 = vrot.slane %v5833_v22, %v9110_v0  ;;  %v5856_v9 = vrot.slane %v5834_v26, %v9110_v0 }
 0x477   :  { %v7113_v7 = vadd.f32 %v7112_v45, %v12108_v2  ;;  %v5864_v23 = vcombine.high %v5842_v14, %v5842_v14  ;;  %v6993_v54 = vcombine.low %v5818_v19, %v5842_v14  ;;  %v6872_v61 = vrot.slane %v6865_v49, %v9110_v0 }
 0x478   :  { %v5863_v6 = vrot.slane %v5835_v50, %v9110_v0  ;;  %v5865_v63 = vcombine.high %v5849_v16, %v5849_v16  ;;  %v5866_v62 = vcombine.high %v5856_v9, %v5856_v9  ;;  %v6895_v22 = vrot.slane %v6888_v59, %v9110_v0 }
 0x479   :  { %v7089_v26 = vcombine.low %v5856_v9, %v5864_v23  ;;  %v5874_v37 = vrot.slane %v5266_v20, %v9110_v0  ;;  %v7000_v46 = vrot.slane %v6993_v54, %v9110_v0  ;;  %v7007_v48 = vrot.slane %v5856_v9, %v9110_v0 }
 0x47a   :  { %v12127_v55 = vcombine.low %v5866_v62, %v5849_v16  ;;  %v7207_v45 = vcombine.low %v5849_v16, %v5863_v6  ;;  %v7926_v50 = vcombine.high %v5849_v16, %v5863_v6  ;;  %v7221_v23 = vrot.slane %v5865_v63, %v9110_v0 }
 0x47b   :  { %v7096_v24 = vrot.slane %v7089_v26, %v9110_v0  ;;  %v5875_v5 = vcombine.high %v5874_v37, %v5874_v37  ;;  %v5882_v19 = vrot.slane %v5874_v37, %v9110_v0  ;;  %v7008_v14 = vcombine.low %v7000_v46, %v7007_v48 }
 0x47c   :  { %v7214_v49 = vrot.slane %v7207_v45, %v9110_v0  ;;  %v6076_v59 = vadd.f32 %v11768_v29, %v11880_v31  ;;  %v7282_v62 = vrot.slane %v7926_v50, %v9110_v0  ;;  %v12140_v16 = vsel %vm6073_vm14, %v6872_v61, 0.0 }
 0x47d   :  { %v7103_v20 = vrot.slane %v7096_v24, %v9110_v0  ;;  %v5889_v9 = vrot.slane %v5875_v5, %v9110_v0  ;;  %v7289_v54 = vrot.slane %v5882_v19, %v9110_v0  ;;  %v7015_v48 = vrot.slane %v7008_v14, %v9110_v0 }
 0x47e   :  { %v7222_v37 = vcombine.low %v7214_v49, %v7221_v23  ;;  %v6079_v6 = vadd.f32 %v12017_v10, %v12064_v3  ;;  %v6080_v24 = vsel %vm6073_vm14, %v6076_v59, 0.0  ;;  %v12148_v5 = vsel %vm6073_vm14, %v6895_v22, 0.0 }
 0x47f   :  { %v7114_v63 = vsel %vm5954_vm13, %v7103_v20, 0.0  ;;  %v7290_v29 = vcombine.low %v7282_v62, %v7289_v54  ;;  %v7335_v31 = vcombine.low %v5882_v19, %v5889_v9  ;;  %v6081_v3 = vrot.slane %v6080_v24, 4 }
 0x480   :  { %v12153_v61 = vrot.slane %v7222_v37, %v9110_v0  ;;  %v12155_v46 = vadd.f32 %v7114_v63, %v7113_v7  ;;  %v6087_v50 = vsel %vm6073_vm14, %v6079_v6, 0.0  ;;  %v12161_v19 = vsel %vm6073_vm14, %v7015_v48, 0.0 }
 0x481   :  { %v7297_v45 = vrot.slane %v7290_v29, %v9110_v0  ;;  %v7342_v10 = vrot.slane %v7335_v31, %v9110_v0  ;;  %12997 = vst [vmem:[#allocation17_spill] sm:$0xff] %v12161_v19  ;;  %v6088_v22 = vrot.slane %v6087_v50, 4  ;;  %v6280_v14 = vadd.f32 %v11775_v4, %v11910_v17 }
 0x482   :  { %v6283_v49 = vadd.f32 %v12036_v51, %v12014_v8  ;;  %v6082_v59 = vadd.f32 %v6081_v3, %v6080_v24  ;;  %v6487_v20 = vadd.f32 %v11821_v1, %v11779_v28  ;;  %v6499_v28 = vsel %vm6073_vm14, %v12076_v30, 0.0 }
 0x483   :  { %v7302_v7 = vsel %vm6073_vm14, %v7297_v45, 0.0  ;;  %v7349_v23 = vrot.slane %v7342_v10, %v9110_v0  ;;  %v6089_v62 = vadd.f32 %v6088_v22, %v6087_v50  ;;  %v6284_v54 = vsel %vm5954_vm13, %v6280_v14, 0.0 }
 0x484   :  { %v12172_v9 = vadd.f32 %v7302_v7, %v12161_v19  ;;  %v6291_v48 = vsel %vm5954_vm13, %v6283_v49, 0.0  ;;  %v6083_v17 = vrot.slane %v6082_v59, 2  ;;  %v6285_v8 = vrot.slane %v6284_v54, 4 }
 0x485   :  { %v7354_v4 = vsel %vm5954_vm13, %v7349_v23, 0.0  ;;  %v6292_v51 = vrot.slane %v6291_v48, 4  ;;  %v6090_v6 = vrot.slane %v6089_v62, 2  ;;  %v6492_v29 = vsel %vm6073_vm14, %v6487_v20, 0.0 }
 0x486   :  { %v12177_v37 = vadd.f32 %v7354_v4, %v7114_v63  ;;  %v6084_v1 = vadd.f32 %v6083_v17, %v6082_v59  ;;  %v6286_v31 = vadd.f32 %v6285_v8, %v6284_v54  ;;  %v6493_v45 = vrot.slane %v6492_v29, 4 }
 0x487   :  { %v6293_v24 = vadd.f32 %v6292_v51, %v6291_v48  ;;  %v6091_v10 = vadd.f32 %v6090_v6, %v6089_v62  ;;  %v6500_v3 = vrot.slane %v6499_v28, 4  ;;  %v6699_v50 = vadd.f32 %v12108_v2, %v12045_v33  ;;  %v7576_v2 = vld [vmem:[%s12826_s5 + $0x398] sm:$0xff] }
 0x488   :  { %v6700_v63 = vsel %vm5954_vm13, %v11813_v56, 0.0  ;;  %v6085_v22 = vrot.slane %v6084_v1, 1  ;;  %v6287_v14 = vrot.slane %v6286_v31, 2  ;;  %v6494_v7 = vadd.f32 %v6493_v45, %v6492_v29  ;;  %v7575_v56 = vld [vmem:[%s12826_s5 + $0x390] sm:$0xff] }
 0x489   :  { %v6294_v49 = vrot.slane %v6293_v24, 2  ;;  %v6092_v23 = vrot.slane %v6091_v10, 1  ;;  %v6501_v20 = vadd.f32 %v6500_v3, %v6499_v28  ;;  %v6701_v30 = vrot.slane %v6700_v63, 4 }
 0x48a   :  { %v6707_v59 = vsel %vm5954_vm13, %v6699_v50, 0.0  ;;  %v6086_v54 = vadd.f32 %v6085_v22, %v6084_v1  ;;  %v6288_v48 = vadd.f32 %v6287_v14, %v6286_v31  ;;  %v6495_v62 = vrot.slane %v6494_v7, 2  ;;  %v7560_v50 = vld [vmem:[%s12826_s5 + $0x318] sm:$0xff] }
 0x48b   :  { %v6295_v4 = vadd.f32 %v6294_v49, %v6293_v24  ;;  %v6093_v17 = vadd.f32 %v6092_v23, %v6091_v10  ;;  %v6502_v8 = vrot.slane %v6501_v20, 2  ;;  %v6702_v51 = vadd.f32 %v6701_v30, %v6700_v63  ;;  %v7559_v10 = vld [vmem:[%s12826_s5 + $0x310] sm:$0xff] }
 0x48c   :  { %v6708_v33 = vrot.slane %v6707_v59, 4  ;;  %v6094_v6 = vmul.f32 0.16666667, %v6086_v54  ;;  %v6289_v29 = vrot.slane %v6288_v48, 1  ;;  %v6496_v45 = vadd.f32 %v6495_v62, %v6494_v7 }
 0x48d   :  { %v6296_v28 = vrot.slane %v6295_v4, 1  ;;  %v6095_v1 = vmul.f32 0.16666667, %v6093_v17  ;;  %v6503_v31 = vadd.f32 %v6502_v8, %v6501_v20  ;;  %v6703_v24 = vrot.slane %v6702_v51, 2 }
 0x48e   :  { %v6709_v3 = vadd.f32 %v6708_v33, %v6707_v59  ;;  %v6290_v63 = vadd.f32 %v6289_v29, %v6288_v48  ;;  %v6497_v14 = vrot.slane %v6496_v45, 1  ;;  %v8609_v49 = vpack.c.bf16 %v7576_v2, %v7575_v56 }
 0x48f   :  { %v6297_v22 = vadd.f32 %v6296_v28, %v6295_v4  ;;  %v7379_v23 = vsel %vm7374_vm15, %v6095_v1, %v6094_v6  ;;  %v6504_v30 = vrot.slane %v6503_v31, 1  ;;  %v6704_v7 = vadd.f32 %v6703_v24, %v6702_v51 }
 0x490   :  { %v6710_v54 = vrot.slane %v6709_v3, 2  ;;  %v6298_v20 = vmul.f32 0.25, %v6290_v63  ;;  %v6498_v59 = vadd.f32 %v6497_v14, %v6496_v45  ;;  %8610 = vmatprep.subr.bf16.mxu0 %v8609_v49  ;;  %v8611_v17 = vpack.c.bf16 %v7560_v50, %v7559_v10 }
 0x491   :  { %v6299_v62 = vmul.f32 0.25, %v6297_v22  ;;  %v6505_v8 = vadd.f32 %v6504_v30, %v6503_v31  ;;  %v6705_v33 = vrot.slane %v6704_v7, 1  ;;  %v6902_v19 = vsel %vm6073_vm14, %v12001_v39, 0.0 }
 0x492   :  { %v6711_v26 = vadd.f32 %v6710_v54, %v6709_v3  ;;  %v6506_v4 = vmul.f32 0.11111111, %v6498_v59  ;;  %8612 = vmatpush3.bf16.msra.mxu0 %v8611_v17  ;;  %v6903_v56 = vadd.f32 %v6902_v19, %v11845_v58  ;;  %v6905_v51 = vadd.f32 %v12140_v16, %v12069_v38 }
 0x493   :  { %v7389_v48 = vsel %vm7374_vm15, %v6299_v62, %v6298_v20  ;;  %v6507_v6 = vmul.f32 0.11111111, %v6505_v8  ;;  %v6706_v29 = vadd.f32 %v6705_v33, %v6704_v7  ;;  %v7116_v39 = vsel %vm5954_vm13, %v11905_v53, 0.0 }
 0x494   :  { %v8651_v2 = vpack.i.bf16 %v7379_v23, %v7389_v48  ;;  %v6712_v28 = vrot.slane %v6711_v26, 1  ;;  %v6907_v45 = vadd.f32 %v12148_v5, %v6905_v51  ;;  %v6908_v1 = vsel %vm6073_vm14, %v6903_v56, 0.0 }
 0x495   :  { %v7123_v31 = vsel %vm5954_vm13, %v12155_v46, 0.0  ;;  %v6714_v24 = vmul.f32 0.16666667, %v6706_v29  ;;  %v7399_v38 = vsel %vm7374_vm15, %v6507_v6, %v6506_v4  ;;  %v6909_v16 = vrot.slane %v6908_v1, 4 }
 0x496   :  { %8652 = vrot.lane.b32.xlu1 %v8651_v2, %s8701_s29  ;;  %v6713_v58 = vadd.f32 %v6712_v28, %v6711_v26  ;;  %v6915_v3 = vsel %vm6073_vm14, %v6907_v45, 0.0  ;;  %v7117_v10 = vrot.slane %v7116_v39, 4  ;;  %v7124_v50 = vrot.slane %v7123_v31, 4 }
 0x497   :  { %v7233_v63 = vadd.f32 %v12007_v44, %v6902_v19  ;;  %v6910_v14 = vadd.f32 %v6909_v16, %v6908_v1  ;;  %v6916_v49 = vrot.slane %v6915_v3, 4  ;;  %v7234_v53 = vsel %vm6073_vm14, %v12153_v61, 0.0 }
 0x498   :  { %v6715_v22 = vmul.f32 0.16666667, %v6713_v58  ;;  %v7118_v46 = vadd.f32 %v7117_v10, %v7116_v39  ;;  %v7125_v23 = vadd.f32 %v7124_v50, %v7123_v31  ;;  %v7235_v26 = vadd.f32 %v7234_v53, %v12148_v5 }
 0x499   :  { %v7236_v30 = vsel %vm6073_vm14, %v7233_v63, 0.0  ;;  %v6911_v54 = vrot.slane %v6910_v14, 2  ;;  %v6917_v20 = vadd.f32 %v6916_v49, %v6915_v3  ;;  %v7356_v56 = vsel %vm5954_vm13, %v11955_v27, 0.0  ;;  %v7577_v3 = vld [vmem:[%s12826_s5 + $0x3a0] sm:$0xff]  ;;  %v7578_v27 = vld [vmem:[%s12826_s5 + $0x3a8] sm:$0xff]  ;;  %v7579_v49 = vld [vmem:[%s12826_s5 + $0x3b0] sm:$0xff] }
 0x49a   :  { %v7409_v7 = vsel %vm7374_vm15, %v6715_v22, %v6714_v24  ;;  %v7237_v62 = vrot.slane %v7236_v30, 4  ;;  %v7119_v17 = vrot.slane %v7118_v46, 2  ;;  %v7126_v44 = vrot.slane %v7125_v23, 2  ;;  %v7561_v22 = vld [vmem:[%s12826_s5 + $0x320] sm:$0xff] }
 0x49b   :  { %v8656_v59 = vpack.i.bf16 %v7399_v38, %v7409_v7  ;;  %v7243_v19 = vsel %vm6073_vm14, %v7235_v26, 0.0  ;;  %v6912_v8 = vadd.f32 %v6911_v54, %v6910_v14  ;;  %v6918_v33 = vrot.slane %v6917_v20, 2  ;;  %v7562_v14 = vld [vmem:[%s12826_s5 + $0x328] sm:$0xff]  ;;  %v7563_v7 = vld [vmem:[%s12826_s5 + $0x330] sm:$0xff]  ;;  %v7564_v54 = vld [vmem:[%s12826_s5 + $0x338] sm:$0xff] }
 0x49c   :  { %v7238_v48 = vadd.f32 %v7237_v62, %v7236_v30  ;;  %v7244_v61 = vrot.slane %v7243_v19, 4  ;;  %v7120_v4 = vadd.f32 %v7119_v17, %v7118_v46  ;;  %v7127_v5 = vadd.f32 %v7126_v44, %v7125_v23  ;;  %v7580_v30 = vld [vmem:[%s12826_s5 + $0x3b8] sm:$0xff] }
 0x49d   :  { %8657 = vrot.lane.b32.xlu0 %v8656_v59, %s8701_s29  ;;  %v7363_v51 = vsel %vm5954_vm13, %v12177_v37, 0.0  ;;  %v6913_v2 = vrot.slane %v6912_v8, 1  ;;  %v6919_v6 = vadd.f32 %v6918_v33, %v6917_v20  ;;  %v7357_v39 = vrot.slane %v7356_v56, 4 }
 0x49e   :  { %v7239_v29 = vrot.slane %v7238_v48, 2  ;;  %v7245_v28 = vadd.f32 %v7244_v61, %v7243_v19  ;;  %v7121_v45 = vrot.slane %v7120_v4, 1  ;;  %v7128_v1 = vrot.slane %v7127_v5, 1  ;;  %v7478_v61 = vld [vmem:[%s12826_s5 + $0x88] sm:$0xff] }
 0x49f   :  { %v7364_v31 = vrot.slane %v7363_v51, 4  ;;  %v6914_v58 = vadd.f32 %v6913_v2, %v6912_v8  ;;  %v6920_v24 = vrot.slane %v6919_v6, 1  ;;  %v7358_v50 = vadd.f32 %v7357_v39, %v7356_v56 }
 0x4a0   :  { %v7240_v38 = vadd.f32 %v7239_v29, %v7238_v48  ;;  %v7246_v16 = vrot.slane %v7245_v28, 2  ;;  %v7122_v37 = vadd.f32 %v7121_v45, %v7120_v4  ;;  %v7129_v10 = vadd.f32 %v7128_v1, %v7127_v5  ;;  %v7477_v48 = vld [vmem:[%s12826_s5 + $0x80] sm:$0xff]  ;;  %v7479_v29 = vld [vmem:[%s12826_s5 + $0x90] sm:$0xff] }
 0x4a1   :  { %v7365_v63 = vadd.f32 %v7364_v31, %v7363_v51  ;;  %v6921_v53 = vadd.f32 %v6920_v24, %v6919_v6  ;;  %v6922_v46 = vmul.f32 0.11111111, %v6914_v58  ;;  %v7359_v59 = vrot.slane %v7358_v50, 2  ;;  %v7461_v4 = vld [vmem:[%s12826_s5] sm:$0xff]  ;;  %v7462_v6 = vld [vmem:[%s12826_s5 + $0x8] sm:$0xff]  ;;  %v12274_v58 = vld [vmem:[%s12826_s5 + $0x10] sm:$0xff] }
 0x4a2   :  { %v7241_v23 = vrot.slane %v7240_v38, 1  ;;  %v7247_v26 = vadd.f32 %v7246_v16, %v7245_v28  ;;  %v7130_v20 = vmul.f32 0.16666667, %v7122_v37  ;;  %v7131_v62 = vmul.f32 0.16666667, %v7129_v10  ;;  %v7480_v28 = vld [vmem:[%s12826_s5 + $0x98] sm:$0xff] }
 0x4a3   :  { %v7366_v17 = vrot.slane %v7365_v63, 2  ;;  %v6923_v44 = vmul.f32 0.11111111, %v6921_v53  ;;  %v8613_v33 = vpack.c.bf16 %v7578_v27, %v7577_v3  ;;  %v7360_v56 = vadd.f32 %v7359_v59, %v7358_v50  ;;  %v7464_v27 = vld [vmem:[%s12826_s5 + $0x18] sm:$0xff]  ;;  %v7581_v37 = vld [vmem:[%s12826_s5 + $0x3c0] sm:$0xff]  ;;  %v7582_v10 = vld [vmem:[%s12826_s5 + $0x3c8] sm:$0xff] }
 0x4a4   :  { %v7242_v19 = vadd.f32 %v7241_v23, %v7240_v38  ;;  %v7248_v8 = vrot.slane %v7247_v26, 1  ;;  %v7429_v5 = vsel %vm7374_vm15, %v7131_v62, %v7130_v20  ;;  %v8615_v2 = vpack.c.bf16 %v7562_v14, %v7561_v22  ;;  %v7565_v53 = vld [vmem:[%s12826_s5 + $0x340] sm:$0xff]  ;;  %v7482_v20 = vld [vmem:[%s12826_s5 + $0xa8] sm:$0xff] }
 0x4a5   :  { %v7367_v51 = vadd.f32 %v7366_v17, %v7365_v63  ;;  %v7419_v45 = vsel %vm7374_vm15, %v6923_v44, %v6922_v46  ;;  %8614 = vmatprep.subr.bf16.mxu0 %v8613_v33  ;;  %v8617_v31 = vpack.c.bf16 %v7580_v30, %v7579_v49  ;;  %v7361_v38 = vrot.slane %v7360_v56, 1  ;;  %v7481_v49 = vld [vmem:[%s12826_s5 + $0xa0] sm:$0xff]  ;;  %v7566_v46 = vld [vmem:[%s12826_s5 + $0x348] sm:$0xff] }
 0x4a6   :  { %v7249_v1 = vadd.f32 %v7248_v8, %v7247_v26  ;;  %v7250_v39 = vmul.f32 0.16666667, %v7242_v19  ;;  %v8661_v24 = vpack.i.bf16 %v7419_v45, %v7429_v5  ;;  %8616 = vmatpush3.bf16.msra.mxu0 %v8615_v2  ;;  %v8619_v3 = vpack.c.bf16 %v7564_v54, %v7563_v7  ;;  %v12307_v62 = vld [vmem:[%s12826_s5 + $0x20] sm:$0xff]  ;;  %v12325_v19 = vld [vmem:[%s12826_s5 + $0xb0] sm:$0xff]  ;;  %v12330_v8 = vld [vmem:[%s12826_s5 + $0xb8] sm:$0xff] }
 0x4a7   :  { %v7368_v16 = vrot.slane %v7367_v51, 1  ;;  %8618 = vmatprep.subr.bf16.mxu0 %v8617_v31  ;;  %v8509_v63 = vpack.c.bf16 %v7478_v61, %v7477_v48  ;;  %v8511_v22 = vpack.c.bf16 %v7462_v6, %v7461_v4  ;;  %v8513_v14 = vpack.c.bf16 %v7480_v28, %v7479_v29  ;;  %v12341_v5 = vld [vmem:[%s12826_s5 + $0x38] sm:$0xff] }
 0x4a8   :  { %v7251_v50 = vmul.f32 0.16666667, %v7249_v1  ;;  %v12998_v23 = vcombine.low %v11936_v12, %v11929_v60  ;;  %v6187_v30 = vrot.slane %v11983_v32, %v9110_v0  ;;  %8662 = vrot.lane.b32.xlu1 %v8661_v24, %s8701_s29  ;;  %v7362_v7 = vadd.f32 %v7361_v38, %v7360_v56  ;;  %v12312_v60 = vld [vmem:[%s12826_s5 + $0x28] sm:$0xff]  ;;  %v7583_v56 = vld [vmem:[%s12826_s5 + $0x3d0] sm:$0xff]  ;;  %v12379_v38 = vld [vmem:[%s12826_s5 + $0xc0] sm:$0xff] }
 0x4a9   :  { %v7369_v54 = vadd.f32 %v7368_v16, %v7367_v51  ;;  %v5969_v12 = vrot.slane %v12116_v52, 4  ;;  %v12999_v32 = vrot.slane %v11977_v36, %v9110_v0  ;;  %8510 = vmatprep.subr.bf16.mxu1 %v8509_v63  ;;  %v8621_v44 = vpack.c.bf16 %v7582_v10, %v7581_v37  ;;  %v12335_v36 = vld [vmem:[%s12826_s5 + $0x30] sm:$0xff]  ;;  %v7584_v51 = vld [vmem:[%s12826_s5 + $0x3d8] sm:$0xff]  ;;  %v12384_v16 = vld [vmem:[%s12826_s5 + $0xc8] sm:$0xff] }
 0x4aa   :  { %v6164_v26 = vrot.slane %v12998_v23, %v9110_v0  ;;  %v7439_v17 = vsel %vm7374_vm15, %v7251_v50, %v7250_v39  ;;  %v7370_v33 = vmul.f32 0.25, %v7362_v7  ;;  %8620 = vmatpush3.bf16.msra.mxu0 %v8619_v3  ;;  %8512 = vmatpush3.bf16.msra.mxu1 %v8511_v22  ;;  %v8515_v61 = vpack.c.bf16 %v7464_v27, %v12274_v58  ;;  %v7567_v39 = vld [vmem:[%s12826_s5 + $0x350] sm:$0xff]  ;;  %v12396_v27 = vld [vmem:[%s12826_s5 + $0x48] sm:$0xff]  ;;  %v12406_v10 = vld [vmem:[%s12826_s5 + $0xd8] sm:$0xff] }
 0x4ab   :  { %v12319_v59 = vrot.slane %v12999_v32, %v9110_v0  ;;  %v7371_v48 = vmul.f32 0.25, %v7369_v54  ;;  %v8623_v4 = vpack.c.bf16 %v7566_v46, %v7565_v53  ;;  %v13000_v2 = vrot.slane %v12028_v47, %v9110_v0  ;;  %8514 = vmatprep.subr.bf16.mxu1 %v8513_v14  ;;  %8622 = vmatprep.subr.bf16.mxu0 %v8621_v44  ;;  %v7568_v47 = vld [vmem:[%s12826_s5 + $0x358] sm:$0xff]  ;;  %v12401_v37 = vld [vmem:[%s12826_s5 + $0xd0] sm:$0xff] }
 0x4ac   :  { %v6599_v29 = vrot.slane %v12059_v57, %v9110_v0  ;;  %v13001_v28 = vrot.slane %v12127_v55, %v9110_v0  ;;  %v8517_v1 = vpack.c.bf16 %v7482_v20, %v7481_v49  ;;  %v13002_v57 = vcombine.low %v12085_v42, %v12088_v13  ;;  %v12389_v42 = vld [vmem:[%s12826_s5 + $0x40] sm:$0xff]  ;;  %v12415_v14 = vld [vmem:[%s12826_s5 + $0x50] sm:$0xff]  ;;  %v12420_v49 = vld [vmem:[%s12826_s5 + $0x58] sm:$0xff] }
 0x4ad   :  { %v6608_v6 = vsel %vm6073_vm14, %v13000_v2, 0.0  ;;  %v7449_v55 = vsel %vm7374_vm15, %v7371_v48, %v7370_v33  ;;  %v8519_v58 = vpack.c.bf16 %v12312_v60, %v12307_v62  ;;  %v8521_v24 = vpack.c.bf16 %v12330_v8, %v12325_v19  ;;  %v7585_v48 = vld [vmem:[%s12826_s5 + $0x3e0] sm:$0xff] }
 0x4ae   :  { %v7161_v45 = vrot.slane %v13001_v28, %v9110_v0  ;;  %v12369_v31 = vrot.slane %v13002_v57, %v9110_v0  ;;  %v8666_v13 = vpack.i.bf16 %v7439_v17, %v7449_v55  ;;  %v8523_v3 = vpack.c.bf16 %v12341_v5, %v12335_v36  ;;  %8516 = vmatpush3.bf16.msra.mxu1 %v8515_v61  ;;  %v7569_v28 = vld [vmem:[%s12826_s5 + $0x360] sm:$0xff] }
 0x4af   :  { %v8625_v50 = vpack.c.bf16 %v7584_v51, %v7583_v56  ;;  %v13003_v63 = vrot.slane %v11686_v15, %v9110_v0  ;;  %8624 = vmatpush3.bf16.msra.mxu0 %v8623_v4  ;;  %v8627_v53 = vpack.c.bf16 %v7568_v47, %v7567_v39  ;;  %v13004_v46 = vrot.slane %v11717_v41, %v9110_v0  ;;  %v12490_v39 = vld [vmem:[%s12826_s5 + $0xf8] sm:$0xff] }
 0x4b0   :  { %v6195_v23 = vsel %vm6073_vm14, %v6164_v26, 0.0  ;;  %v6196_v7 = vsel %vm6073_vm14, %v6187_v30, 0.0  ;;  %v7166_v54 = vsel %vm5954_vm13, %v7161_v45, 0.0  ;;  %8667 = vrot.lane.b32.xlu0 %v8666_v13, %s8701_s29  ;;  %8518 = vmatprep.subr.bf16.mxu1 %v8517_v1  ;;  %v8525_v20 = vpack.c.bf16 %v12384_v16, %v12379_v38  ;;  %v12439_v26 = vld [vmem:[%s12826_s5 + $0xe0] sm:$0xff]  ;;  %v12444_v30 = vld [vmem:[%s12826_s5 + $0xe8] sm:$0xff]  ;;  %v12485_v1 = vld [vmem:[%s12826_s5 + $0xf0] sm:$0xff] }
 0x4b1   :  { %v6192_v22 = vsel %vm6073_vm14, %v13003_v63, 0.0  ;;  %v6193_v15 = vsel %vm6073_vm14, %v13004_v46, 0.0  ;;  %v6197_v60 = vadd.f32 %v6196_v7, %v6195_v23  ;;  %v8527_v32 = vpack.c.bf16 %v12396_v27, %v12389_v42  ;;  %8626 = vmatprep.subr.bf16.mxu0 %v8625_v50  ;;  %v7570_v45 = vld [vmem:[%s12826_s5 + $0x368] sm:$0xff] }
 0x4b2   :  { %v6194_v62 = vadd.f32 %v6193_v15, %v6192_v22  ;;  %v8529_v41 = vpack.c.bf16 %v12406_v10, %v12401_v37  ;;  %v5957_v17 = vadd.f32 %v11729_v35, %v11840_v40  ;;  %v5970_v44 = vadd.f32 %v5969_v12, %v12116_v52  ;;  %v7586_v35 = vld [vmem:[%s12826_s5 + $0x3e8] sm:$0xff]  ;;  %8520 = vmatpush3.bf16.msra.mxu1 %v8519_v58  ;;  %v12465_v40 = vld [vmem:[%s12826_s5 + $0x60] sm:$0xff] }
 0x4b3   :  { %v8531_v19 = vpack.c.bf16 %v12420_v49, %v12415_v14  ;;  %v6205_v36 = vsel %vm6073_vm14, %v6197_v60, 0.0  ;;  %v12454_v33 = vsel %vm6073_vm14, %v6599_v29, 0.0  ;;  %v12470_v52 = vld [vmem:[%s12826_s5 + $0x68] sm:$0xff]  ;;  %8628 = vmatpush3.bf16.msra.mxu0 %v8627_v53  ;;  %8522 = vmatprep.subr.bf16.mxu1 %v8521_v24  ;;  %v8533_v56 = vpack.c.bf16 %v12444_v30, %v12439_v26 }
 0x4b4   :  { %v6198_v8 = vsel %vm6073_vm14, %v6194_v62, 0.0  ;;  %v6206_v61 = vrot.slane %v6205_v36, 4  ;;  %v5961_v4 = vsel %vm5954_vm13, %v5957_v17, 0.0  ;;  %v5971_v5 = vrot.slane %v5970_v44, 2 }
 0x4b5   :  { %v6199_v12 = vrot.slane %v6198_v8, 4  ;;  %v5962_v51 = vrot.slane %v5961_v4, 4  ;;  %v6605_v2 = vadd.f32 %v11996_v25, %v6193_v15  ;;  %v6609_v29 = vadd.f32 %v6608_v6, %v6196_v7 }
 0x4b6   :  { %v6207_v6 = vadd.f32 %v6206_v61, %v6205_v36  ;;  %v5972_v47 = vadd.f32 %v5971_v5, %v5970_v44  ;;  %v8629_v57 = vpack.c.bf16 %v7586_v35, %v7585_v48  ;;  %v8535_v55 = vpack.c.bf16 %v12470_v52, %v12465_v40  ;;  %8524 = vmatpush3.bf16.msra.mxu1 %v8523_v3  ;;  %v7587_v36 = vld [vmem:[%s12826_s5 + $0x3f0] sm:$0xff]  ;;  %v7588_v48 = vld [vmem:[%s12826_s5 + $0x3f8] sm:$0xff] }
 0x4b7   :  { %v6200_v25 = vadd.f32 %v6199_v12, %v6198_v8  ;;  %v5963_v58 = vadd.f32 %v5962_v51, %v5961_v4  ;;  %v6607_v24 = vadd.f32 %v11863_v43, %v6605_v2  ;;  %v6611_v38 = vadd.f32 %v12454_v33, %v6609_v29  ;;  %8526 = vmatprep.subr.bf16.mxu1 %v8525_v20  ;;  %v7475_v35 = vld [vmem:[%s12826_s5 + $0x70] sm:$0xff]  ;;  %v7476_v12 = vld [vmem:[%s12826_s5 + $0x78] sm:$0xff] }
 0x4b8   :  { %v6208_v42 = vrot.slane %v6207_v6, 2  ;;  %v5973_v13 = vrot.slane %v5972_v47, 1  ;;  %8630 = vmatprep.subr.bf16.mxu0 %v8629_v57  ;;  %v8631_v27 = vpack.c.bf16 %v7570_v45, %v7569_v28  ;;  %v8537_v50 = vpack.c.bf16 %v12490_v39, %v12485_v1  ;;  %v7571_v29 = vld [vmem:[%s12826_s5 + $0x370] sm:$0xff]  ;;  %v7572_v28 = vld [vmem:[%s12826_s5 + $0x378] sm:$0xff] }
 0x4b9   :  { %v6201_v16 = vrot.slane %v6200_v25, 2  ;;  %v5964_v63 = vrot.slane %v5963_v58, 2  ;;  %v6612_v22 = vsel %vm6073_vm14, %v6607_v24, 0.0  ;;  %v6619_v53 = vsel %vm6073_vm14, %v6611_v38, 0.0 }
 0x4ba   :  { %v6209_v15 = vadd.f32 %v6208_v42, %v6207_v6  ;;  %v5974_v43 = vadd.f32 %v5973_v13, %v5972_v47  ;;  %v6613_v23 = vrot.slane %v6612_v22, 4  ;;  %8632 = vmatpush3.bf16.msra.mxu0 %v8631_v27  ;;  %v6620_v7 = vrot.slane %v6619_v53, 4  ;;  %8528 = vmatpush3.bf16.msra.mxu1 %v8527_v32  ;;  %v7509_v6 = vld [vmem:[%s12826_s5 + $0x180] sm:$0xff]  ;;  %v7510_v47 = vld [vmem:[%s12826_s5 + $0x188] sm:$0xff] }
 0x4bb   :  { %v6202_v46 = vadd.f32 %v6201_v16, %v6200_v25  ;;  %v5965_v3 = vadd.f32 %v5964_v63, %v5963_v58  ;;  %v7167_v62 = vadd.f32 %v7166_v54, %v12097_v34  ;;  %v7168_v20 = vsel %vm5954_vm13, %v11913_v11, 0.0  ;;  %8530 = vmatprep.subr.bf16.mxu1 %v8529_v41 }
 0x4bc   :  { %v6210_v17 = vrot.slane %v6209_v15, 1  ;;  %v5976_v44 = vmul.f32 0.25, %v5974_v43  ;;  %v6614_v8 = vadd.f32 %v6613_v23, %v6612_v22  ;;  %v6621_v54 = vadd.f32 %v6620_v7, %v6619_v53 }
 0x4bd   :  { %v6203_v60 = vrot.slane %v6202_v46, 1  ;;  %v5966_v34 = vrot.slane %v5965_v3, 1  ;;  %v7169_v11 = vrot.slane %v7168_v20, 4  ;;  %v7175_v32 = vsel %vm5954_vm13, %v7167_v62, 0.0 }
 0x4be   :  { %v6211_v4 = vadd.f32 %v6210_v17, %v6209_v15  ;;  %v6615_v5 = vrot.slane %v6614_v8, 2  ;;  %v7176_v51 = vrot.slane %v7175_v32, 4  ;;  %v6622_v37 = vrot.slane %v6621_v54, 2  ;;  %8532 = vmatpush3.bf16.msra.mxu1 %v8531_v19 }
 0x4bf   :  { %v6204_v61 = vadd.f32 %v6203_v60, %v6202_v46  ;;  %v5967_v2 = vadd.f32 %v5966_v34, %v5965_v3  ;;  %v7170_v10 = vadd.f32 %v7169_v11, %v7168_v20  ;;  %v8633_v41 = vpack.c.bf16 %v7588_v48, %v7587_v36  ;;  %8534 = vmatprep.subr.bf16.mxu1 %v8533_v56  ;;  %v13006_v36 = vld [vmem:[#allocation7_spill] sm:$0xff]  ;;  %v13007_v48 = vld [vmem:[#allocation9_spill] sm:$0xff] }
 0x4c0   :  { %v6213_v25 = vmul.f32 0.16666667, %v6211_v4  ;;  %v6616_v57 = vadd.f32 %v6615_v5, %v6614_v8  ;;  %v7177_v58 = vadd.f32 %v7176_v51, %v7175_v32  ;;  %v8539_v24 = vpack.c.bf16 %v7476_v12, %v7475_v35  ;;  %v13008_v11 = vld [vmem:[#allocation11_spill] sm:$0xff]  ;;  %v13009_v12 = vld [vmem:[#allocation8_spill] sm:$0xff] }
 0x4c1   :  { %v6212_v45 = vmul.f32 0.16666667, %v6204_v61  ;;  %v5975_v38 = vmul.f32 0.25, %v5967_v2  ;;  %v6623_v14 = vadd.f32 %v6622_v37, %v6621_v54  ;;  %v7171_v49 = vrot.slane %v7170_v10, 2  ;;  %8634 = vmatprep.subr.bf16.mxu0 %v8633_v41  ;;  %v13010_v5 = vld [vmem:[#allocation16_spill] sm:$0xff] }
 0x4c2   :  { %v6617_v16 = vrot.slane %v6616_v57, 1  ;;  %v7178_v42 = vrot.slane %v7177_v58, 2  ;;  %v8635_v13 = vpack.c.bf16 %v7572_v28, %v7571_v29  ;;  %v8541_v27 = vpack.c.bf16 %v7510_v47, %v7509_v6  ;;  %8536 = vmatpush3.bf16.msra.mxu1 %v8535_v55 }
 0x4c3   :  { %v12538_v19 = vsel %vm7374_vm15, %v6213_v25, %v6212_v45  ;;  %v12541_v63 = vsel %vm7374_vm15, %v5976_v44, %v5975_v38  ;;  %v6624_v22 = vrot.slane %v6623_v14, 1  ;;  %v7172_v53 = vadd.f32 %v7171_v49, %v7170_v10  ;;  %8538 = vmatprep.subr.bf16.mxu1 %v8537_v50  ;;  %v13011_v25 = vld [vmem:[#allocation17_spill] sm:$0xff] }
 0x4c4   :  { %v6618_v26 = vadd.f32 %v6617_v16, %v6616_v57  ;;  %v7179_v30 = vadd.f32 %v7178_v42, %v7177_v58  ;;  %8636 = vmatpush3.bf16.msra.mxu0 %v8635_v13  ;;  %v13005_v56 = vrot.slane %v11901_v21, %v9110_v0  ;;  %v7311_v15 = vsel %vm6073_vm14, %v12172_v9, 0.0 }
 0x4c5   :  { %v6625_v43 = vadd.f32 %v6624_v22, %v6623_v14  ;;  %v7173_v23 = vrot.slane %v7172_v53, 1  ;;  %v7312_v52 = vrot.slane %v7311_v15, 4  ;;  %v6368_v20 = vsel %vm5954_vm13, %v12319_v59, 0.0 }
 0x4c6   :  { %v7300_v46 = vsel %vm6073_vm14, %v13005_v56, 0.0  ;;  %v6626_v55 = vmul.f32 0.11111111, %v6618_v26  ;;  %v7180_v3 = vrot.slane %v7179_v30, 1  ;;  %8540 = vmatpush3.bf16.msra.mxu1 %v8539_v24  ;;  %v7024_v1 = vsel %vm6073_vm14, %v12369_v31, 0.0 }
 0x4c7   :  { %v7301_v40 = vadd.f32 %v7300_v46, %v12004_v18  ;;  %v6627_v7 = vmul.f32 0.11111111, %v6625_v43  ;;  %v7174_v62 = vadd.f32 %v7173_v23, %v7172_v53  ;;  %v7313_v21 = vadd.f32 %v7312_v52, %v7311_v15  ;;  %8542 = vmatprep.subr.bf16.mxu1 %v8541_v27 }
 0x4c8   :  { %v7181_v9 = vadd.f32 %v7180_v3, %v7179_v30  ;;  %v6367_v34 = vadd.f32 %v13007_v48, %v13006_v36  ;;  %v6369_v59 = vadd.f32 %v6368_v20, %v13008_v11  ;;  %v7023_v61 = vadd.f32 %v12004_v18, %v13009_v12  ;;  %v13013_v3 = vld [vmem:[#allocation13_spill] sm:$0xff] }
 0x4c9   :  { %v7304_v0 = vsel %vm6073_vm14, %v7301_v40, 0.0  ;;  %v12562_v39 = vsel %vm7374_vm15, %v6627_v7, %v6626_v55  ;;  %v7314_v50 = vrot.slane %v7313_v21, 2  ;;  %v7182_v17 = vmul.f32 0.25, %v7174_v62  ;;  %v13012_v55 = vld [vmem:[#allocation10_spill] sm:$0xff]  ;;  %v13014_v62 = vld [vmem:[#allocation12_spill] sm:$0xff] }
 0x4ca   :  { %v7305_v60 = vrot.slane %v7304_v0, 4  ;;  %v7183_v44 = vmul.f32 0.25, %v7181_v9  ;;  %v6372_v31 = vsel %vm5954_vm13, %v6367_v34, 0.0  ;;  %v6371_v51 = vadd.f32 %v13010_v5, %v6369_v59 }
 0x4cb   :  { %v7315_v54 = vadd.f32 %v7314_v50, %v7313_v21  ;;  %v6373_v2 = vrot.slane %v6372_v31, 4  ;;  %v7025_v37 = vadd.f32 %v7024_v1, %v12454_v33  ;;  %v7028_v41 = vsel %vm6073_vm14, %v7023_v61, 0.0 }
 0x4cc   :  { %v7306_v8 = vadd.f32 %v7305_v60, %v7304_v0  ;;  %v12568_v32 = vsel %vm7374_vm15, %v7183_v44, %v7182_v17  ;;  %v6379_v45 = vsel %vm5954_vm13, %v6371_v51, 0.0  ;;  %v7029_v58 = vrot.slane %v7028_v41, 4 }
 0x4cd   :  { %v7316_v4 = vrot.slane %v7315_v54, 1  ;;  %v6374_v28 = vadd.f32 %v6373_v2, %v6372_v31  ;;  %v7027_v6 = vadd.f32 %v13011_v25, %v7025_v37  ;;  %v6380_v57 = vrot.slane %v6379_v45, 4  ;;  %v7511_v25 = vld [vmem:[%s12826_s5 + $0x190] sm:$0xff] }
 0x4ce   :  { %v7307_v35 = vrot.slane %v7306_v8, 2  ;;  %v7030_v16 = vadd.f32 %v7029_v58, %v7028_v41  ;;  %v6783_v7 = vadd.f32 %v13013_v3, %v13012_v55  ;;  %v6795_v0 = vsel %vm5954_vm13, %v13014_v62, 0.0  ;;  %v7501_v3 = vld [vmem:[%s12826_s5 + $0x140] sm:$0xff]  ;;  %v7519_v62 = vld [vmem:[%s12826_s5 + $0x1d0] sm:$0xff] }
 0x4cf   :  { %v7317_v29 = vadd.f32 %v7316_v4, %v7315_v54  ;;  %v6375_v18 = vrot.slane %v6374_v28, 2  ;;  %v7035_v38 = vsel %vm6073_vm14, %v7027_v6, 0.0  ;;  %v6381_v49 = vadd.f32 %v6380_v57, %v6379_v45  ;;  %v7512_v6 = vld [vmem:[%s12826_s5 + $0x198] sm:$0xff] }
 0x4d0   :  { %v7308_v10 = vadd.f32 %v7307_v35, %v7306_v8  ;;  %v7036_v33 = vrot.slane %v7035_v38, 4  ;;  %v7031_v22 = vrot.slane %v7030_v16, 2  ;;  %v6796_v60 = vrot.slane %v6795_v0, 4 }
 0x4d1   :  { %v7319_v24 = vmul.f32 0.16666667, %v7317_v29  ;;  %v6376_v42 = vadd.f32 %v6375_v18, %v6374_v28  ;;  %v6382_v27 = vrot.slane %v6381_v49, 2  ;;  %v6788_v1 = vsel %vm5954_vm13, %v6783_v7, 0.0  ;;  %v7493_v29 = vld [vmem:[%s12826_s5 + $0x100] sm:$0xff]  ;;  %v7494_v28 = vld [vmem:[%s12826_s5 + $0x108] sm:$0xff] }
 0x4d2   :  { %v7309_v47 = vrot.slane %v7308_v10, 1  ;;  %v7037_v53 = vadd.f32 %v7036_v33, %v7035_v38  ;;  %v7032_v46 = vadd.f32 %v7031_v22, %v7030_v16  ;;  %v6789_v8 = vrot.slane %v6788_v1, 4  ;;  %v7513_v16 = vld [vmem:[%s12826_s5 + $0x1a0] sm:$0xff]  ;;  %v7502_v7 = vld [vmem:[%s12826_s5 + $0x148] sm:$0xff] }
 0x4d3   :  { %v6377_v26 = vrot.slane %v6376_v42, 1  ;;  %v6383_v56 = vadd.f32 %v6382_v27, %v6381_v49  ;;  %v6797_v36 = vadd.f32 %v6796_v60, %v6795_v0  ;;  %v8543_v58 = vpack.c.bf16 %v7494_v28, %v7493_v29  ;;  %v7496_v49 = vld [vmem:[%s12826_s5 + $0x118] sm:$0xff]  ;;  %v7498_v27 = vld [vmem:[%s12826_s5 + $0x128] sm:$0xff] }
 0x4d4   :  { %v7310_v14 = vadd.f32 %v7309_v47, %v7308_v10  ;;  %v7038_v15 = vrot.slane %v7037_v53, 2  ;;  %v7033_v40 = vrot.slane %v7032_v46, 1  ;;  %v6790_v11 = vadd.f32 %v6789_v8, %v6788_v1  ;;  %v7520_v0 = vld [vmem:[%s12826_s5 + $0x1d8] sm:$0xff]  ;;  %v7521_v1 = vld [vmem:[%s12826_s5 + $0x1e0] sm:$0xff] }
 0x4d5   :  { %v6378_v43 = vadd.f32 %v6377_v26, %v6376_v42  ;;  %v6384_v23 = vrot.slane %v6383_v56, 1  ;;  %v6798_v59 = vrot.slane %v6797_v36, 2  ;;  %v8545_v38 = vpack.c.bf16 %v7512_v6, %v7511_v25  ;;  %v7516_v26 = vld [vmem:[%s12826_s5 + $0x1b8] sm:$0xff]  ;;  %v7505_v8 = vld [vmem:[%s12826_s5 + $0x160] sm:$0xff]  ;;  %v7526_v6 = vld [vmem:[%s12826_s5 + $0x208] sm:$0xff] }
 0x4d6   :  { %v7318_v13 = vmul.f32 0.16666667, %v7310_v14  ;;  %v7039_v52 = vadd.f32 %v7038_v15, %v7037_v53  ;;  %v7034_v20 = vadd.f32 %v7033_v40, %v7032_v46  ;;  %v6791_v31 = vrot.slane %v6790_v11, 2  ;;  %v7495_v14 = vld [vmem:[%s12826_s5 + $0x110] sm:$0xff]  ;;  %v7517_v40 = vld [vmem:[%s12826_s5 + $0x1c0] sm:$0xff]  ;;  %v7504_v60 = vld [vmem:[%s12826_s5 + $0x158] sm:$0xff] }
 0x4d7   :  { %v6385_v21 = vadd.f32 %v6384_v23, %v6383_v56  ;;  %v6386_v50 = vmul.f32 0.16666667, %v6378_v43  ;;  %v6799_v12 = vadd.f32 %v6798_v59, %v6797_v36  ;;  %v7515_v53 = vld [vmem:[%s12826_s5 + $0x1b0] sm:$0xff]  ;;  %v7500_v23 = vld [vmem:[%s12826_s5 + $0x138] sm:$0xff]  ;;  %v7506_v36 = vld [vmem:[%s12826_s5 + $0x168] sm:$0xff] }
 0x4d8   :  { %v12580_v30 = vsel %vm7374_vm15, %v7319_v24, %v7318_v13  ;;  %v7040_v9 = vrot.slane %v7039_v52, 1  ;;  %v7042_v34 = vmul.f32 0.11111111, %v7034_v20  ;;  %v6792_v61 = vadd.f32 %v6791_v31, %v6790_v11  ;;  %v7497_v13 = vld [vmem:[%s12826_s5 + $0x120] sm:$0xff]  ;;  %v7499_v43 = vld [vmem:[%s12826_s5 + $0x130] sm:$0xff] }
 0x4d9   :  { %v6387_v17 = vmul.f32 0.16666667, %v6385_v21  ;;  %v6800_v4 = vrot.slane %v6799_v12, 1  ;;  %v8551_v46 = vpack.c.bf16 %v7498_v27, %v7497_v13  ;;  %v8553_v15 = vpack.c.bf16 %v7516_v26, %v7515_v53  ;;  %v7525_v25 = vld [vmem:[%s12826_s5 + $0x200] sm:$0xff]  ;;  %v7547_v13 = vld [vmem:[%s12826_s5 + $0x2b0] sm:$0xff]  ;;  %v7532_v26 = vld [vmem:[%s12826_s5 + $0x238] sm:$0xff] }
 0x4da   :  { %v7041_v44 = vadd.f32 %v7040_v9, %v7039_v52  ;;  %v6793_v5 = vrot.slane %v6792_v61, 1  ;;  %v8555_v52 = vpack.c.bf16 %v7500_v23, %v7499_v43  ;;  %v8559_v21 = vpack.c.bf16 %v7502_v7, %v7501_v3  ;;  %v7503_v9 = vld [vmem:[%s12826_s5 + $0x150] sm:$0xff]  ;;  %v7533_v23 = vld [vmem:[%s12826_s5 + $0x240] sm:$0xff] }
 0x4db   :  { %v12588_v48 = vsel %vm7374_vm15, %v6387_v17, %v6386_v50  ;;  %v6801_v51 = vadd.f32 %v6800_v4, %v6799_v12  ;;  %v8561_v20 = vpack.c.bf16 %v7520_v0, %v7519_v62  ;;  %v7522_v50 = vld [vmem:[%s12826_s5 + $0x1e8] sm:$0xff]  ;;  %v8563_v17 = vpack.c.bf16 %v7504_v60, %v7503_v9  ;;  %v7507_v4 = vld [vmem:[%s12826_s5 + $0x170] sm:$0xff]  ;;  %v7536_v62 = vld [vmem:[%s12826_s5 + $0x258] sm:$0xff] }
 0x4dc   :  { %v7043_v54 = vmul.f32 0.11111111, %v7041_v44  ;;  %v6794_v2 = vadd.f32 %v6793_v5, %v6792_v61  ;;  %v8565_v44 = vpack.c.bf16 %v7522_v50, %v7521_v1  ;;  %v8567_v59 = vpack.c.bf16 %v7506_v36, %v7505_v8  ;;  %v7508_v5 = vld [vmem:[%s12826_s5 + $0x178] sm:$0xff]  ;;  %v7531_v53 = vld [vmem:[%s12826_s5 + $0x230] sm:$0xff]  ;;  %v7553_v0 = vld [vmem:[%s12826_s5 + $0x2e0] sm:$0xff] }
 0x4dd   :  { %v6803_v37 = vmul.f32 0.16666667, %v6801_v51  ;;  %v7541_v51 = vld [vmem:[%s12826_s5 + $0x280] sm:$0xff]  ;;  %v8571_v28 = vpack.c.bf16 %v7508_v5, %v7507_v4  ;;  %v7535_v7 = vld [vmem:[%s12826_s5 + $0x250] sm:$0xff]  ;;  %v7538_v1 = vld [vmem:[%s12826_s5 + $0x268] sm:$0xff] }
 0x4de   :  { %v12591_v35 = vsel %vm7374_vm15, %v7043_v54, %v7042_v34  ;;  %v6802_v10 = vmul.f32 0.16666667, %v6794_v2  ;;  %v7523_v34 = vld [vmem:[%s12826_s5 + $0x1f0] sm:$0xff]  ;;  %v7524_v54 = vld [vmem:[%s12826_s5 + $0x1f8] sm:$0xff]  ;;  %v7542_v2 = vld [vmem:[%s12826_s5 + $0x288] sm:$0xff] }
 0x4df   :  { %v8569_v61 = vpack.c.bf16 %v7524_v54, %v7523_v34  ;;  %v7537_v60 = vld [vmem:[%s12826_s5 + $0x260] sm:$0xff]  ;;  %v7555_v50 = vld [vmem:[%s12826_s5 + $0x2f0] sm:$0xff]  ;;  %v7540_v34 = vld [vmem:[%s12826_s5 + $0x278] sm:$0xff] }
 0x4e0   :  { %v12594_v41 = vsel %vm7374_vm15, %v6803_v37, %v6802_v10  ;;  %v7539_v36 = vld [vmem:[%s12826_s5 + $0x270] sm:$0xff] }
 0x4e1   :  { %v8603_v54 = vpack.c.bf16 %v7540_v34, %v7539_v36 }
 0x508   :  { %v8653_v45 = vpop.permute.xlu1 %8652 }
 0x509   :  { %v8655_v47 = vunpack.i.h.bf16 %v8653_v45  ;;  %v8654_v57 = vunpack.i.l.bf16 %v8653_v45  ;;  %v8573_v45 = vpack.c.bf16 %v7542_v2, %v7541_v51  ;;  %v7927_v2 = vld [vmem:[%s12827_s6] ss:$0 sm:$0xff] }
 0x50b   :  { %v7454_v24 = vsel %vm3063_vm11, %v12538_v19, %v8654_v57  ;;  %v7453_v18 = vsel %vm3063_vm11, %v12541_v63, %v8655_v47  ;;  %v7514_v19 = vld [vmem:[%s12826_s5 + $0x1a8] sm:$0xff]  ;;  %v8547_v63 = vpack.c.bf16 %v7496_v49, %v7495_v14  ;;  %v7544_v47 = vld [vmem:[%s12826_s5 + $0x298] sm:$0xff]  ;;  %v7545_v49 = vld [vmem:[%s12826_s5 + $0x2a0] sm:$0xff] }
 0x50c   :  { %7660 = vmatprep.mubr.f32.mxu1 %v7454_v24  ;;  %v8549_v42 = vpack.c.bf16 %v7514_v19, %v7513_v16  ;;  %v7546_v16 = vld [vmem:[%s12826_s5 + $0x2a8] sm:$0xff] }
 0x50d   :  { %7661 = vmatmul.mubr.f32.vlgmr.msra.gmra.mrb[52].mxu1 %v7453_v18  ;;  %v7527_v18 = vld [vmem:[%s12826_s5 + $0x210] sm:$0xff] }
 0x50e   :  { %8544 = vmatpush3.bf16.msra.mxu1 %v8543_v58  ;;  %v8575_v58 = vpack.c.bf16 %v7526_v6, %v7525_v25 }
 0x50f   :  { %8546 = vmatprep.subr.bf16.mxu1 %v8545_v38  ;;  %v12624_v33 = vpop.permute.xlu0 %8657  ;;  %v7528_v38 = vld [vmem:[%s12826_s5 + $0x218] sm:$0xff] }
 0x510   :  { %v8659_v22 = vunpack.i.l.bf16 %v12624_v33 }
 0x512   :  { %8548 = vmatpush3.bf16.msra.mxu1 %v8547_v63  ;;  %v7456_v56 = vsel %vm3063_vm11, %v12562_v39, %v8659_v22  ;;  %v7518_v39 = vld [vmem:[%s12826_s5 + $0x1c8] sm:$0xff]  ;;  %v8579_v63 = vpack.c.bf16 %v7528_v38, %v7527_v18 }
 0x513   :  { %8550 = vmatprep.subr.bf16.mxu1 %v8549_v42  ;;  %7730 = vmatprep.mubr.f32.mxu1 %v7456_v56  ;;  %v8557_v55 = vpack.c.bf16 %v7518_v39, %v7517_v40  ;;  %v7530_v42 = vld [vmem:[%s12826_s5 + $0x228] sm:$0xff]  ;;  %v7549_v56 = vld [vmem:[%s12826_s5 + $0x2c0] sm:$0xff]  ;;  %v7551_v39 = vld [vmem:[%s12826_s5 + $0x2d0] sm:$0xff] }
 0x514   :  { %v7534_v40 = vld [vmem:[%s12826_s5 + $0x248] sm:$0xff] }
 0x516   :  { %8552 = vmatpush3.bf16.msra.mxu1 %v8551_v46  ;;  %v7550_v46 = vld [vmem:[%s12826_s5 + $0x2c8] sm:$0xff] }
 0x517   :  { %8554 = vmatprep.subr.bf16.mxu1 %v8553_v15  ;;  %v8587_v15 = vpack.c.bf16 %v7532_v26, %v7531_v53  ;;  %v8589_v43 = vpack.c.bf16 %v7550_v46, %v7549_v56 }
 0x51a   :  { %8556 = vmatpush3.bf16.msra.mxu1 %v8555_v52  ;;  %v12705_v29 = vpop.permute.xlu1 %8662  ;;  %v7552_v52 = vld [vmem:[%s12826_s5 + $0x2d8] sm:$0xff] }
 0x51b   :  { %8558 = vmatprep.subr.bf16.mxu1 %v8557_v55  ;;  %v8664_v57 = vunpack.i.l.bf16 %v12705_v29  ;;  %v8591_v55 = vpack.c.bf16 %v7534_v40, %v7533_v23  ;;  %v8593_v3 = vpack.c.bf16 %v7552_v52, %v7551_v39 }
 0x51d   :  { %v7458_v19 = vsel %vm3063_vm11, %v12591_v35, %v8664_v57  ;;  %v7548_v35 = vld [vmem:[%s12826_s5 + $0x2b8] sm:$0xff] }
 0x51e   :  { %8560 = vmatpush3.bf16.msra.mxu1 %v8559_v21  ;;  %v8585_v22 = vpack.c.bf16 %v7548_v35, %v7547_v13  ;;  %v7554_v21 = vld [vmem:[%s12826_s5 + $0x2e8] sm:$0xff] }
 0x51f   :  { %8562 = vmatprep.subr.bf16.mxu1 %v8561_v20  ;;  %v8595_v20 = vpack.c.bf16 %v7536_v62, %v7535_v7  ;;  %v8597_v9 = vpack.c.bf16 %v7554_v21, %v7553_v0 }
 0x522   :  { %v8668_v11 = vpop.permute.xlu0 %8667  ;;  %8564 = vmatpush3.bf16.msra.mxu1 %v8563_v17  ;;  %v7556_v17 = vld [vmem:[%s12826_s5 + $0x2f8] sm:$0xff] }
 0x523   :  { %v8670_v31 = vunpack.i.h.bf16 %v8668_v11  ;;  %v8669_v12 = vunpack.i.l.bf16 %v8668_v11  ;;  %8566 = vmatprep.subr.bf16.mxu1 %v8565_v44  ;;  %v8599_v44 = vpack.c.bf16 %v7538_v1, %v7537_v60  ;;  %v8601_v8 = vpack.c.bf16 %v7556_v17, %v7555_v50 }
 0x524   :  { %v8665_v11 = vunpack.i.h.bf16 %v12705_v29 }
 0x525   :  { %v7459_v37 = vsel %vm3063_vm11, %v12568_v32, %v8670_v31  ;;  %v7460_v10 = vsel %vm3063_vm11, %v12580_v30, %v8669_v12  ;;  %v8660_v32 = vunpack.i.h.bf16 %v12624_v33  ;;  %v7543_v30 = vld [vmem:[%s12826_s5 + $0x290] sm:$0xff]  ;;  %v8581_v33 = vpack.c.bf16 %v7546_v16, %v7545_v49 }
 0x526   :  { %7870 = vmatprep.mubr.f32.mxu0 %v7460_v10  ;;  %8568 = vmatpush3.bf16.msra.mxu1 %v8567_v59  ;;  %v8577_v24 = vpack.c.bf16 %v7544_v47, %v7543_v30  ;;  %v7457_v59 = vsel %vm3063_vm11, %v12594_v41, %v8665_v11 }
 0x527   :  { %7871 = vmatmul.mubr.f32.vlgmr.msra.gmra.mrb[98].mxu0 %v7459_v37  ;;  %8570 = vmatprep.subr.bf16.mxu1 %v8569_v61  ;;  %v7455_v14 = vsel %vm3063_vm11, %v12588_v48, %v8660_v32  ;;  %v7529_v48 = vld [vmem:[%s12826_s5 + $0x220] sm:$0xff]  ;;  %s8706_s5 = smov [#allocation2]  }
 0x528   :  { %v8583_v27 = vpack.c.bf16 %v7530_v42, %v7529_v48  ;;  %s7884_s13 = sshll.u32 %s8706_s5, 4  ;;  %s7885_s13 = int_to_ptr.vmem [resolvable:$true] %s7884_s13 }
 0x529   :  { %s8674_s14 = scalar_lea.vmem %s7885_s13, 32  ;;  %p8679_p1 = scmp.lt.s32.totalorder %s7885_s13, %s7885_s13 }
 0x52a   :  { %8572 = vmatpush3.bf16.msra.mxu1 %v8571_v28  ;;  %p8675_p0 = scmp.ne.s32.totalorder %s7885_s13, %s8674_s14  ;;  %p8680_p2 = scmp.lt.s32.totalorder %s8674_s14, %s8674_s14 }
 0x52b   :  { %8574 = vmatprep.subr.bf16.mxu1 %v8573_v45 }
 0x52c   :  { %p8681_p3 = por %p8680_p2, %p8679_p1 }
 0x52d   :  { %7731 = vmatmul.mubr.f32.vlgmr.msra.gmra.mrb[54].mxu1 %v7455_v14 }
 0x52e   :  { %8576 = vmatpush3.bf16.msra.mxu1 %v8575_v58  ;;  %7800 = vmatprep.mubr.f32.mxu1 %v7458_v19  ;;  %p8682_p4 = pnand %p8681_p3, %p8675_p0 }
 0x52f   :  { %8578 = vmatprep.subr.bf16.mxu1 %v8577_v24 }
 0x532   :  { %8580 = vmatpush3.bf16.msra.mxu1 %v8579_v63 }
 0x533   :  { %8582 = vmatprep.subr.bf16.mxu1 %v8581_v33 }
 0x536   :  { %8584 = vmatpush3.bf16.msra.mxu1 %v8583_v27 }
 0x537   :  { %8586 = vmatprep.subr.bf16.mxu1 %v8585_v22 }
 0x53a   :  { %8588 = vmatpush3.bf16.msra.mxu1 %v8587_v15 }
 0x53b   :  { %8590 = vmatprep.subr.bf16.mxu1 %v8589_v43 }
 0x53e   :  { %8592 = vmatpush3.bf16.msra.mxu1 %v8591_v55 }
 0x53f   :  { %8594 = vmatprep.subr.bf16.mxu1 %v8593_v3 }
 0x542   :  { %8596 = vmatpush3.bf16.msra.mxu1 %v8595_v20 }
 0x543   :  { %8598 = vmatprep.subr.bf16.mxu1 %v8597_v9 }
 0x546   :  { %8600 = vmatpush3.bf16.msra.mxu1 %v8599_v44 }
 0x547   :  { %8602 = vmatprep.subr.bf16.mxu1 %v8601_v8 }
 0x54a   :  { %8604 = vmatpush3.bf16.msra.mxu1 %v8603_v54 }
 0x54d   :  { %7801 = vmatmul.mubr.f32.vlgmr.msra.gmra.mrb[56].mxu1 %v7457_v59 }
 0x5e0   :  { %v8113_v31 = vpop.f32.mrb[52].mxu1 }
 0x5e1   :  { %v8114_v12 = vpop.f32.mrb[53].mxu1 }
 0x5e2   :  { %v8115_v61 = vadd.f32 %v8114_v12, %v8113_v31 }
 0x5e4   :  { %v7663_v28 = vadd.f32 %v8115_v61, %v7927_v2 }
 0x5fa   :  { %v8218_v4 = vpop.f32.mrb[98].mxu0 }
 0x5fb   :  { %v8219_v5 = vpop.f32.mrb[99].mxu0 }
 0x5fc   :  { %v8220_v51 = vadd.f32 %v8219_v5, %v8218_v4 }
 0x600   :  { %v8148_v37 = vpop.f32.mrb[54].mxu1 }
 0x601   :  { %v8149_v10 = vpop.f32.mrb[55].mxu1 }
 0x602   :  { %v8150_v45 = vadd.f32 %v8149_v10, %v8148_v37 }
 0x604   :  { %v7733_v29 = vadd.f32 %v8150_v45, %v7663_v28 }
 0x620   :  { %v8183_v25 = vpop.f32.mrb[56].mxu1 }
 0x621   :  { %v8184_v6 = vpop.f32.mrb[57].mxu1 }
 0x622   :  { %v8185_v32 = vadd.f32 %v8184_v6, %v8183_v25 }
 0x624   :  { %v7803_v41 = vadd.f32 %v8185_v32, %v7733_v29 }
 0x626   :  { %v7873_v30 = vadd.f32 %v8220_v51, %v7803_v41 }
 0x628   :  { %7877 = vst.msk [vmem:[#allocation2] sm:$0x3] %vm7876_vm0, %v7873_v30 }
 0x629   :  { %8685 = shalt.err (!%p8682_p4)
}
 0x62a   :  { %s8686_s16 = scalar_lea.hbm %s12828_s7, 32 }
 0x62b   :  { %p8687_p5 = scmp.ne.s32.totalorder %s12828_s7, %s8686_s16  ;;  %p8690_p6 = scmp.lt.u32.totalorder %s8686_s16, %s12828_s7 }
 0x62d   :  { %p8692_p7 = pnand %p8690_p6, %p8687_p5 }
 0x62f   :  { %8695 = shalt.err (!%p8692_p7)
}
 0x630   :  { %7887 = dma.vmem_to_hbm [thread:$0]  %s7885_s13, 32, %s12828_s7, [#allocation3]  }
 0x631   :  { %8696 = dma.done.wait [#allocation3], 32  }
 0x632   :  { %8697 = vsyncadd [#allocation3], 4294967264 }
 0x633   :  { %7891 = vsyncpa [#allocation3], 1 }

</bundles_post_ra>
